<compile_context>
chip_gen: v6e
topology: v6e:2x2x1
jax: 0.10.0
libtpu: 0.0.40
codegen_flags: <defaults>
</compile_context>

<pallas_src>
import functools

import jax
import jax.numpy as jnp
from jax.experimental import pallas as pl
from jax.experimental.pallas import tpu as pltpu


# --------------------------------------------------------------------------- #
# Decoder kernel: whole recurrence in one grid step (fori_loop over time).
# --------------------------------------------------------------------------- #
def _decoder_kernel(
    emb_ref,         # (T, Bb, M)   time-major embeddings for this batch block
    enc_ref,         # (Bb, P, E)   encoder features
    w_enc_att_ref,   # (E, A)
    b_att_ref,       # (1, A)       b_enc_att + b_dec_att (folded host-side)
    w_dec_att_ref,   # (D, A)
    w_full_ref,      # (1, A)       full_att weight as a lane vector
    w_lstm_ref,      # (M+E+D, 4D)  [w_ih ; w_hh] stacked host-side
    b_lstm_ref,      # (1, 4D)      b_ih + b_hh
    w_init_h_ref,    # (E, D)
    b_init_h_ref,    # (1, D)
    w_init_c_ref,    # (E, D)
    b_init_c_ref,    # (1, D)
    hseq_ref,        # (T, Bb, D)   out: hidden state per timestep
    alphas_ref,      # (T, Bb, P)   out: attention weights per timestep
    *,
    fuse_gates,
):
    T, Bb, M = emb_ref.shape
    _, P, E = enc_ref.shape
    D = hseq_ref.shape[2]
    A = w_enc_att_ref.shape[1]
    f32 = jnp.float32

    # Encoder features loaded once per grid step (reused by attention context).
    enc = enc_ref[...].astype(f32)                                   # (Bb, P, E)

    # ----- hoisted, time-invariant encoder attention projection (largest matmul)
    # Both attention biases folded in once (not re-added every timestep).
    att1 = (jnp.dot(enc.reshape(Bb * P, E), w_enc_att_ref[...],
                    preferred_element_type=f32)
            + b_att_ref[...]).reshape(Bb, P, A)                      # (Bb, P, A)

    # ----- initial hidden / cell state from mean-pooled encoder features -----
    mean_enc = jnp.mean(enc, axis=1)                                 # (Bb, E)
    h0 = (jnp.dot(mean_enc, w_init_h_ref[...], preferred_element_type=f32)
          + b_init_h_ref[...])
    c0 = (jnp.dot(mean_enc, w_init_c_ref[...], preferred_element_type=f32)
          + b_init_c_ref[...])

    # Only the unused last timestep slot needs zeroing (PyTorch loop runs
    # max_length - 1 iterations); the step loop overwrites t in [0, T-1).
    hseq_ref[T - 1] = jnp.zeros((Bb, D), hseq_ref.dtype)
    alphas_ref[T - 1] = jnp.zeros((Bb, P), alphas_ref.dtype)

    def step(t, carry):
        h, c = carry

        # --- soft attention (full_att bias omitted: softmax is shift-invariant)
        att2 = jnp.dot(h, w_dec_att_ref[...], preferred_element_type=f32)   # (Bb, A)
        rel = jnp.maximum(att1 + att2[:, None, :], 0.0)                     # (Bb, P, A)
        # N=1 matmul avoided: VPU multiply + lane reduce (no per-step reshape).
        scores = jnp.sum(rel * w_full_ref[...][None, :, :], axis=-1)        # (Bb, P)
        m = jnp.max(scores, axis=1, keepdims=True)
        e = jnp.exp(scores - m)
        alpha = e * pl.reciprocal(jnp.sum(e, axis=1, keepdims=True), approx=True)
        # M=1 batched matmul avoided: VPU broadcast-multiply + sublane reduce.
        context = jnp.sum(alpha[:, :, None] * enc, axis=1)                  # (Bb, E)

        # --- LSTMCell (PyTorch gate order i, f, g, o); input = [embedding, context]
        emb_t = emb_ref[t].astype(f32)                                      # (Bb, M)
        if fuse_gates:
            # One MXU push per step instead of three.
            x = jnp.concatenate([emb_t, context, h], axis=1)                # (Bb, M+E+D)
            gates = (jnp.dot(x, w_lstm_ref[...], preferred_element_type=f32)
                     + b_lstm_ref[...])                                     # (Bb, 4D)
        else:
            w_all = w_lstm_ref[...]
            gates = (jnp.dot(emb_t, w_all[:M, :], preferred_element_type=f32)
                     + jnp.dot(context, w_all[M:M + E, :], preferred_element_type=f32)
                     + jnp.dot(h, w_all[M + E:, :], preferred_element_type=f32)
                     + b_lstm_ref[...])
        i_g = jax.nn.sigmoid(gates[:, 0 * D:1 * D])
        f_g = jax.nn.sigmoid(gates[:, 1 * D:2 * D])
        g_g = jnp.tanh(gates[:, 2 * D:3 * D])
        o_g = jax.nn.sigmoid(gates[:, 3 * D:4 * D])
        c_new = f_g * c + i_g * g_g
        h_new = o_g * jnp.tanh(c_new)
        # TODO(synk): nn.Dropout(p=0.5) treated as identity (eval-mode forward);
        #             training-mode dropout has no deterministic equivalent here.

        hseq_ref[t] = h_new
        alphas_ref[t] = alpha
        return (h_new, c_new)

    jax.lax.fori_loop(0, T - 1, step, (h0, c0))


# --------------------------------------------------------------------------- #
# Vocab projection: one big tiled matmul over all (T-1)*B hidden states.
# --------------------------------------------------------------------------- #
def _fc_kernel(h_ref, w_ref, b_ref, o_ref):
    o_ref[...] = (jnp.dot(h_ref[...], w_ref[...], preferred_element_type=jnp.float32)
                  + b_ref[...]).astype(o_ref.dtype)


def _fc_forward(h_flat, w_fc, b_fc, vmem_limit):
    """((T-1)*B, D) @ (D, V).  Vocab axis outermost, row tiles iterate fastest
    so the (D, tn) weight tile stays resident across consecutive row tiles."""
    R, D = h_flat.shape
    V = w_fc.shape[1]
    tm = R if R <= 512 else 512        # R is a multiple of 8 (padded batch)
    tn = V if V <= 1024 else 1024      # multiple of 128 when tiled
    grid = (pl.cdiv(V, tn), pl.cdiv(R, tm))   # (vocab outermost, rows fastest)
    return pl.pallas_call(
        _fc_kernel,
        out_shape=jax.ShapeDtypeStruct((R, V), jnp.float32),
        grid_spec=pltpu.PrefetchScalarGridSpec(
            num_scalar_prefetch=0,
            grid=grid,
            in_specs=[
                pl.BlockSpec((tm, D), lambda j, i: (i, 0)),
                pl.BlockSpec((D, tn), lambda j, i: (0, j)),   # resident across i
                pl.BlockSpec((1, tn), lambda j, i: (0, j)),
            ],
            out_specs=pl.BlockSpec((tm, tn), lambda j, i: (i, j)),
        ),
        compiler_params=pltpu.CompilerParams(
            dimension_semantics=("parallel", "arbitrary"),
            vmem_limit_bytes=vmem_limit,
        ),
    )(h_flat, w_fc, b_fc)


# --------------------------------------------------------------------------- #
# Wrapper
# --------------------------------------------------------------------------- #
def _tpu_kind():
    try:
        d = jax.devices()[0]
        if d.platform != "tpu":
            return ""
        return d.device_kind.lower()
    except Exception:
        return ""


def _run_decoder(emb_t, enc, w, *, Bb, n_bblk, vmem_limit,
                 single_buffer_weights, fuse_gates):
    T, B_pad, M = emb_t.shape
    _, P, E = enc.shape
    D = w["w_init_h"].shape[1]

    def fixed(a):
        nd = a.ndim
        idx = lambda b, _nd=nd: (0,) * _nd
        if single_buffer_weights:
            # Grid-invariant weights: no point double-buffering them.
            return pl.BlockSpec(a.shape, idx, pipeline_mode=pl.Buffered(1))
        return pl.BlockSpec(a.shape, idx)

    in_specs = [
        pl.BlockSpec((T, Bb, M), lambda b: (0, b, 0)),     # embeddings (time-major)
        pl.BlockSpec((Bb, P, E), lambda b: (b, 0, 0)),     # encoder features
        fixed(w["w_enc_att"]), fixed(w["b_att"]),
        fixed(w["w_dec_att"]), fixed(w["w_full_row"]),
        fixed(w["w_lstm"]), fixed(w["b_lstm"]),
        fixed(w["w_init_h"]), fixed(w["b_init_h"]),
        fixed(w["w_init_c"]), fixed(w["b_init_c"]),
    ]
    out_specs = [
        pl.BlockSpec((T, Bb, D), lambda b: (0, b, 0)),
        pl.BlockSpec((T, Bb, P), lambda b: (0, b, 0)),
    ]
    kernel = functools.partial(_decoder_kernel, fuse_gates=fuse_gates)
    return pl.pallas_call(
        kernel,
        out_shape=(
            jax.ShapeDtypeStruct((T, B_pad, D), jnp.float32),
            jax.ShapeDtypeStruct((T, B_pad, P), jnp.float32),
        ),
        grid_spec=pltpu.PrefetchScalarGridSpec(
            num_scalar_prefetch=0,
            grid=(n_bblk,),
            in_specs=in_specs,
            out_specs=out_specs,
        ),
        compiler_params=pltpu.CompilerParams(
            dimension_semantics=("parallel",),             # batch blocks independent
            vmem_limit_bytes=vmem_limit,
        ),
    )(emb_t, enc,
      w["w_enc_att"], w["b_att"], w["w_dec_att"], w["w_full_row"],
      w["w_lstm"], w["b_lstm"],
      w["w_init_h"], w["b_init_h"], w["w_init_c"], w["b_init_c"])


def decoder_with_attention_forward(encoder_out, captions, lengths, params):
    """encoder_out: (B, encoder_dim, num_pixels), captions: (B, max_len) int32.
    lengths only determine max_length (= max(lengths)), matching the reference
    forward which never truncates the batch per timestep."""
    B, E, P = encoder_out.shape
    T = int(max(lengths))
    M = params["embedding"].shape[1]
    D = params["w_hh"].shape[0]
    V = params["w_fc"].shape[1]

    if T <= 1:
        return (jnp.zeros((B, T, V), jnp.float32),
                jnp.zeros((B, T, P), jnp.float32))

    # ----- generation-aware configuration -------------------------------------
    kind = _tpu_kind()
    is_v7 = ("v7" in kind) or ("7x" in kind)
    if is_v7:
        vmem_limit = 48 * 1024 * 1024       # 64 MiB physical: leave headroom
    elif ("v5 lite" in kind) or ("v5e" in kind) or ("v6" in kind):
        vmem_limit = 100 * 1024 * 1024      # 128 MiB physical parts
    else:
        vmem_limit = 64 * 1024 * 1024

    # Pad batch to a multiple of 8 (full sublanes).  Split the batch-block grid
    # axis only where there are 2 TensorCores per chip (v7x megacore); on
    # single-TC chips the grid is a serial loop and splitting just shrinks M.
    B_pad = max(8, ((B + 7) // 8) * 8)
    n_bblk = 2 if (is_v7 and B_pad >= 16 and B_pad % 16 == 0) else 1
    Bb = B_pad // n_bblk

    enc = jnp.transpose(encoder_out, (0, 2, 1)).astype(jnp.float32)   # (B, P, E)
    enc = jnp.pad(enc, ((0, B_pad - B), (0, 0), (0, 0)))
    emb = params["embedding"][captions[:, :T]]                        # (B, T, M) (glue: gather)
    emb_t = jnp.transpose(emb, (1, 0, 2))                             # (T, B, M)
    emb_t = jnp.pad(emb_t, ((0, 0), (0, B_pad - B), (0, 0)))

    # Host-side weight prep: fused LSTM weight / bias and folded attention bias.
    w = {
        "w_enc_att": params["w_enc_att"],
        "b_att": params["b_enc_att"] + params["b_dec_att"],           # folded once
        "w_dec_att": params["w_dec_att"],
        "w_full_row": params["w_full_att"].T,                         # (1, A)
        "w_lstm": jnp.concatenate([params["w_ih"], params["w_hh"]], axis=0),
        "b_lstm": params["b_ih"] + params["b_hh"],
        "w_init_h": params["w_init_h"], "b_init_h": params["b_init_h"],
        "w_init_c": params["w_init_c"], "b_init_c": params["b_init_c"],
    }

    try:
        hseq, alphas_p = _run_decoder(
            emb_t, enc, w, Bb=Bb, n_bblk=n_bblk, vmem_limit=vmem_limit,
            single_buffer_weights=True, fuse_gates=True)
    except Exception:
        # Conservative fallback if this Pallas build rejects single-buffered
        # BlockSpecs or the unaligned lane-dim concatenation.
        hseq, alphas_p = _run_decoder(
            emb_t, enc, w, Bb=Bb, n_bblk=n_bblk, vmem_limit=vmem_limit,
            single_buffer_weights=False, fuse_gates=False)

    # Vocab projection batched over all (T-1)*B_pad hidden states at once.
    h_flat = hseq[:T - 1].reshape((T - 1) * B_pad, D)
    preds_flat = _fc_forward(h_flat, params["w_fc"], params["b_fc"], vmem_limit)
    preds_body = preds_flat.reshape(T - 1, B_pad, V)[:, :B, :]        # (T-1, B, V)
    predictions = jnp.concatenate(
        [jnp.transpose(preds_body, (1, 0, 2)),
         jnp.zeros((B, 1, V), jnp.float32)], axis=1)                  # (B, T, V)
    alphas = jnp.transpose(alphas_p[:, :B, :], (1, 0, 2))             # (B, T, P)
    return predictions, alphas


# --------------------------------------------------------------------------- #
# Parameter init + pure-JAX reference
# --------------------------------------------------------------------------- #
def make_params(key, *, attention_dim, embed_dim, decoder_dim, vocab_size, encoder_dim):
    """Deterministic parameter init (mirrors module __init__ shapes; weights stored
    transposed as (in, out) for right-multiplication)."""
    ks = jax.random.split(key, 16)

    def lin(kw, kb, fan_in, fan_out):
        bound = 1.0 / jnp.sqrt(fan_in)
        w = jax.random.uniform(kw, (fan_in, fan_out), jnp.float32, -bound, bound)
        b = jax.random.uniform(kb, (1, fan_out), jnp.float32, -bound, bound)
        return w, b

    p = {}
    # Attention(encoder_dim, decoder_dim, attention_dim)
    p["w_enc_att"], p["b_enc_att"] = lin(ks[0], ks[1], encoder_dim, attention_dim)
    p["w_dec_att"], p["b_dec_att"] = lin(ks[2], ks[3], decoder_dim, attention_dim)
    p["w_full_att"], p["b_full_att"] = lin(ks[4], ks[5], attention_dim, 1)  # (A,1), (1,1)
    # Embedding: uniform(-0.1, 0.1) per init_weights
    p["embedding"] = jax.random.uniform(ks[6], (vocab_size, embed_dim),
                                        jnp.float32, -0.1, 0.1)
    # LSTMCell(embed_dim + encoder_dim, decoder_dim)
    bound = 1.0 / jnp.sqrt(decoder_dim)
    p["w_ih"] = jax.random.uniform(ks[7], (embed_dim + encoder_dim, 4 * decoder_dim),
                                   jnp.float32, -bound, bound)
    p["b_ih"] = jax.random.uniform(ks[8], (1, 4 * decoder_dim), jnp.float32, -bound, bound)
    p["w_hh"] = jax.random.uniform(ks[9], (decoder_dim, 4 * decoder_dim),
                                   jnp.float32, -bound, bound)
    p["b_hh"] = jax.random.uniform(ks[10], (1, 4 * decoder_dim), jnp.float32, -bound, bound)
    # fc: weight uniform(-0.1, 0.1), bias 0 per init_weights
    p["w_fc"] = jax.random.uniform(ks[11], (decoder_dim, vocab_size), jnp.float32, -0.1, 0.1)
    p["b_fc"] = jnp.zeros((1, vocab_size), jnp.float32)
    # init_h / init_c
    p["w_init_h"], p["b_init_h"] = lin(ks[12], ks[13], encoder_dim, decoder_dim)
    p["w_init_c"], p["b_init_c"] = lin(ks[14], ks[15], encoder_dim, decoder_dim)
    return p


def reference_forward(encoder_out, captions, lengths, p):
    """Pure-JAX reference mirroring the PyTorch forward (dropout = identity)."""
    hp = jax.lax.Precision.HIGHEST
    enc = jnp.transpose(encoder_out, (0, 2, 1))
    B, P, E = enc.shape
    T = int(max(lengths))
    D = p["w_hh"].shape[0]
    V = p["w_fc"].shape[1]
    emb = p["embedding"][captions[:, :T]]
    mean_enc = enc.mean(axis=1)
    h = jnp.dot(mean_enc, p["w_init_h"], precision=hp) + p["b_init_h"]
    c = jnp.dot(mean_enc, p["w_init_c"], precision=hp) + p["b_init_c"]
    predictions = jnp.zeros((B, T, V), jnp.float32)
    alphas = jnp.zeros((B, T, P), jnp.float32)
    for t in range(T - 1):
        att1 = jnp.einsum("bpe,ea->bpa", enc, p["w_enc_att"], precision=hp) + p["b_enc_att"]
        att2 = jnp.dot(h, p["w_dec_att"], precision=hp) + p["b_dec_att"]
        rel = jnp.maximum(att1 + att2[:, None, :], 0.0)
        scores = (jnp.einsum("bpa,a->bp", rel, p["w_full_att"][:, 0], precision=hp)
                  + p["b_full_att"][0, 0])
        alpha = jax.nn.softmax(scores, axis=1)
        context = jnp.sum(enc * alpha[:, :, None], axis=1)
        x = jnp.concatenate([emb[:, t, :], context], axis=1)
        gates = (jnp.dot(x, p["w_ih"], precision=hp) + p["b_ih"]
                 + jnp.dot(h, p["w_hh"], precision=hp) + p["b_hh"])
        i_g = jax.nn.sigmoid(gates[:, 0 * D:1 * D])
        f_g = jax.nn.sigmoid(gates[:, 1 * D:2 * D])
        g_g = jnp.tanh(gates[:, 2 * D:3 * D])
        o_g = jax.nn.sigmoid(gates[:, 3 * D:4 * D])
        c = f_g * c + i_g * g_g
        h = o_g * jnp.tanh(c)
        preds = jnp.dot(h, p["w_fc"], precision=hp) + p["b_fc"]
        predictions = predictions.at[:, t, :].set(preds)
        alphas = alphas.at[:, t, :].set(alpha)
    return predictions, alphas


if __name__ == "__main__":
    # Small shapes consistent with the module's forward signature.
    B = 2            # batch
    ENCODER_DIM = 32
    NUM_PIXELS = 16
    ATTENTION_DIM = 16
    EMBED_DIM = 16
    DECODER_DIM = 32
    VOCAB = 64
    MAX_LEN = 8

    key = jax.random.PRNGKey(0)
    k_enc, k_cap, k_param = jax.random.split(key, 3)

    encoder_out = jax.random.normal(k_enc, (B, ENCODER_DIM, NUM_PIXELS), jnp.float32)
    captions = jax.random.randint(k_cap, (B, MAX_LEN), 0, VOCAB, jnp.int32)
    lengths = [MAX_LEN, MAX_LEN - 2]

    params = make_params(k_param,
                         attention_dim=ATTENTION_DIM, embed_dim=EMBED_DIM,
                         decoder_dim=DECODER_DIM, vocab_size=VOCAB,
                         encoder_dim=ENCODER_DIM)

    preds, alphas = decoder_with_attention_forward(encoder_out, captions, lengths, params)
    jax.block_until_ready((preds, alphas))

    preds_ref, alphas_ref = reference_forward(encoder_out, captions, lengths, params)
    assert preds.shape == (B, MAX_LEN, VOCAB) and alphas.shape == (B, MAX_LEN, NUM_PIXELS)
    assert jnp.allclose(preds, preds_ref, atol=5e-3, rtol=5e-3)
    assert jnp.allclose(alphas, alphas_ref, atol=5e-3, rtol=5e-3)

    print("KERNEL_OK")
</pallas_src>

<mosaic_0001>
module attributes {stable_mosaic.version = 11 : i64} {
  func.func @_decoder_kernel(%arg0: i32, %arg1: memref<8x8x16xf32, #tpu.memory_space<vmem>>, %arg2: memref<8x16x32xf32, #tpu.memory_space<vmem>>, %arg3: memref<32x16xf32, #tpu.memory_space<vmem>>, %arg4: memref<1x16xf32, #tpu.memory_space<vmem>>, %arg5: memref<32x16xf32, #tpu.memory_space<vmem>>, %arg6: memref<1x16xf32, #tpu.memory_space<vmem>>, %arg7: memref<80x128xf32, #tpu.memory_space<vmem>>, %arg8: memref<1x128xf32, #tpu.memory_space<vmem>>, %arg9: memref<32x32xf32, #tpu.memory_space<vmem>>, %arg10: memref<1x32xf32, #tpu.memory_space<vmem>>, %arg11: memref<32x32xf32, #tpu.memory_space<vmem>>, %arg12: memref<1x32xf32, #tpu.memory_space<vmem>>, %arg13: memref<8x8x32xf32, #tpu.memory_space<vmem>>, %arg14: memref<8x8x16xf32, #tpu.memory_space<vmem>>) attributes {dimension_semantics = [#tpu.dimension_semantics<parallel>], iteration_bounds = array<i64: 1>, scalar_prefetch = 0 : i64, scratch_operands = 0 : i64, tpu.core_type = #tpu.core_type<tc>, window_params = [{transform_indices = @transform_0, window_bounds = array<i64: 8, 8, 16>}, {transform_indices = @transform_1, window_bounds = array<i64: 8, 16, 32>}, {pipeline_mode = #tpu.pipeline_mode<synchronous>, transform_indices = @transform_2, window_bounds = array<i64: 32, 16>}, {pipeline_mode = #tpu.pipeline_mode<synchronous>, transform_indices = @transform_3, window_bounds = array<i64: 1, 16>}, {pipeline_mode = #tpu.pipeline_mode<synchronous>, transform_indices = @transform_4, window_bounds = array<i64: 32, 16>}, {pipeline_mode = #tpu.pipeline_mode<synchronous>, transform_indices = @transform_5, window_bounds = array<i64: 1, 16>}, {pipeline_mode = #tpu.pipeline_mode<synchronous>, transform_indices = @transform_6, window_bounds = array<i64: 80, 128>}, {pipeline_mode = #tpu.pipeline_mode<synchronous>, transform_indices = @transform_7, window_bounds = array<i64: 1, 128>}, {pipeline_mode = #tpu.pipeline_mode<synchronous>, transform_indices = @transform_8, window_bounds = array<i64: 32, 32>}, {pipeline_mode = #tpu.pipeline_mode<synchronous>, transform_indices = @transform_9, window_bounds = array<i64: 1, 32>}, {pipeline_mode = #tpu.pipeline_mode<synchronous>, transform_indices = @transform_10, window_bounds = array<i64: 32, 32>}, {pipeline_mode = #tpu.pipeline_mode<synchronous>, transform_indices = @transform_11, window_bounds = array<i64: 1, 32>}, {transform_indices = @transform_12, window_bounds = array<i64: 8, 8, 32>}, {transform_indices = @transform_13, window_bounds = array<i64: 8, 8, 16>}]} {
    %c0 = arith.constant 0 : index
    %c0_0 = arith.constant 0 : index
    %c0_1 = arith.constant 0 : index
    %0 = vector.load %arg2[%c0, %c0_0, %c0_1] : memref<8x16x32xf32, #tpu.memory_space<vmem>>, vector<8x16x32xf32>
    %1 = vector.shape_cast %0 : vector<8x16x32xf32> to vector<128x32xf32>
    %c0_2 = arith.constant 0 : index
    %c0_3 = arith.constant 0 : index
    %2 = vector.load %arg3[%c0_2, %c0_3] : memref<32x16xf32, #tpu.memory_space<vmem>>, vector<32x16xf32>
    %cst = arith.constant dense<0.000000e+00> : vector<128x16xf32>
    %3 = tpu.matmul %1, %2, %cst {dimension_numbers = #tpu.dot_dimension_numbers<[1], [0], [0], [1], [0, 0, 1, 1], [], []>} : vector<128x32xf32>, vector<32x16xf32>, vector<128x16xf32> -> vector<128x16xf32>
    %c0_4 = arith.constant 0 : index
    %c0_5 = arith.constant 0 : index
    %4 = vector.load %arg4[%c0_4, %c0_5] : memref<1x16xf32, #tpu.memory_space<vmem>>, vector<1x16xf32>
    %5 = vector.broadcast %4 : vector<1x16xf32> to vector<128x16xf32>
    %6 = arith.addf %3, %5 : vector<128x16xf32>
    %7 = vector.shape_cast %6 : vector<128x16xf32> to vector<8x16x16xf32>
    %cst_6 = arith.constant dense<0.000000e+00> : vector<8x32xf32>
    %8 = vector.multi_reduction <add>, %0, %cst_6 [1] : vector<8x16x32xf32> to vector<8x32xf32>
    %cst_7 = arith.constant 1.600000e+01 : f32
    %9 = vector.broadcast %cst_7 : f32 to vector<8x32xf32>
    %10 = arith.divf %8, %9 : vector<8x32xf32>
    %c0_8 = arith.constant 0 : index
    %c0_9 = arith.constant 0 : index
    %11 = vector.load %arg9[%c0_8, %c0_9] : memref<32x32xf32, #tpu.memory_space<vmem>>, vector<32x32xf32>
    %cst_10 = arith.constant dense<0.000000e+00> : vector<8x32xf32>
    %12 = tpu.matmul %10, %11, %cst_10 {dimension_numbers = #tpu.dot_dimension_numbers<[1], [0], [0], [1], [0, 0, 1, 1], [], []>} : vector<8x32xf32>, vector<32x32xf32>, vector<8x32xf32> -> vector<8x32xf32>
    %c0_11 = arith.constant 0 : index
    %c0_12 = arith.constant 0 : index
    %13 = vector.load %arg10[%c0_11, %c0_12] : memref<1x32xf32, #tpu.memory_space<vmem>>, vector<1x32xf32>
    %14 = vector.broadcast %13 : vector<1x32xf32> to vector<8x32xf32>
    %15 = arith.addf %12, %14 : vector<8x32xf32>
    %c0_13 = arith.constant 0 : index
    %c0_14 = arith.constant 0 : index
    %16 = vector.load %arg11[%c0_13, %c0_14] : memref<32x32xf32, #tpu.memory_space<vmem>>, vector<32x32xf32>
    %cst_15 = arith.constant dense<0.000000e+00> : vector<8x32xf32>
    %17 = tpu.matmul %10, %16, %cst_15 {dimension_numbers = #tpu.dot_dimension_numbers<[1], [0], [0], [1], [0, 0, 1, 1], [], []>} : vector<8x32xf32>, vector<32x32xf32>, vector<8x32xf32> -> vector<8x32xf32>
    %c0_16 = arith.constant 0 : index
    %c0_17 = arith.constant 0 : index
    %18 = vector.load %arg12[%c0_16, %c0_17] : memref<1x32xf32, #tpu.memory_space<vmem>>, vector<1x32xf32>
    %19 = vector.broadcast %18 : vector<1x32xf32> to vector<8x32xf32>
    %20 = arith.addf %17, %19 : vector<8x32xf32>
    %cst_18 = arith.constant 0.000000e+00 : f32
    %21 = vector.broadcast %cst_18 : f32 to vector<8x32xf32>
    %c7 = arith.constant 7 : index
    %c0_19 = arith.constant 0 : index
    %c0_20 = arith.constant 0 : index
    %22 = vector.load %arg13[%c7, %c0_19, %c0_20] : memref<8x8x32xf32, #tpu.memory_space<vmem>>, vector<1x8x32xf32>
    %23 = vector.shape_cast %22 : vector<1x8x32xf32> to vector<8x32xf32>
    %24 = vector.shape_cast %21 : vector<8x32xf32> to vector<1x8x32xf32>
    tpu.vector_store %arg13[%c7, %c0_19, %c0_20], %24 {strides = array<i32>} : memref<8x8x32xf32, #tpu.memory_space<vmem>>, vector<1x8x32xf32>,
    %cst_21 = arith.constant 0.000000e+00 : f32
    %25 = vector.broadcast %cst_21 : f32 to vector<8x16xf32>
    %c7_22 = arith.constant 7 : index
    %c0_23 = arith.constant 0 : index
    %c0_24 = arith.constant 0 : index
    %26 = vector.load %arg14[%c7_22, %c0_23, %c0_24] : memref<8x8x16xf32, #tpu.memory_space<vmem>>, vector<1x8x16xf32>
    %27 = vector.shape_cast %26 : vector<1x8x16xf32> to vector<8x16xf32>
    %28 = vector.shape_cast %25 : vector<8x16xf32> to vector<1x8x16xf32>
    tpu.vector_store %arg14[%c7_22, %c0_23, %c0_24], %28 {strides = array<i32>} : memref<8x8x16xf32, #tpu.memory_space<vmem>>, vector<1x8x16xf32>,
    %c0_i32 = arith.constant 0 : i32
    %c7_i32 = arith.constant 7 : i32
    %29 = arith.addi %c0_i32, %c7_i32 : i32
    %c1_i32 = arith.constant 1 : i32
    %30:2 = scf.for %arg15 = %c0_i32 to %29 step %c1_i32 iter_args(%arg16 = %15, %arg17 = %20) -> (vector<8x32xf32>, vector<8x32xf32>)  : i32 {
      %c0_26 = arith.constant 0 : index
      %c0_27 = arith.constant 0 : index
      %31 = vector.load %arg5[%c0_26, %c0_27] : memref<32x16xf32, #tpu.memory_space<vmem>>, vector<32x16xf32>
      %cst_28 = arith.constant dense<0.000000e+00> : vector<8x16xf32>
      %32 = tpu.matmul %arg16, %31, %cst_28 {dimension_numbers = #tpu.dot_dimension_numbers<[1], [0], [0], [1], [0, 0, 1, 1], [], []>} : vector<8x32xf32>, vector<32x16xf32>, vector<8x16xf32> -> vector<8x16xf32>
      %33 = vector.shape_cast %32 : vector<8x16xf32> to vector<8x1x16xf32>
      %34 = vector.broadcast %33 : vector<8x1x16xf32> to vector<8x16x16xf32>
      %35 = arith.addf %7, %34 : vector<8x16x16xf32>
      %cst_29 = arith.constant 0.000000e+00 : f32
      %36 = vector.broadcast %cst_29 : f32 to vector<8x16x16xf32>
      %37 = arith.maximumf %35, %36 : vector<8x16x16xf32>
      %c0_30 = arith.constant 0 : index
      %c0_31 = arith.constant 0 : index
      %38 = vector.load %arg6[%c0_30, %c0_31] : memref<1x16xf32, #tpu.memory_space<vmem>>, vector<1x16xf32>
      %39 = vector.shape_cast %38 : vector<1x16xf32> to vector<1x1x16xf32>
      %40 = vector.broadcast %39 : vector<1x1x16xf32> to vector<8x16x16xf32>
      %41 = arith.mulf %37, %40 : vector<8x16x16xf32>
      %cst_32 = arith.constant dense<0.000000e+00> : vector<8x16xf32>
      %42 = vector.multi_reduction <add>, %41, %cst_32 [2] : vector<8x16x16xf32> to vector<8x16xf32>
      %cst_33 = arith.constant dense<0xFF800000> : vector<8xf32>
      %43 = vector.multi_reduction <maximumf>, %42, %cst_33 [1] : vector<8x16xf32> to vector<8xf32>
      %44 = vector.shape_cast %43 : vector<8xf32> to vector<8x1xf32>
      %45 = vector.broadcast %44 : vector<8x1xf32> to vector<8x16xf32>
      %46 = arith.subf %42, %45 : vector<8x16xf32>
      %47 = math.exp %46 : vector<8x16xf32>
      %cst_34 = arith.constant dense<0.000000e+00> : vector<8xf32>
      %48 = vector.multi_reduction <add>, %47, %cst_34 [1] : vector<8x16xf32> to vector<8xf32>
      %49 = vector.shape_cast %48 : vector<8xf32> to vector<8x1xf32>
      %50 = tpu.reciprocal %49 {approx = true} : vector<8x1xf32> -> vector<8x1xf32>
      %51 = vector.broadcast %50 : vector<8x1xf32> to vector<8x16xf32>
      %52 = arith.mulf %47, %51 : vector<8x16xf32>
      %53 = vector.shape_cast %52 : vector<8x16xf32> to vector<8x16x1xf32>
      %54 = vector.broadcast %53 : vector<8x16x1xf32> to vector<8x16x32xf32>
      %55 = arith.mulf %54, %0 : vector<8x16x32xf32>
      %cst_35 = arith.constant dense<0.000000e+00> : vector<8x32xf32>
      %56 = vector.multi_reduction <add>, %55, %cst_35 [1] : vector<8x16x32xf32> to vector<8x32xf32>
      %57 = arith.index_cast %arg15 : i32 to index
      %c0_36 = arith.constant 0 : index
      %c0_37 = arith.constant 0 : index
      %58 = vector.load %arg1[%57, %c0_36, %c0_37] : memref<8x8x16xf32, #tpu.memory_space<vmem>>, vector<1x8x16xf32>
      %59 = vector.shape_cast %58 : vector<1x8x16xf32> to vector<8x16xf32>
      %60 = tpu.concatenate %59, %56, %arg16 in 1 : vector<8x16xf32>, vector<8x32xf32>, vector<8x32xf32> -> vector<8x80xf32>
      %c0_38 = arith.constant 0 : index
      %c0_39 = arith.constant 0 : index
      %61 = vector.load %arg7[%c0_38, %c0_39] : memref<80x128xf32, #tpu.memory_space<vmem>>, vector<80x128xf32>
      %cst_40 = arith.constant dense<0.000000e+00> : vector<8x128xf32>
      %62 = tpu.matmul %60, %61, %cst_40 {dimension_numbers = #tpu.dot_dimension_numbers<[1], [0], [0], [1], [0, 0, 1, 1], [], []>} : vector<8x80xf32>, vector<80x128xf32>, vector<8x128xf32> -> vector<8x128xf32>
      %c0_41 = arith.constant 0 : index
      %c0_42 = arith.constant 0 : index
      %63 = vector.load %arg8[%c0_41, %c0_42] : memref<1x128xf32, #tpu.memory_space<vmem>>, vector<1x128xf32>
      %64 = vector.broadcast %63 : vector<1x128xf32> to vector<8x128xf32>
      %65 = arith.addf %62, %64 : vector<8x128xf32>
      %66 = vector.extract_strided_slice %65 {offsets = [0, 0], sizes = [8, 32], strides = [1, 1]} : vector<8x128xf32> to vector<8x32xf32>
      %67 = arith.negf %66 : vector<8x32xf32>
      %68 = math.exp %67 : vector<8x32xf32>
      %cst_43 = arith.constant 1.000000e+00 : f32
      %69 = vector.broadcast %cst_43 : f32 to vector<8x32xf32>
      %70 = arith.addf %69, %68 : vector<8x32xf32>
      %71 = arith.divf %69, %70 : vector<8x32xf32>
      %72 = vector.extract_strided_slice %65 {offsets = [0, 32], sizes = [8, 32], strides = [1, 1]} : vector<8x128xf32> to vector<8x32xf32>
      %73 = arith.negf %72 : vector<8x32xf32>
      %74 = math.exp %73 : vector<8x32xf32>
      %cst_44 = arith.constant 1.000000e+00 : f32
      %75 = vector.broadcast %cst_44 : f32 to vector<8x32xf32>
      %76 = arith.addf %75, %74 : vector<8x32xf32>
      %77 = arith.divf %75, %76 : vector<8x32xf32>
      %78 = vector.extract_strided_slice %65 {offsets = [0, 64], sizes = [8, 32], strides = [1, 1]} : vector<8x128xf32> to vector<8x32xf32>
      %79 = math.tanh %78 : vector<8x32xf32>
      %80 = vector.extract_strided_slice %65 {offsets = [0, 96], sizes = [8, 32], strides = [1, 1]} : vector<8x128xf32> to vector<8x32xf32>
      %81 = arith.negf %80 : vector<8x32xf32>
      %82 = math.exp %81 : vector<8x32xf32>
      %cst_45 = arith.constant 1.000000e+00 : f32
      %83 = vector.broadcast %cst_45 : f32 to vector<8x32xf32>
      %84 = arith.addf %83, %82 : vector<8x32xf32>
      %85 = arith.divf %83, %84 : vector<8x32xf32>
      %86 = arith.mulf %77, %arg17 : vector<8x32xf32>
      %87 = arith.mulf %71, %79 : vector<8x32xf32>
      %88 = arith.addf %86, %87 : vector<8x32xf32>
      %89 = math.tanh %88 : vector<8x32xf32>
      %90 = arith.mulf %85, %89 : vector<8x32xf32>
      %91 = arith.index_cast %arg15 : i32 to index
      %c0_46 = arith.constant 0 : index
      %c0_47 = arith.constant 0 : index
      %92 = vector.load %arg13[%91, %c0_46, %c0_47] : memref<8x8x32xf32, #tpu.memory_space<vmem>>, vector<1x8x32xf32>
      %93 = vector.shape_cast %92 : vector<1x8x32xf32> to vector<8x32xf32>
      %94 = vector.shape_cast %90 : vector<8x32xf32> to vector<1x8x32xf32>
      tpu.vector_store %arg13[%91, %c0_46, %c0_47], %94 {strides = array<i32>} : memref<8x8x32xf32, #tpu.memory_space<vmem>>, vector<1x8x32xf32>,
      %95 = arith.index_cast %arg15 : i32 to index
      %c0_48 = arith.constant 0 : index
      %c0_49 = arith.constant 0 : index
      %96 = vector.load %arg14[%95, %c0_48, %c0_49] : memref<8x8x16xf32, #tpu.memory_space<vmem>>, vector<1x8x16xf32>
      %97 = vector.shape_cast %96 : vector<1x8x16xf32> to vector<8x16xf32>
      %98 = vector.shape_cast %52 : vector<8x16xf32> to vector<1x8x16xf32>
      tpu.vector_store %arg14[%95, %c0_48, %c0_49], %98 {strides = array<i32>} : memref<8x8x16xf32, #tpu.memory_space<vmem>>, vector<1x8x16xf32>,
      scf.yield %90, %88 : vector<8x32xf32>, vector<8x32xf32>
    }
    %c7_i32_25 = arith.constant 7 : i32
    return
  }
  func.func @transform_0(%arg0: i32) -> (i32, i32, i32) {
    %c0_i32 = arith.constant 0 : i32
    %c0_i32_0 = arith.constant 0 : i32
    %c0_i32_1 = arith.constant 0 : i32
    return %c0_i32, %arg0, %c0_i32_0 : i32, i32, i32
  }
  func.func @transform_1(%arg0: i32) -> (i32, i32, i32) {
    %c0_i32 = arith.constant 0 : i32
    %c0_i32_0 = arith.constant 0 : i32
    %c0_i32_1 = arith.constant 0 : i32
    return %arg0, %c0_i32, %c0_i32_0 : i32, i32, i32
  }
  func.func @transform_2(%arg0: i32) -> (i32, i32) {
    %c0_i32 = arith.constant 0 : i32
    %c0_i32_0 = arith.constant 0 : i32
    %c0_i32_1 = arith.constant 0 : i32
    return %c0_i32, %c0_i32_0 : i32, i32
  }
  func.func @transform_3(%arg0: i32) -> (i32, i32) {
    %c0_i32 = arith.constant 0 : i32
    %c0_i32_0 = arith.constant 0 : i32
    %c0_i32_1 = arith.constant 0 : i32
    return %c0_i32, %c0_i32_0 : i32, i32
  }
  func.func @transform_4(%arg0: i32) -> (i32, i32) {
    %c0_i32 = arith.constant 0 : i32
    %c0_i32_0 = arith.constant 0 : i32
    %c0_i32_1 = arith.constant 0 : i32
    return %c0_i32, %c0_i32_0 : i32, i32
  }
  func.func @transform_5(%arg0: i32) -> (i32, i32) {
    %c0_i32 = arith.constant 0 : i32
    %c0_i32_0 = arith.constant 0 : i32
    %c0_i32_1 = arith.constant 0 : i32
    return %c0_i32, %c0_i32_0 : i32, i32
  }
  func.func @transform_6(%arg0: i32) -> (i32, i32) {
    %c0_i32 = arith.constant 0 : i32
    %c0_i32_0 = arith.constant 0 : i32
    %c0_i32_1 = arith.constant 0 : i32
    return %c0_i32, %c0_i32_0 : i32, i32
  }
  func.func @transform_7(%arg0: i32) -> (i32, i32) {
    %c0_i32 = arith.constant 0 : i32
    %c0_i32_0 = arith.constant 0 : i32
    %c0_i32_1 = arith.constant 0 : i32
    return %c0_i32, %c0_i32_0 : i32, i32
  }
  func.func @transform_8(%arg0: i32) -> (i32, i32) {
    %c0_i32 = arith.constant 0 : i32
    %c0_i32_0 = arith.constant 0 : i32
    %c0_i32_1 = arith.constant 0 : i32
    return %c0_i32, %c0_i32_0 : i32, i32
  }
  func.func @transform_9(%arg0: i32) -> (i32, i32) {
    %c0_i32 = arith.constant 0 : i32
    %c0_i32_0 = arith.constant 0 : i32
    %c0_i32_1 = arith.constant 0 : i32
    return %c0_i32, %c0_i32_0 : i32, i32
  }
  func.func @transform_10(%arg0: i32) -> (i32, i32) {
    %c0_i32 = arith.constant 0 : i32
    %c0_i32_0 = arith.constant 0 : i32
    %c0_i32_1 = arith.constant 0 : i32
    return %c0_i32, %c0_i32_0 : i32, i32
  }
  func.func @transform_11(%arg0: i32) -> (i32, i32) {
    %c0_i32 = arith.constant 0 : i32
    %c0_i32_0 = arith.constant 0 : i32
    %c0_i32_1 = arith.constant 0 : i32
    return %c0_i32, %c0_i32_0 : i32, i32
  }
  func.func @transform_12(%arg0: i32) -> (i32, i32, i32) {
    %c0_i32 = arith.constant 0 : i32
    %c0_i32_0 = arith.constant 0 : i32
    %c0_i32_1 = arith.constant 0 : i32
    return %c0_i32, %arg0, %c0_i32_0 : i32, i32, i32
  }
  func.func @transform_13(%arg0: i32) -> (i32, i32, i32) {
    %c0_i32 = arith.constant 0 : i32
    %c0_i32_0 = arith.constant 0 : i32
    %c0_i32_1 = arith.constant 0 : i32
    return %c0_i32, %arg0, %c0_i32_0 : i32, i32, i32
  }
}

module attributes {stable_mosaic.version = 11 : i64} {
  func.func @_decoder_kernel(%arg0: i32, %arg1: memref<8x8x16xf32, #tpu.memory_space<vmem>>, %arg2: memref<8x16x32xf32, #tpu.memory_space<vmem>>, %arg3: memref<32x16xf32, #tpu.memory_space<vmem>>, %arg4: memref<1x16xf32, #tpu.memory_space<vmem>>, %arg5: memref<32x16xf32, #tpu.memory_space<vmem>>, %arg6: memref<1x16xf32, #tpu.memory_space<vmem>>, %arg7: memref<80x128xf32, #tpu.memory_space<vmem>>, %arg8: memref<1x128xf32, #tpu.memory_space<vmem>>, %arg9: memref<32x32xf32, #tpu.memory_space<vmem>>, %arg10: memref<1x32xf32, #tpu.memory_space<vmem>>, %arg11: memref<32x32xf32, #tpu.memory_space<vmem>>, %arg12: memref<1x32xf32, #tpu.memory_space<vmem>>, %arg13: memref<8x8x32xf32, #tpu.memory_space<vmem>>, %arg14: memref<8x8x16xf32, #tpu.memory_space<vmem>>) attributes {dimension_semantics = [#tpu.dimension_semantics<parallel>], iteration_bounds = array<i64: 1>, scalar_prefetch = 0 : i64, scratch_operands = 0 : i64, tpu.core_type = #tpu.core_type<tc>, window_params = [{transform_indices = @transform_0, window_bounds = array<i64: 8, 8, 16>}, {transform_indices = @transform_1, window_bounds = array<i64: 8, 16, 32>}, {pipeline_mode = #tpu.pipeline_mode<synchronous>, transform_indices = @transform_2, window_bounds = array<i64: 32, 16>}, {pipeline_mode = #tpu.pipeline_mode<synchronous>, transform_indices = @transform_3, window_bounds = array<i64: 1, 16>}, {pipeline_mode = #tpu.pipeline_mode<synchronous>, transform_indices = @transform_4, window_bounds = array<i64: 32, 16>}, {pipeline_mode = #tpu.pipeline_mode<synchronous>, transform_indices = @transform_5, window_bounds = array<i64: 1, 16>}, {pipeline_mode = #tpu.pipeline_mode<synchronous>, transform_indices = @transform_6, window_bounds = array<i64: 80, 128>}, {pipeline_mode = #tpu.pipeline_mode<synchronous>, transform_indices = @transform_7, window_bounds = array<i64: 1, 128>}, {pipeline_mode = #tpu.pipeline_mode<synchronous>, transform_indices = @transform_8, window_bounds = array<i64: 32, 32>}, {pipeline_mode = #tpu.pipeline_mode<synchronous>, transform_indices = @transform_9, window_bounds = array<i64: 1, 32>}, {pipeline_mode = #tpu.pipeline_mode<synchronous>, transform_indices = @transform_10, window_bounds = array<i64: 32, 32>}, {pipeline_mode = #tpu.pipeline_mode<synchronous>, transform_indices = @transform_11, window_bounds = array<i64: 1, 32>}, {transform_indices = @transform_12, window_bounds = array<i64: 8, 8, 32>}, {transform_indices = @transform_13, window_bounds = array<i64: 8, 8, 16>}]} {
    %c0 = arith.constant 0 : index
    %c0_0 = arith.constant 0 : index
    %c0_1 = arith.constant 0 : index
    %0 = vector.load %arg2[%c0, %c0_0, %c0_1] : memref<8x16x32xf32, #tpu.memory_space<vmem>>, vector<8x16x32xf32>
    %1 = vector.shape_cast %0 : vector<8x16x32xf32> to vector<128x32xf32>
    %c0_2 = arith.constant 0 : index
    %c0_3 = arith.constant 0 : index
    %2 = vector.load %arg3[%c0_2, %c0_3] : memref<32x16xf32, #tpu.memory_space<vmem>>, vector<32x16xf32>
    %cst = arith.constant dense<0.000000e+00> : vector<128x16xf32>
    %3 = tpu.matmul %1, %2, %cst {dimension_numbers = #tpu.dot_dimension_numbers<[1], [0], [0], [1], [0, 0, 1, 1], [], []>} : vector<128x32xf32>, vector<32x16xf32>, vector<128x16xf32> -> vector<128x16xf32>
    %c0_4 = arith.constant 0 : index
    %c0_5 = arith.constant 0 : index
    %4 = vector.load %arg4[%c0_4, %c0_5] : memref<1x16xf32, #tpu.memory_space<vmem>>, vector<1x16xf32>
    %5 = vector.broadcast %4 : vector<1x16xf32> to vector<128x16xf32>
    %6 = arith.addf %3, %5 : vector<128x16xf32>
    %7 = vector.shape_cast %6 : vector<128x16xf32> to vector<8x16x16xf32>
    %cst_6 = arith.constant dense<0.000000e+00> : vector<8x32xf32>
    %8 = vector.multi_reduction <add>, %0, %cst_6 [1] : vector<8x16x32xf32> to vector<8x32xf32>
    %cst_7 = arith.constant 1.600000e+01 : f32
    %9 = vector.broadcast %cst_7 : f32 to vector<8x32xf32>
    %10 = arith.divf %8, %9 : vector<8x32xf32>
    %c0_8 = arith.constant 0 : index
    %c0_9 = arith.constant 0 : index
    %11 = vector.load %arg9[%c0_8, %c0_9] : memref<32x32xf32, #tpu.memory_space<vmem>>, vector<32x32xf32>
    %cst_10 = arith.constant dense<0.000000e+00> : vector<8x32xf32>
    %12 = tpu.matmul %10, %11, %cst_10 {dimension_numbers = #tpu.dot_dimension_numbers<[1], [0], [0], [1], [0, 0, 1, 1], [], []>} : vector<8x32xf32>, vector<32x32xf32>, vector<8x32xf32> -> vector<8x32xf32>
    %c0_11 = arith.constant 0 : index
    %c0_12 = arith.constant 0 : index
    %13 = vector.load %arg10[%c0_11, %c0_12] : memref<1x32xf32, #tpu.memory_space<vmem>>, vector<1x32xf32>
    %14 = vector.broadcast %13 : vector<1x32xf32> to vector<8x32xf32>
    %15 = arith.addf %12, %14 : vector<8x32xf32>
    %c0_13 = arith.constant 0 : index
    %c0_14 = arith.constant 0 : index
    %16 = vector.load %arg11[%c0_13, %c0_14] : memref<32x32xf32, #tpu.memory_space<vmem>>, vector<32x32xf32>
    %cst_15 = arith.constant dense<0.000000e+00> : vector<8x32xf32>
    %17 = tpu.matmul %10, %16, %cst_15 {dimension_numbers = #tpu.dot_dimension_numbers<[1], [0], [0], [1], [0, 0, 1, 1], [], []>} : vector<8x32xf32>, vector<32x32xf32>, vector<8x32xf32> -> vector<8x32xf32>
    %c0_16 = arith.constant 0 : index
    %c0_17 = arith.constant 0 : index
    %18 = vector.load %arg12[%c0_16, %c0_17] : memref<1x32xf32, #tpu.memory_space<vmem>>, vector<1x32xf32>
    %19 = vector.broadcast %18 : vector<1x32xf32> to vector<8x32xf32>
    %20 = arith.addf %17, %19 : vector<8x32xf32>
    %cst_18 = arith.constant 0.000000e+00 : f32
    %21 = vector.broadcast %cst_18 : f32 to vector<8x32xf32>
    %c7 = arith.constant 7 : index
    %c0_19 = arith.constant 0 : index
    %c0_20 = arith.constant 0 : index
    %22 = vector.load %arg13[%c7, %c0_19, %c0_20] : memref<8x8x32xf32, #tpu.memory_space<vmem>>, vector<1x8x32xf32>
    %23 = vector.shape_cast %22 : vector<1x8x32xf32> to vector<8x32xf32>
    %24 = vector.shape_cast %21 : vector<8x32xf32> to vector<1x8x32xf32>
    tpu.vector_store %arg13[%c7, %c0_19, %c0_20], %24 {strides = array<i32>} : memref<8x8x32xf32, #tpu.memory_space<vmem>>, vector<1x8x32xf32>,
    %cst_21 = arith.constant 0.000000e+00 : f32
    %25 = vector.broadcast %cst_21 : f32 to vector<8x16xf32>
    %c7_22 = arith.constant 7 : index
    %c0_23 = arith.constant 0 : index
    %c0_24 = arith.constant 0 : index
    %26 = vector.load %arg14[%c7_22, %c0_23, %c0_24] : memref<8x8x16xf32, #tpu.memory_space<vmem>>, vector<1x8x16xf32>
    %27 = vector.shape_cast %26 : vector<1x8x16xf32> to vector<8x16xf32>
    %28 = vector.shape_cast %25 : vector<8x16xf32> to vector<1x8x16xf32>
    tpu.vector_store %arg14[%c7_22, %c0_23, %c0_24], %28 {strides = array<i32>} : memref<8x8x16xf32, #tpu.memory_space<vmem>>, vector<1x8x16xf32>,
    %c0_i32 = arith.constant 0 : i32
    %c7_i32 = arith.constant 7 : i32
    %29 = arith.addi %c0_i32, %c7_i32 : i32
    %c1_i32 = arith.constant 1 : i32
    %30:2 = scf.for %arg15 = %c0_i32 to %29 step %c1_i32 iter_args(%arg16 = %15, %arg17 = %20) -> (vector<8x32xf32>, vector<8x32xf32>)  : i32 {
      %c0_26 = arith.constant 0 : index
      %c0_27 = arith.constant 0 : index
      %31 = vector.load %arg5[%c0_26, %c0_27] : memref<32x16xf32, #tpu.memory_space<vmem>>, vector<32x16xf32>
      %cst_28 = arith.constant dense<0.000000e+00> : vector<8x16xf32>
      %32 = tpu.matmul %arg16, %31, %cst_28 {dimension_numbers = #tpu.dot_dimension_numbers<[1], [0], [0], [1], [0, 0, 1, 1], [], []>} : vector<8x32xf32>, vector<32x16xf32>, vector<8x16xf32> -> vector<8x16xf32>
      %33 = vector.shape_cast %32 : vector<8x16xf32> to vector<8x1x16xf32>
      %34 = vector.broadcast %33 : vector<8x1x16xf32> to vector<8x16x16xf32>
      %35 = arith.addf %7, %34 : vector<8x16x16xf32>
      %cst_29 = arith.constant 0.000000e+00 : f32
      %36 = vector.broadcast %cst_29 : f32 to vector<8x16x16xf32>
      %37 = arith.maximumf %35, %36 : vector<8x16x16xf32>
      %c0_30 = arith.constant 0 : index
      %c0_31 = arith.constant 0 : index
      %38 = vector.load %arg6[%c0_30, %c0_31] : memref<1x16xf32, #tpu.memory_space<vmem>>, vector<1x16xf32>
      %39 = vector.shape_cast %38 : vector<1x16xf32> to vector<1x1x16xf32>
      %40 = vector.broadcast %39 : vector<1x1x16xf32> to vector<8x16x16xf32>
      %41 = arith.mulf %37, %40 : vector<8x16x16xf32>
      %cst_32 = arith.constant dense<0.000000e+00> : vector<8x16xf32>
      %42 = vector.multi_reduction <add>, %41, %cst_32 [2] : vector<8x16x16xf32> to vector<8x16xf32>
      %cst_33 = arith.constant dense<0xFF800000> : vector<8xf32>
      %43 = vector.multi_reduction <maximumf>, %42, %cst_33 [1] : vector<8x16xf32> to vector<8xf32>
      %44 = vector.shape_cast %43 : vector<8xf32> to vector<8x1xf32>
      %45 = vector.broadcast %44 : vector<8x1xf32> to vector<8x16xf32>
      %46 = arith.subf %42, %45 : vector<8x16xf32>
      %47 = math.exp %46 : vector<8x16xf32>
      %cst_34 = arith.constant dense<0.000000e+00> : vector<8xf32>
      %48 = vector.multi_reduction <add>, %47, %cst_34 [1] : vector<8x16xf32> to vector<8xf32>
      %49 = vector.shape_cast %48 : vector<8xf32> to vector<8x1xf32>
      %50 = tpu.reciprocal %49 {approx = true} : vector<8x1xf32> -> vector<8x1xf32>
      %51 = vector.broadcast %50 : vector<8x1xf32> to vector<8x16xf32>
      %52 = arith.mulf %47, %51 : vector<8x16xf32>
      %53 = vector.shape_cast %52 : vector<8x16xf32> to vector<8x16x1xf32>
      %54 = vector.broadcast %53 : vector<8x16x1xf32> to vector<8x16x32xf32>
      %55 = arith.mulf %54, %0 : vector<8x16x32xf32>
      %cst_35 = arith.constant dense<0.000000e+00> : vector<8x32xf32>
      %56 = vector.multi_reduction <add>, %55, %cst_35 [1] : vector<8x16x32xf32> to vector<8x32xf32>
      %57 = arith.index_cast %arg15 : i32 to index
      %c0_36 = arith.constant 0 : index
      %c0_37 = arith.constant 0 : index
      %58 = vector.load %arg1[%57, %c0_36, %c0_37] : memref<8x8x16xf32, #tpu.memory_space<vmem>>, vector<1x8x16xf32>
      %59 = vector.shape_cast %58 : vector<1x8x16xf32> to vector<8x16xf32>
      %c0_38 = arith.constant 0 : index
      %c0_39 = arith.constant 0 : index
      %60 = vector.load %arg7[%c0_38, %c0_39] : memref<80x128xf32, #tpu.memory_space<vmem>>, vector<80x128xf32>
      %61 = vector.extract_strided_slice %60 {offsets = [0, 0], sizes = [16, 128], strides = [1, 1]} : vector<80x128xf32> to vector<16x128xf32>
      %cst_40 = arith.constant dense<0.000000e+00> : vector<8x128xf32>
      %62 = tpu.matmul %59, %61, %cst_40 {dimension_numbers = #tpu.dot_dimension_numbers<[1], [0], [0], [1], [0, 0, 1, 1], [], []>} : vector<8x16xf32>, vector<16x128xf32>, vector<8x128xf32> -> vector<8x128xf32>
      %63 = vector.extract_strided_slice %60 {offsets = [16, 0], sizes = [32, 128], strides = [1, 1]} : vector<80x128xf32> to vector<32x128xf32>
      %cst_41 = arith.constant dense<0.000000e+00> : vector<8x128xf32>
      %64 = tpu.matmul %56, %63, %cst_41 {dimension_numbers = #tpu.dot_dimension_numbers<[1], [0], [0], [1], [0, 0, 1, 1], [], []>} : vector<8x32xf32>, vector<32x128xf32>, vector<8x128xf32> -> vector<8x128xf32>
      %65 = arith.addf %62, %64 : vector<8x128xf32>
      %66 = vector.extract_strided_slice %60 {offsets = [48, 0], sizes = [32, 128], strides = [1, 1]} : vector<80x128xf32> to vector<32x128xf32>
      %cst_42 = arith.constant dense<0.000000e+00> : vector<8x128xf32>
      %67 = tpu.matmul %arg16, %66, %cst_42 {dimension_numbers = #tpu.dot_dimension_numbers<[1], [0], [0], [1], [0, 0, 1, 1], [], []>} : vector<8x32xf32>, vector<32x128xf32>, vector<8x128xf32> -> vector<8x128xf32>
      %68 = arith.addf %65, %67 : vector<8x128xf32>
      %c0_43 = arith.constant 0 : index
      %c0_44 = arith.constant 0 : index
      %69 = vector.load %arg8[%c0_43, %c0_44] : memref<1x128xf32, #tpu.memory_space<vmem>>, vector<1x128xf32>
      %70 = vector.broadcast %69 : vector<1x128xf32> to vector<8x128xf32>
      %71 = arith.addf %68, %70 : vector<8x128xf32>
      %72 = vector.extract_strided_slice %71 {offsets = [0, 0], sizes = [8, 32], strides = [1, 1]} : vector<8x128xf32> to vector<8x32xf32>
      %73 = arith.negf %72 : vector<8x32xf32>
      %74 = math.exp %73 : vector<8x32xf32>
      %cst_45 = arith.constant 1.000000e+00 : f32
      %75 = vector.broadcast %cst_45 : f32 to vector<8x32xf32>
      %76 = arith.addf %75, %74 : vector<8x32xf32>
      %77 = arith.divf %75, %76 : vector<8x32xf32>
      %78 = vector.extract_strided_slice %71 {offsets = [0, 32], sizes = [8, 32], strides = [1, 1]} : vector<8x128xf32> to vector<8x32xf32>
      %79 = arith.negf %78 : vector<8x32xf32>
      %80 = math.exp %79 : vector<8x32xf32>
      %cst_46 = arith.constant 1.000000e+00 : f32
      %81 = vector.broadcast %cst_46 : f32 to vector<8x32xf32>
      %82 = arith.addf %81, %80 : vector<8x32xf32>
      %83 = arith.divf %81, %82 : vector<8x32xf32>
      %84 = vector.extract_strided_slice %71 {offsets = [0, 64], sizes = [8, 32], strides = [1, 1]} : vector<8x128xf32> to vector<8x32xf32>
      %85 = math.tanh %84 : vector<8x32xf32>
      %86 = vector.extract_strided_slice %71 {offsets = [0, 96], sizes = [8, 32], strides = [1, 1]} : vector<8x128xf32> to vector<8x32xf32>
      %87 = arith.negf %86 : vector<8x32xf32>
      %88 = math.exp %87 : vector<8x32xf32>
      %cst_47 = arith.constant 1.000000e+00 : f32
      %89 = vector.broadcast %cst_47 : f32 to vector<8x32xf32>
      %90 = arith.addf %89, %88 : vector<8x32xf32>
      %91 = arith.divf %89, %90 : vector<8x32xf32>
      %92 = arith.mulf %83, %arg17 : vector<8x32xf32>
      %93 = arith.mulf %77, %85 : vector<8x32xf32>
      %94 = arith.addf %92, %93 : vector<8x32xf32>
      %95 = math.tanh %94 : vector<8x32xf32>
      %96 = arith.mulf %91, %95 : vector<8x32xf32>
      %97 = arith.index_cast %arg15 : i32 to index
      %c0_48 = arith.constant 0 : index
      %c0_49 = arith.constant 0 : index
      %98 = vector.load %arg13[%97, %c0_48, %c0_49] : memref<8x8x32xf32, #tpu.memory_space<vmem>>, vector<1x8x32xf32>
      %99 = vector.shape_cast %98 : vector<1x8x32xf32> to vector<8x32xf32>
      %100 = vector.shape_cast %96 : vector<8x32xf32> to vector<1x8x32xf32>
      tpu.vector_store %arg13[%97, %c0_48, %c0_49], %100 {strides = array<i32>} : memref<8x8x32xf32, #tpu.memory_space<vmem>>, vector<1x8x32xf32>,
      %101 = arith.index_cast %arg15 : i32 to index
      %c0_50 = arith.constant 0 : index
      %c0_51 = arith.constant 0 : index
      %102 = vector.load %arg14[%101, %c0_50, %c0_51] : memref<8x8x16xf32, #tpu.memory_space<vmem>>, vector<1x8x16xf32>
      %103 = vector.shape_cast %102 : vector<1x8x16xf32> to vector<8x16xf32>
      %104 = vector.shape_cast %52 : vector<8x16xf32> to vector<1x8x16xf32>
      tpu.vector_store %arg14[%101, %c0_50, %c0_51], %104 {strides = array<i32>} : memref<8x8x16xf32, #tpu.memory_space<vmem>>, vector<1x8x16xf32>,
      scf.yield %96, %94 : vector<8x32xf32>, vector<8x32xf32>
    }
    %c7_i32_25 = arith.constant 7 : i32
    return
  }
  func.func @transform_0(%arg0: i32) -> (i32, i32, i32) {
    %c0_i32 = arith.constant 0 : i32
    %c0_i32_0 = arith.constant 0 : i32
    %c0_i32_1 = arith.constant 0 : i32
    return %c0_i32, %arg0, %c0_i32_0 : i32, i32, i32
  }
  func.func @transform_1(%arg0: i32) -> (i32, i32, i32) {
    %c0_i32 = arith.constant 0 : i32
    %c0_i32_0 = arith.constant 0 : i32
    %c0_i32_1 = arith.constant 0 : i32
    return %arg0, %c0_i32, %c0_i32_0 : i32, i32, i32
  }
  func.func @transform_2(%arg0: i32) -> (i32, i32) {
    %c0_i32 = arith.constant 0 : i32
    %c0_i32_0 = arith.constant 0 : i32
    %c0_i32_1 = arith.constant 0 : i32
    return %c0_i32, %c0_i32_0 : i32, i32
  }
  func.func @transform_3(%arg0: i32) -> (i32, i32) {
    %c0_i32 = arith.constant 0 : i32
    %c0_i32_0 = arith.constant 0 : i32
    %c0_i32_1 = arith.constant 0 : i32
    return %c0_i32, %c0_i32_0 : i32, i32
  }
  func.func @transform_4(%arg0: i32) -> (i32, i32) {
    %c0_i32 = arith.constant 0 : i32
    %c0_i32_0 = arith.constant 0 : i32
    %c0_i32_1 = arith.constant 0 : i32
    return %c0_i32, %c0_i32_0 : i32, i32
  }
  func.func @transform_5(%arg0: i32) -> (i32, i32) {
    %c0_i32 = arith.constant 0 : i32
    %c0_i32_0 = arith.constant 0 : i32
    %c0_i32_1 = arith.constant 0 : i32
    return %c0_i32, %c0_i32_0 : i32, i32
  }
  func.func @transform_6(%arg0: i32) -> (i32, i32) {
    %c0_i32 = arith.constant 0 : i32
    %c0_i32_0 = arith.constant 0 : i32
    %c0_i32_1 = arith.constant 0 : i32
    return %c0_i32, %c0_i32_0 : i32, i32
  }
  func.func @transform_7(%arg0: i32) -> (i32, i32) {
    %c0_i32 = arith.constant 0 : i32
    %c0_i32_0 = arith.constant 0 : i32
    %c0_i32_1 = arith.constant 0 : i32
    return %c0_i32, %c0_i32_0 : i32, i32
  }
  func.func @transform_8(%arg0: i32) -> (i32, i32) {
    %c0_i32 = arith.constant 0 : i32
    %c0_i32_0 = arith.constant 0 : i32
    %c0_i32_1 = arith.constant 0 : i32
    return %c0_i32, %c0_i32_0 : i32, i32
  }
  func.func @transform_9(%arg0: i32) -> (i32, i32) {
    %c0_i32 = arith.constant 0 : i32
    %c0_i32_0 = arith.constant 0 : i32
    %c0_i32_1 = arith.constant 0 : i32
    return %c0_i32, %c0_i32_0 : i32, i32
  }
  func.func @transform_10(%arg0: i32) -> (i32, i32) {
    %c0_i32 = arith.constant 0 : i32
    %c0_i32_0 = arith.constant 0 : i32
    %c0_i32_1 = arith.constant 0 : i32
    return %c0_i32, %c0_i32_0 : i32, i32
  }
  func.func @transform_11(%arg0: i32) -> (i32, i32) {
    %c0_i32 = arith.constant 0 : i32
    %c0_i32_0 = arith.constant 0 : i32
    %c0_i32_1 = arith.constant 0 : i32
    return %c0_i32, %c0_i32_0 : i32, i32
  }
  func.func @transform_12(%arg0: i32) -> (i32, i32, i32) {
    %c0_i32 = arith.constant 0 : i32
    %c0_i32_0 = arith.constant 0 : i32
    %c0_i32_1 = arith.constant 0 : i32
    return %c0_i32, %arg0, %c0_i32_0 : i32, i32, i32
  }
  func.func @transform_13(%arg0: i32) -> (i32, i32, i32) {
    %c0_i32 = arith.constant 0 : i32
    %c0_i32_0 = arith.constant 0 : i32
    %c0_i32_1 = arith.constant 0 : i32
    return %c0_i32, %arg0, %c0_i32_0 : i32, i32, i32
  }
}

</mosaic_0001>

<bundles_post_ra>
// kernel: tpu_custom_call.1
= control target key start
LH: loop header
LB: loop body
LE: loop exit
PB: predicated region body
PF: predicated region fallthrough
CT: control target
= control target key end

     0   :  { %19 = vsyncpa [#allocation3], 0  ;;  %s3059_s0 = inlined_call_operand.hbm [shape: f32[8,8,16], index: 0, kind: input, shape index: {}]   ;;  %s3060_s1 = inlined_call_operand.hbm [shape: f32[8,16,32], index: 1, kind: input, shape index: {}]   ;;  %s3061_s2 = inlined_call_operand.vmem [shape: f32[32,16], index: 2, kind: input, shape index: {}]   ;;  %s3062_s3 = inlined_call_operand.hbm [shape: f32[1,16], index: 3, kind: input, shape index: {}]   ;;  %s3063_s4 = inlined_call_operand.vmem [shape: f32[32,16], index: 4, kind: input, shape index: {}]   ;;  %s3064_s5 = inlined_call_operand.hbm [shape: f32[1,16], index: 5, kind: input, shape index: {}]   ;;  %s3065_s6 = inlined_call_operand.vmem [shape: f32[80,128], index: 6, kind: input, shape index: {}]   ;;  %s3066_s7 = inlined_call_operand.hbm [shape: f32[1,128], index: 7, kind: input, shape index: {}]   ;;  %s3067_s8 = inlined_call_operand.hbm [shape: f32[32,32], index: 8, kind: input, shape index: {}]   ;;  %s3068_s9 = inlined_call_operand.hbm [shape: f32[1,32], index: 9, kind: input, shape index: {}]   ;;  %s3069_s10 = inlined_call_operand.vmem [shape: f32[32,32], index: 10, kind: input, shape index: {}]   ;;  %s3070_s11 = inlined_call_operand.vmem [shape: f32[1,32], index: 11, kind: input, shape index: {}]   ;;  %s3071_s12 = inlined_call_operand.hbm [shape: f32[8,8,32], index: 12, kind: output, shape index: {0}]   ;;  %s3072_s13 = inlined_call_operand.hbm [shape: f32[8,8,16], index: 13, kind: output, shape index: {1}]  }
   0x1   :  { %20 = vsyncpa [#allocation6], 0 }
   0x2   :  { %21 = vsyncpa [#allocation9], 0 }
   0x3   :  { %22 = vsyncpa [#allocation12], 0 }
   0x4   :  { %23 = vsyncpa [#allocation4], 0 }
   0x5   :  { %24 = vsyncpa [#allocation16], 0  ;;  %s2234_s25 = smov [#allocation5]   ;;  %s2235_s27 = smov [#allocation8]  }
   0x6   :  { %s42_s26 = sshll.u32 %s2234_s25, 4  ;;  %s69_s28 = sshll.u32 %s2235_s27, 4  ;;  %s43_s26 = int_to_ptr.vmem [resolvable:$true] %s42_s26  ;;  %s70_s28 = int_to_ptr.vmem [resolvable:$true] %s69_s28 }
   0x7   :  { %s2026_s29 = scalar_lea.vmem %s43_s26, 2048  ;;  %p2031_p1 = scmp.lt.s32.totalorder %s43_s26, %s43_s26 }
   0x8   :  { %p2027_p0 = scmp.ne.s32.totalorder %s43_s26, %s2026_s29  ;;  %p2032_p2 = scmp.lt.s32.totalorder %s2026_s29, %s2026_s29 }
   0xa   :  { %p2033_p3 = por %p2032_p2, %p2031_p1 }
   0xc   :  { %p2034_p4 = pnand %p2033_p3, %p2027_p0 }
   0xe   :  { %2037 = shalt.err (!%p2034_p4)
}
   0xf   :  { %s2236_s30 = smov 128   ;;  %s2237_s14 = smov 8  }
  0x10   :  { %48 = dma.hbm_to_vmem [thread:$0]  %s3060_s1, 2048, %s43_s26, [#allocation6], %s2236_s30, %s2236_s30, %s2237_s14  }
  0x11   :  { %s2046_s17 = scalar_lea.vmem %s70_s28, 16  ;;  %s2050_s18 = scalar_lea.vmem %s70_s28, 32 }
  0x12   :  { %p2047_p5 = scmp.ne.s32.totalorder %s70_s28, %s2046_s17  ;;  %p2051_p6 = scmp.lt.s32.totalorder %s70_s28, %s70_s28 }
  0x13   :  { %p2052_p7 = scmp.lt.s32.totalorder %s2050_s18, %s2046_s17 }
  0x15   :  { %p2053_p8 = por %p2052_p7, %p2051_p6 }
  0x17   :  { %p2054_p9 = pnand %p2053_p8, %p2047_p5 }
  0x19   :  { %2057 = shalt.err (!%p2054_p9)
}
  0x1a   :  { %72 = dma.hbm_to_vmem [thread:$0]  %s3064_s5, 16, %s70_s28, [#allocation9]  }
  0x1b   :  { %s2238_s21 = smov [#allocation11]   ;;  %s2239_s23 = smov [#allocation2]  }
  0x1c   :  { %s90_s22 = sshll.u32 %s2238_s21, 4  ;;  %s30_s24 = sshll.u32 %s2239_s23, 4  ;;  %s91_s22 = int_to_ptr.vmem [resolvable:$true] %s90_s22  ;;  %s31_s24 = int_to_ptr.vmem [resolvable:$true] %s30_s24 }
  0x1d   :  { %s2066_s25 = scalar_lea.vmem %s91_s22, 512  ;;  %p2071_p11 = scmp.lt.s32.totalorder %s91_s22, %s91_s22 }
  0x1e   :  { %p2067_p10 = scmp.ne.s32.totalorder %s91_s22, %s2066_s25  ;;  %p2072_p12 = scmp.lt.s32.totalorder %s2066_s25, %s2066_s25 }
  0x20   :  { %p2073_p13 = por %p2072_p12, %p2071_p11 }
  0x22   :  { %p2074_p0 = pnand %p2073_p13, %p2067_p10 }
  0x24   :  { %2077 = shalt.err (!%p2074_p0)
}
  0x25   :  { %96 = dma.hbm_to_vmem [thread:$0]  %s3067_s8, 512, %s91_s22, [#allocation12], %s2236_s30, %s2236_s30, %s2237_s14  }
  0x26   :  { %s2086_s5 = scalar_lea.vmem %s31_s24, 1024  ;;  %p2091_p2 = scmp.lt.s32.totalorder %s31_s24, %s31_s24 }
  0x27   :  { %p2087_p1 = scmp.ne.s32.totalorder %s31_s24, %s2086_s5  ;;  %p2092_p3 = scmp.lt.s32.totalorder %s2086_s5, %s2086_s5 }
  0x29   :  { %p2093_p4 = por %p2092_p3, %p2091_p2 }
  0x2b   :  { %p2094_p5 = pnand %p2093_p4, %p2087_p1 }
  0x2d   :  { %2097 = shalt.err (!%p2094_p5)
}
  0x2e   :  { %36 = dma.hbm_to_vmem [thread:$0]  %s3059_s0, 1024, %s31_s24, [#allocation3], %s2236_s30, %s2236_s30, %s2237_s14  }
  0x2f   :  { %s2240_s29 = smov [#allocation7]   ;;  %s2241_s16 = smov [#allocation10]  }
  0x30   :  { %s57_s15 = sshll.u32 %s2240_s29, 4  ;;  %s81_s17 = sshll.u32 %s2241_s16, 4  ;;  %s58_s15 = int_to_ptr.vmem [resolvable:$true] %s57_s15  ;;  %s82_s17 = int_to_ptr.vmem [resolvable:$true] %s81_s17 }
  0x31   :  { %s2106_s8 = scalar_lea.vmem %s58_s15, 16  ;;  %s2110_s18 = scalar_lea.vmem %s58_s15, 32 }
  0x32   :  { %p2107_p6 = scmp.ne.s32.totalorder %s58_s15, %s2106_s8  ;;  %p2111_p7 = scmp.lt.s32.totalorder %s58_s15, %s58_s15 }
  0x33   :  { %p2112_p8 = scmp.lt.s32.totalorder %s2110_s18, %s2106_s8 }
  0x35   :  { %p2113_p9 = por %p2112_p8, %p2111_p7 }
  0x37   :  { %p2114_p10 = pnand %p2113_p9, %p2107_p6 }
  0x39   :  { %2117 = shalt.err (!%p2114_p10)
}
  0x3a   :  { %60 = dma.hbm_to_vmem [thread:$0]  %s3062_s3, 16, %s58_s15, [#allocation6]  }
  0x3b   :  { %s2126_s21 = scalar_lea.vmem %s82_s17, 16  ;;  %s2130_s0 = scalar_lea.vmem %s82_s17, 32 }
  0x3c   :  { %p2127_p11 = scmp.ne.s32.totalorder %s82_s17, %s2126_s21  ;;  %p2131_p12 = scmp.lt.s32.totalorder %s82_s17, %s82_s17 }
  0x3d   :  { %p2132_p13 = scmp.lt.s32.totalorder %s2130_s0, %s2126_s21 }
  0x3f   :  { %p2133_p0 = por %p2132_p13, %p2131_p12 }
  0x41   :  { %p2134_p1 = pnand %p2133_p0, %p2127_p11 }
  0x43   :  { %2137 = shalt.err (!%p2134_p1)
}
  0x44   :  { %84 = dma.hbm_to_vmem [thread:$0]  %s3066_s7, 16, %s82_s17, [#allocation9]  }
  0x45   :  { %s2242_s24 = smov [#allocation13]  }
  0x46   :  { %s103_s25 = sshll.u32 %s2242_s24, 4  ;;  %s104_s25 = int_to_ptr.vmem [resolvable:$true] %s103_s25 }
  0x47   :  { %s2146_s1 = scalar_lea.vmem %s104_s25, 16  ;;  %s2150_s26 = scalar_lea.vmem %s104_s25, 32 }
  0x48   :  { %p2147_p2 = scmp.ne.s32.totalorder %s104_s25, %s2146_s1  ;;  %p2151_p3 = scmp.lt.s32.totalorder %s104_s25, %s104_s25 }
  0x49   :  { %p2152_p4 = scmp.lt.s32.totalorder %s2150_s26, %s2146_s1 }
  0x4b   :  { %p2153_p5 = por %p2152_p4, %p2151_p3 }
  0x4d   :  { %p2154_p6 = pnand %p2153_p5, %p2147_p2 }
  0x4f   :  { %2157 = shalt.err (!%p2154_p6)
}
  0x50   :  { %106 = dma.hbm_to_vmem [thread:$0]  %s3068_s9, 16, %s104_s25, [#allocation12]  }
  0x51   :  { %2210 = dma.done.wait [#allocation3], 1024  }
  0x52   :  { %2211 = vsyncadd [#allocation3], 4294966272 }
  0x53   :  { %2212 = dma.done.wait [#allocation6], 2064  }
  0x54   :  { %2213 = vsyncadd [#allocation6], 4294965232 }
  0x55   :  { %2214 = dma.done.wait [#allocation9], 32  }
  0x56   :  { %2215 = vsyncadd [#allocation9], 4294967264 }
  0x57   :  { %2216 = dma.done.wait [#allocation12], 528  }
  0x58   :  { %2217 = vsyncadd [#allocation12], 4294966768  ;;  %vm159_vm0 = vcmask 261120   ;;  %vm623_vm1 = vcmask 130048   ;;  %v2243_v0 = vmov 0.0   ;;  %v151_v1 = vld [vmem:[%s3061_s2 + $0x18] sm:$0xff] }
  0x59   :  { %621 = vst.msk [vmem:[#allocation14 + $0x38] sm:$0xff] %vm159_vm0, %v2243_v0  ;;  %v150_v2 = vld [vmem:[%s3061_s2 + $0x10] sm:$0xff]  ;;  %1832 = vmatprep.subr.mxu0 %v151_v1  ;;  %v149_v3 = vld [vmem:[%s3061_s2 + $0x8] sm:$0xff]  ;;  %1920 = vmatprep.subr.mxu1 %v151_v1  ;;  %v2369_v4 = vld [vmem:[#allocation5] sm:$0xff]  ;;  %vm2244_vm2 = vmmov 0   ;;  %vm453_vm3 = vcmask 1041409  }
  0x5a   :  { %624 = vst.msk [vmem:[#allocation15 + $0x38] sm:$0xff] %vm623_vm1, %v2243_v0  ;;  %v2371_v5 = vld [vmem:[#allocation5 + $0x8] sm:$0xff]  ;;  %1833 = vmatpush3.msra.mxu0 %v151_v1  ;;  %1924 = vmatpush3.msra.mxu1 %v151_v1  ;;  %v353_v6 = vsel %vm159_vm0, %v2369_v4, 0.0  ;;  %v2377_v8 = vld [vmem:[#allocation5 + $0x10] sm:$0xff]  ;;  %v2379_v9 = vld [vmem:[#allocation5 + $0x18] sm:$0xff]  ;;  %vm455_vm4 = vcmask 1042434  }
  0x5b   :  { %v354_v7 = vsel %vm159_vm0, %v2371_v5, 0.0  ;;  %v2381_v10 = vld [vmem:[#allocation5 + $0x60] sm:$0xff]  ;;  %1834 = vmatprep.subr.mxu0 %v150_v2  ;;  %1840 = vmatprep.mubr.msk.f32.mxu0 %vm159_vm0, %v2369_v4  ;;  %v362_v12 = vsel %vm159_vm0, %v2377_v8, 0.0  ;;  %v363_v13 = vsel %vm159_vm0, %v2379_v9, 0.0  ;;  %v2389_v14 = vld [vmem:[#allocation5 + $0x68] sm:$0xff]  ;;  %v2406_v23 = vld [vmem:[#allocation5 + $0x70] sm:$0xff] }
  0x5c   :  { %v355_v11 = vadd.f32 %v354_v7, %v353_v6  ;;  %v407_v15 = vsel %vm159_vm0, %v2381_v10, 0.0  ;;  %v2393_v16 = vld [vmem:[#allocation5 + $0x20] sm:$0xff]  ;;  %v2395_v17 = vld [vmem:[#allocation5 + $0x28] sm:$0xff]  ;;  %1835 = vmatpush3.msra.mxu0 %v150_v2  ;;  %1921 = vmatprep.subr.mxu1 %v150_v2  ;;  %v364_v19 = vadd.f32 %v363_v13, %v362_v12  ;;  %v408_v20 = vsel %vm159_vm0, %v2389_v14, 0.0  ;;  %v2408_v24 = vld [vmem:[#allocation5 + $0x78] sm:$0xff]  ;;  %s2540_s24 = smov 0  }
  0x5d   :  { %v148_v18 = vld [vmem:[%s3061_s2] sm:$0xff]  ;;  %v371_v21 = vsel %vm159_vm0, %v2393_v16, 0.0  ;;  %v372_v22 = vsel %vm159_vm0, %v2395_v17, 0.0  ;;  %1836 = vmatprep.subr.mxu0 %v149_v3  ;;  %1925 = vmatpush3.msra.mxu1 %v150_v2  ;;  %v409_v26 = vadd.f32 %v408_v20, %v407_v15  ;;  %v416_v28 = vsel %vm159_vm0, %v2406_v23, 0.0  ;;  %v2412_v29 = vld [vmem:[#allocation5 + $0x30] sm:$0xff]  ;;  %v2414_v30 = vld [vmem:[#allocation5 + $0x38] sm:$0xff] }
  0x5e   :  { %v356_v25 = vrot.slane %v355_v11, 4  ;;  %v373_v27 = vadd.f32 %v372_v22, %v371_v21  ;;  %1837 = vmatpush3.msra.mxu0 %v149_v3  ;;  %1922 = vmatprep.subr.mxu1 %v149_v3  ;;  %v365_v31 = vrot.slane %v364_v19, 4  ;;  %v417_v32 = vsel %vm159_vm0, %v2408_v24, 0.0  ;;  %v2422_v39 = vld [vmem:[#allocation5 + $0x40] sm:$0xff]  ;;  %v2424_v40 = vld [vmem:[#allocation5 + $0x48] sm:$0xff]  ;;  %v2426_v41 = vld [vmem:[#allocation5 + $0x50] sm:$0xff] }
  0x5f   :  { %v380_v33 = vsel %vm159_vm0, %v2412_v29, 0.0  ;;  %v381_v34 = vsel %vm159_vm0, %v2414_v30, 0.0  ;;  %1838 = vmatprep.subr.mxu0 %v148_v18  ;;  %1926 = vmatpush3.msra.mxu1 %v149_v3  ;;  %v410_v36 = vrot.slane %v409_v26, 4  ;;  %v418_v38 = vadd.f32 %v417_v32, %v416_v28  ;;  %v437_v49 = vld [vmem:[#allocation11 + $0x18] sm:$0xff]  ;;  %v436_v60 = vld [vmem:[#allocation11 + $0x10] sm:$0xff]  ;;  %v435_v7 = vld [vmem:[#allocation11 + $0x8] sm:$0xff] }
  0x60   :  { %v357_v35 = vadd.f32 %v356_v25, %v355_v11  ;;  %v374_v37 = vrot.slane %v373_v27, 4  ;;  %1839 = vmatpush3.msra.mxu0 %v148_v18  ;;  %1923 = vmatprep.subr.mxu1 %v148_v18  ;;  %v366_v42 = vadd.f32 %v365_v31, %v364_v19  ;;  %v382_v43 = vadd.f32 %v381_v34, %v380_v33  ;;  %v2434_v51 = vld [vmem:[#allocation5 + $0x58] sm:$0xff]  ;;  %v434_v22 = vld [vmem:[#allocation11] sm:$0xff] }
  0x61   :  { %v389_v44 = vsel %vm159_vm0, %v2422_v39, 0.0  ;;  %v390_v45 = vsel %vm159_vm0, %v2424_v40, 0.0  ;;  %1841 = vmatmul.mubr.msk.f32.vlgmr.msra.gmra.mxu0 %vm159_vm0, %v2371_v5  ;;  %1927 = vmatpush3.msra.mxu1 %v148_v18  ;;  %v411_v47 = vadd.f32 %v410_v36, %v409_v26  ;;  %v419_v50 = vrot.slane %v418_v38, 4 }
  0x62   :  { %v358_v46 = vrot.slane %v357_v35, 2  ;;  %v375_v48 = vadd.f32 %v374_v37, %v373_v27  ;;  %1843 = vmatprep.mubr.msk.f32.mxu0 %vm159_vm0, %v2377_v8  ;;  %v367_v52 = vrot.slane %v366_v42, 2  ;;  %1858 = vmatprep.mubr.msk.f32.mxu1 %vm159_vm0, %v2381_v10  ;;  %v383_v53 = vrot.slane %v382_v43, 4 }
  0x63   :  { %v391_v54 = vadd.f32 %v390_v45, %v389_v44  ;;  %v398_v55 = vsel %vm159_vm0, %v2426_v41, 0.0  ;;  %v412_v57 = vrot.slane %v411_v47, 2  ;;  %1859 = vmatmul.mubr.msk.f32.vlgmr.msra.gmra.mxu1 %vm159_vm0, %v2389_v14  ;;  %1864 = vmatprep.subr.mxu1 %v2243_v0  ;;  %v420_v59 = vadd.f32 %v419_v50, %v418_v38 }
  0x64   :  { %v359_v56 = vadd.f32 %v358_v46, %v357_v35  ;;  %v376_v58 = vrot.slane %v375_v48, 2  ;;  %v368_v61 = vadd.f32 %v367_v52, %v366_v42  ;;  %1865 = vmatpush3.msra.mxu1 %v437_v49  ;;  %1861 = vmatprep.mubr.msk.f32.mxu1 %vm159_vm0, %v2406_v23  ;;  %v384_v62 = vadd.f32 %v383_v53, %v382_v43 }
  0x65   :  { %v392_v63 = vrot.slane %v391_v54, 4  ;;  %v399_v1 = vsel %vm159_vm0, %v2434_v51, 0.0  ;;  %1844 = vmatmul.mubr.msk.f32.gmra.mxu0 %vm159_vm0, %v2379_v9  ;;  %1866 = vmatprep.subr.mxu1 %v2243_v0  ;;  %v421_v6 = vrot.slane %v420_v59, 2  ;;  %v413_v19 = vadd.f32 %v412_v57, %v411_v47 }
  0x66   :  { %v360_v2 = vrot.slane %v359_v56, 1  ;;  %v377_v3 = vadd.f32 %v376_v58, %v375_v48  ;;  %v369_v11 = vrot.slane %v368_v61, 1  ;;  %1846 = vmatprep.mubr.msk.f32.mxu0 %vm159_vm0, %v2393_v16  ;;  %1867 = vmatpush3.msra.mxu1 %v436_v60  ;;  %v385_v12 = vrot.slane %v384_v62, 2 }
  0x67   :  { %v393_v13 = vadd.f32 %v392_v63, %v391_v54  ;;  %v400_v15 = vadd.f32 %v399_v1, %v398_v55  ;;  %1862 = vmatmul.mubr.msk.f32.gmra.mxu1 %vm159_vm0, %v2408_v24  ;;  %v422_v21 = vadd.f32 %v421_v6, %v420_v59  ;;  %1868 = vmatprep.subr.mxu1 %v2243_v0  ;;  %v414_v37 = vrot.slane %v413_v19, 1  ;;  %v542_v1 = vld [vmem:[%s3069_s10 + $0x18] sm:$0xff]  ;;  %v540_v6 = vld [vmem:[%s3069_s10 + $0x8] sm:$0xff] }
  0x68   :  { %v361_v18 = vadd.f32 %v360_v2, %v359_v56  ;;  %v378_v20 = vrot.slane %v377_v3, 1  ;;  %v370_v25 = vadd.f32 %v369_v11, %v368_v61  ;;  %v386_v26 = vadd.f32 %v385_v12, %v384_v62  ;;  %1869 = vmatpush3.msra.mxu1 %v435_v7  ;;  %1872 = vmatprep.mubr.msk.f32.mxu1 %vm2244_vm2, %v2243_v0  ;;  %v539_v7 = vld [vmem:[%s3069_s10] sm:$0xff] }
  0x69   :  { %v394_v27 = vrot.slane %v393_v13, 2  ;;  %v401_v28 = vrot.slane %v400_v15, 4  ;;  %1847 = vmatmul.mubr.msk.f32.gmra.mxu0 %vm159_vm0, %v2395_v17  ;;  %1870 = vmatprep.subr.mxu1 %v2243_v0  ;;  %v423_v42 = vrot.slane %v422_v21, 1  ;;  %vm457_vm5 = vcmask 1043459   ;;  %v1759_v11 = vld [vmem:[#allocation7] ss:$0 sm:$0xff] }
  0x6a   :  { %v426_v31 = vmul.f32 0.0625, %v361_v18  ;;  %v379_v32 = vadd.f32 %v378_v20, %v377_v3  ;;  %v427_v33 = vmul.f32 0.0625, %v370_v25  ;;  %1849 = vmatprep.mubr.msk.f32.mxu0 %vm159_vm0, %v2412_v29  ;;  %v387_v34 = vrot.slane %v386_v26, 1  ;;  %1871 = vmatpush3.msra.mxu1 %v434_v22  ;;  %v541_v3 = vld [vmem:[%s3069_s10 + $0x10] sm:$0xff] }
  0x6b   :  { %v395_v35 = vadd.f32 %v394_v27, %v393_v13  ;;  %v402_v36 = vadd.f32 %v401_v28, %v400_v15  ;;  %1875 = vmatprep.subr.mxu1 %v2243_v0  ;;  %v415_v52 = vadd.f32 %v414_v37, %v413_v19  ;;  %vm459_vm6 = vcmask 1044484  }
  0x6c   :  { %v428_v38 = vmul.f32 0.0625, %v379_v32  ;;  %v454_v43 = vsel %vm453_vm3, %v427_v33, %v426_v31  ;;  %v388_v44 = vadd.f32 %v387_v34, %v386_v26  ;;  %v424_v53 = vadd.f32 %v423_v42, %v422_v21 }
  0x6d   :  { %v396_v45 = vrot.slane %v395_v35, 1  ;;  %v403_v46 = vrot.slane %v402_v36, 2  ;;  %1850 = vmatmul.mubr.msk.f32.gmra.mxu0 %vm159_vm0, %v2414_v30  ;;  %v432_v58 = vmul.f32 0.0625, %v415_v52  ;;  %vm461_vm7 = vcmask 1045509   ;;  %v1776_v52 = vld [vmem:[#allocation13] ss:$0 sm:$0xff] }
  0x6e   :  { %v456_v47 = vsel %vm455_vm4, %v428_v38, %v454_v43  ;;  %v429_v48 = vmul.f32 0.0625, %v388_v44  ;;  %1852 = vmatprep.mubr.msk.f32.mxu0 %vm159_vm0, %v2422_v39  ;;  %v433_v60 = vmul.f32 0.0625, %v424_v53  ;;  %vm463_vm8 = vcmask 1046534  }
  0x6f   :  { %v397_v49 = vadd.f32 %v396_v45, %v395_v35  ;;  %v404_v50 = vadd.f32 %v403_v46, %v402_v36  ;;  %vm465_vm9 = vcmask 1047559  }
  0x70   :  { %v458_v54 = vsel %vm457_vm5, %v429_v48, %v456_v47 }
  0x71   :  { %v430_v55 = vmul.f32 0.0625, %v397_v49  ;;  %v405_v56 = vrot.slane %v404_v50, 1  ;;  %1853 = vmatmul.mubr.msk.f32.gmra.mxu0 %vm159_vm0, %v2424_v40 }
  0x72   :  { %1855 = vmatprep.mubr.msk.f32.mxu0 %vm159_vm0, %v2426_v41 }
  0x73   :  { %v406_v57 = vadd.f32 %v405_v56, %v404_v50  ;;  %v460_v59 = vsel %vm459_vm6, %v430_v55, %v458_v54 }
  0x75   :  { %v431_v61 = vmul.f32 0.0625, %v406_v57  ;;  %1856 = vmatmul.mubr.msk.f32.gmra.mxu0 %vm159_vm0, %v2434_v51 }
  0x77   :  { %v462_v62 = vsel %vm461_vm7, %v431_v61, %v460_v59 }
  0x78   :  { %v464_v63 = vsel %vm463_vm8, %v432_v58, %v462_v62  ;;  %v1778_v58 = vld [vmem:[%s3070_s11] ss:$0 sm:$0xff] }
  0x79   :  { %v466_v2 = vsel %vm465_vm9, %v433_v60, %v464_v63 }
  0x7a   :  { %1873 = vmatmul.mubr.msk.f32.vlgmr.msra.gmra.mxu1 %vm159_vm0, %v466_v2 }
  0x7b   :  { %1876 = vmatpush3.msra.mxu1 %v542_v1  ;;  %1883 = vmatprep.mubr.msk.f32.mxu1 %vm2244_vm2, %v2243_v0 }
  0x7c   :  { %1877 = vmatprep.subr.mxu1 %v2243_v0 }
  0x7d   :  { %1878 = vmatpush3.msra.mxu1 %v541_v3 }
  0x7e   :  { %1879 = vmatprep.subr.mxu1 %v2243_v0 }
  0x7f   :  { %1880 = vmatpush3.msra.mxu1 %v540_v6 }
  0x80   :  { %1881 = vmatprep.subr.mxu1 %v2243_v0 }
  0x81   :  { %1882 = vmatpush3.msra.mxu1 %v539_v7 }
  0x82   :  { %1884 = vmatmul.mubr.msk.f32.vlgmr.msra.gmra.mxu1 %vm159_vm0, %v466_v2 }
 0x121   :  { %v1842_v12 = vpop.f32.mrf.mxu0 }
 0x122   :  { %v2501_v13 = vadd.f32 %v1842_v12, %v1759_v11 }
 0x123   :  { %v274_v15 = vpop.f32.mrf.mxu0  ;;  %v1860_v18 = vpop.f32.mrf.mxu1 }
 0x124   :  { %3082 = vst [vmem:[#allocation23_spill] sm:$0xff] %v2501_v13  ;;  %v2503_v19 = vadd.f32 %v1759_v11, %v274_v15  ;;  %v2505_v20 = vadd.f32 %v1860_v18, %v1759_v11 }
 0x125   :  { %v1845_v21 = vpop.f32.mrf.mxu0  ;;  %v334_v22 = vpop.f32.mrf.mxu1 }
 0x126   :  { %3083 = vst [vmem:[#allocation24_spill] sm:$0xff] %v2503_v19  ;;  %3084 = vst [vmem:[#allocation25_spill] sm:$0xff] %v2505_v20  ;;  %v2507_v25 = vadd.f32 %v1845_v21, %v1759_v11  ;;  %v2509_v26 = vadd.f32 %v1759_v11, %v334_v22 }
 0x127   :  { %v284_v0 = vpop.f32.mrf.mxu0  ;;  %v1863_v27 = vpop.f32.mrf.mxu1 }
 0x128   :  { %3085 = vst [vmem:[#allocation26_spill] sm:$0xff] %v2507_v25  ;;  %3086 = vst [vmem:[#allocation27_spill] sm:$0xff] %v2509_v26  ;;  %v2511_v28 = vadd.f32 %v1759_v11, %v284_v0  ;;  %v2513_v31 = vadd.f32 %v1863_v27, %v1759_v11 }
 0x129   :  { %v1848_v32 = vpop.f32.mrf.mxu0  ;;  %v344_v33 = vpop.f32.mrf.mxu1 }
 0x12a   :  { %3087 = vst [vmem:[#allocation28_spill] sm:$0xff] %v2511_v28  ;;  %3088 = vst [vmem:[#allocation29_spill] sm:$0xff] %v2513_v31  ;;  %v2515_v34 = vadd.f32 %v1848_v32, %v1759_v11  ;;  %v2517_v35 = vadd.f32 %v1759_v11, %v344_v33 }
 0x12b   :  { %v294_v36 = vpop.f32.mrf.mxu0 }
 0x12c   :  { %3089 = vst [vmem:[#allocation30_spill] sm:$0xff] %v2515_v34  ;;  %3090 = vst [vmem:[#allocation31_spill] sm:$0xff] %v2517_v35  ;;  %v2519_v37 = vadd.f32 %v1759_v11, %v294_v36 }
 0x12d   :  { %v1851_v38 = vpop.f32.mrf.mxu0 }
 0x12e   :  { %3091 = vst [vmem:[#allocation32_spill] sm:$0xff] %v2519_v37  ;;  %v2521_v42 = vadd.f32 %v1851_v38, %v1759_v11 }
 0x12f   :  { %v304_v43 = vpop.f32.mrf.mxu0 }
 0x130   :  { %3092 = vst [vmem:[#allocation33_spill] sm:$0xff] %v2521_v42  ;;  %v2523_v44 = vadd.f32 %v1759_v11, %v304_v43 }
 0x131   :  { %v1854_v45 = vpop.f32.mrf.mxu0 }
 0x132   :  { %3093 = vst [vmem:[#allocation34_spill] sm:$0xff] %v2523_v44  ;;  %v2525_v46 = vadd.f32 %v1854_v45, %v1759_v11 }
 0x133   :  { %v314_v47 = vpop.f32.mrf.mxu0 }
 0x134   :  { %3094 = vst [vmem:[#allocation35_spill] sm:$0xff] %v2525_v46  ;;  %v2527_v48 = vadd.f32 %v1759_v11, %v314_v47 }
 0x135   :  { %v1857_v49 = vpop.f32.mrf.mxu0 }
 0x136   :  { %3095 = vst [vmem:[#allocation36_spill] sm:$0xff] %v2527_v48  ;;  %v2529_v50 = vadd.f32 %v1857_v49, %v1759_v11 }
 0x137   :  { %v324_v53 = vpop.f32.mrf.mxu0 }
 0x138   :  { %v2531_v54 = vadd.f32 %v1759_v11, %v324_v53 }
 0x13a   :  { %v535_v55 = vpop.f32.mrf.mxu1 }
 0x13b   :  { %v536_v56 = vadd.f32 %v1776_v52, %v535_v55  }
 0x13c   :  { %v1874_v57 = vpop.f32.mrf.mxu1 }
 0x142   :  { %v616_v59 = vpop.f32.mrf.mxu1 }
 0x143   :  { %v617_v60 = vadd.f32 %v1778_v58, %v616_v59  }
 0x144   :  { %v1885_v61 = vpop.f32.mrf.mxu1 }
 0x145 LB: > { %v636_v62 = vld [vmem:[%s3063_s4 + $0x18] sm:$0xff]  ;;  %v3073_v63 = vmov 0.0   ;;  %v635_v1 = vld [vmem:[%s3063_s4 + $0x10] sm:$0xff]  ;;  %vm2246_vm10 = vmmov 0   ;;  %v634_v2 = vld [vmem:[%s3063_s4 + $0x8] sm:$0xff]  ;;  %v715_v11 = vlaneseq  ;;  %vm930_vm11 = vcmask 130112   ;;  %s2232_s24 = sphi %s2540_s24, %s630_s24   ;;  %v2228_v56 = vphi %v536_v56, %v1616_v56   ;;  %v2224_v60 = vphi %v617_v60, %v1704_v60  }
 0x146   : > { %1886 = vmatprep.subr.mxu0 %v3073_v63  ;;  %1894 = vmatprep.mubr.msk.f32.mxu0 %vm2246_vm10, %v3073_v63  ;;  %v633_v3 = vld [vmem:[%s3063_s4] sm:$0xff]  ;;  %v2247_v6 = vmov 1966171168   ;;  %v3096_v19 = vld [vmem:[#allocation24_spill] sm:$0xff]  ;;  %v3097_v13 = vld [vmem:[#allocation23_spill] sm:$0xff]  ;;  %s2249_s16 = smov 48  }
 0x147   : > { %1887 = vmatpush3.msra.mxu0 %v636_v62  ;;  %1897 = vmatprep.subr.mxu1 %v3073_v63  ;;  %v713_v7 = vunpack.c.l.s4 %v2247_v6  ;;  %v2573_v15 = vshrl.u32 %v715_v11, 7  ;;  %v2584_v58 = vld [vmem:[#allocation8] ss:$0 sm:$0xff]  ;;  %v3098_v28 = vld [vmem:[#allocation28_spill] sm:$0xff]  ;;  %v3103_v46 = vld [vmem:[#allocation35_spill] sm:$0xff]  ;;  %s3006_s26 = sshll.u32 %s2232_s24, 3 }
 0x148   : > { %1888 = vmatprep.subr.mxu0 %v3073_v63  ;;  %1917 = vmatprep.mubr.msk.f32.mxu1 %vm2246_vm10, %v3073_v63  ;;  %v3099_v25 = vld [vmem:[#allocation26_spill] sm:$0xff]  ;;  %v3100_v37 = vld [vmem:[#allocation32_spill] sm:$0xff]  ;;  %v3105_v42 = vld [vmem:[#allocation33_spill] sm:$0xff]  ;;  %s1700_s3 = scalar_lea.vmem [#allocation15], %s3006_s26  ;;  %s2250_s27 = smov 32   ;;  %vm1493_vm12 = vcmask 392192  }
 0x149   : > { %1889 = vmatpush3.msra.mxu0 %v635_v1  ;;  %v714_v12 = vunpack.c.0.s8 %v713_v7  ;;  %v2577_v32 = vsub.s32 0, %v2573_v15  ;;  %v3101_v34 = vld [vmem:[#allocation30_spill] sm:$0xff]  ;;  %v3102_v48 = vld [vmem:[#allocation36_spill] sm:$0xff]  ;;  %v3106_v26 = vld [vmem:[#allocation27_spill] sm:$0xff]  ;;  %s2251_s9 = smov 16   ;;  %s1469_s28 = scalar_lea.vmem [#allocation2], %s3006_s26 }
 0x14a   : > { %1890 = vmatprep.subr.mxu0 %v3073_v63  ;;  %v3104_v44 = vld [vmem:[#allocation34_spill] sm:$0xff]  ;;  %v3107_v20 = vld [vmem:[#allocation25_spill] sm:$0xff]  ;;  %v3108_v35 = vld [vmem:[#allocation31_spill] sm:$0xff]  ;;  %vm1512_vm13 = vcmask 654336   ;;  %s2252_s29 = smov 64   ;;  %s2253_s15 = smov 96  }
 0x14b   : > { %1891 = vmatpush3.msra.mxu0 %v634_v2  ;;  %v717_v18 = vsub.s32 %v714_v12, %v2573_v15  ;;  %v3109_v31 = vld [vmem:[#allocation29_spill] sm:$0xff]  ;;  %s630_s24 = sadd.s32 1, %s2232_s24  }
 0x14c   : > { %1892 = vmatprep.subr.mxu0 %v3073_v63  ;;  %p627_p7 = scmp.ge.s32.totalorder %s630_s24, 7  }
 0x14d   : > { %1893 = vmatpush3.msra.mxu0 %v633_v3  ;;  %s2254_s17 = smov (%p627_p7), [#allocation14]   ;;  %s2255_s8 = smov (%p627_p7), [#allocation15]  }
 0x14e   : > { %1895 = vmatmul.mubr.msk.f32.vlgmr.msra.gmra.mxu0 %vm159_vm0, %v2228_v56  ;;  %s1711_s2 = sshll.u32 (%p627_p7), %s2254_s17, 4  ;;  %s1723_s18 = sshll.u32 (%p627_p7), %s2255_s8, 4  ;;  %s1712_s2 = int_to_ptr.vmem [resolvable:$true] %s1711_s2  ;;  %s1724_s18 = int_to_ptr.vmem [resolvable:$true] %s1723_s18 }
 0x14f   :  { %s2158_s19 = scalar_lea.vmem (%p627_p7), %s1712_s2, 1024  ;;  %p2163_p9 = scmp.lt.s32.totalorder (%p627_p7), %s1712_s2, %s1712_s2 }
 0x150   :  { %p2159_p8 = scmp.ne.s32.totalorder (%p627_p7), %s1712_s2, %s2158_s19  ;;  %p2164_p10 = scmp.lt.s32.totalorder (%p627_p7), %s2158_s19, %s2158_s19 }
 0x152   :  { %p2165_p11 = por (%p627_p7), %p2164_p10, %p2163_p9 }
 0x154   :  { %p2166_p12 = pnand (%p627_p7), %p2165_p11, %p2159_p8 }
 0x20e   : > { %v706_v21 = vpop.f32.mrf.mxu0 }
 0x20f   : > { %v711_v22 = vcombine.high %v706_v21, %v706_v21  ;;  %v718_v0 = vrot.slane %v706_v21, %v717_v18 }
 0x210   : > { %v1896_v27 = vpop.f32.mrf.mxu0 }
 0x211   : > { %v725_v33 = vrot.slane %v711_v22, %v717_v18  ;;  %v726_v36 = vcombine.high %v718_v0, %v718_v0  ;;  %v734_v38 = vrot.slane %v718_v0, %v717_v18 }
 0x213   : > { %v741_v43 = vrot.slane %v725_v33, %v717_v18  ;;  %v748_v45 = vrot.slane %v726_v36, %v717_v18  ;;  %v756_v47 = vcombine.high %v734_v38, %v734_v38  ;;  %v763_v49 = vrot.slane %v734_v38, %v2577_v32 }
 0x214   : > { %v727_v2 = vcombine.high %v725_v33, %v725_v33 }
 0x215   : > { %v767_v52 = vrot.slane %v748_v45, %v2577_v32  ;;  %v771_v53 = vrot.slane %v756_v47, %v2577_v32  ;;  %v800_v55 = vadd.f32 %v763_v49, %v3096_v19  ;;  %v801_v57 = vadd.f32 %v763_v49, %v3097_v13 }
 0x216   : > { %v779_v1 = vrot.slane %v741_v43, %v2577_v32  ;;  %v758_v0 = vcombine.high %v748_v45, %v748_v45 }
 0x217   : > { %v802_v59 = vadd.f32 %v767_v52, %v3098_v28  ;;  %v803_v61 = vadd.f32 %v767_v52, %v3099_v25  ;;  %v804_v62 = vadd.f32 %v771_v53, %v3100_v37  ;;  %v816_v3 = vmax.f32 %v800_v55, 0.0 }
 0x218   : > { %v817_v6 = vmax.f32 %v801_v57, 0.0  ;;  %v805_v21 = vadd.f32 %v771_v53, %v3101_v34  ;;  %v808_v38 = vadd.f32 %v779_v1, %v3102_v48  ;;  %v755_v52 = vrot.slane %v727_v2, %v717_v18 }
 0x219   : > { %v818_v7 = vmax.f32 %v802_v59, 0.0  ;;  %v819_v12 = vmax.f32 %v803_v61, 0.0  ;;  %v839_v22 = vmul.f32 %v2584_v58, %v816_v3  ;;  %v820_v36 = vmax.f32 %v804_v62, 0.0 }
 0x21a   : > { %v840_v49 = vmul.f32 %v2584_v58, %v817_v6  ;;  %v821_v57 = vmax.f32 %v805_v21, 0.0  ;;  %v809_v53 = vadd.f32 %v779_v1, %v3103_v46  ;;  %v775_v45 = vrot.slane %v758_v0, %v2577_v32 }
 0x21b   : > { %v841_v27 = vmul.f32 %v2584_v58, %v818_v7  ;;  %v855_v47 = vsel %vm623_vm1, %v839_v22, 0.0  ;;  %v842_v55 = vmul.f32 %v2584_v58, %v819_v12  ;;  %v843_v59 = vmul.f32 %v2584_v58, %v820_v36 }
 0x21c   : > { %856 = vadd.xlane.f32.xlu0 %v855_v47  ;;  %v824_v61 = vmax.f32 %v808_v38, 0.0  ;;  %v858_v62 = vsel %vm623_vm1, %v840_v49, 0.0  ;;  %v806_v3 = vadd.f32 %v775_v45, %v3104_v44  ;;  %v783_v18 = vrot.slane %v755_v52, %v2577_v32 }
 0x21d   : > { %v861_v33 = vsel %vm623_vm1, %v841_v27, 0.0  ;;  %v757_v2 = vcombine.high %v741_v43, %v741_v43  ;;  %v864_v6 = vsel %vm623_vm1, %v842_v55, 0.0  ;;  %v844_v7 = vmul.f32 %v2584_v58, %v821_v57 }
 0x21e   : > { %862 = vadd.xlane.f32.xlu1 %v861_v33  ;;  %v825_v12 = vmax.f32 %v809_v53, 0.0  ;;  %v807_v1 = vadd.f32 %v775_v45, %v3105_v42  ;;  %v867_v21 = vsel %vm623_vm1, %v843_v59, 0.0  ;;  %v847_v22 = vmul.f32 %v2584_v58, %v824_v61 }
 0x21f   : > { %v822_v0 = vmax.f32 %v806_v3, 0.0  ;;  %v810_v27 = vadd.f32 %v783_v18, %v2531_v54  ;;  %v787_v36 = vrot.slane %v757_v2, %v2577_v32  ;;  %v759_v38 = vcombine.high %v755_v52, %v755_v52 }
 0x220   : > { %859 = vadd.xlane.f32.xlu0 %v858_v62  ;;  %v870_v43 = vsel %vm623_vm1, %v844_v7, 0.0  ;;  %v848_v47 = vmul.f32 %v2584_v58, %v825_v12  ;;  %v823_v49 = vmax.f32 %v807_v1, 0.0  ;;  %v811_v33 = vadd.f32 %v783_v18, %v2529_v50 }
 0x221   : > { %v879_v55 = vsel %vm623_vm1, %v847_v22, 0.0  ;;  %v845_v57 = vmul.f32 %v2584_v58, %v822_v0  ;;  %v826_v53 = vmax.f32 %v810_v27, 0.0  ;;  %v812_v45 = vadd.f32 %v787_v36, %v3106_v26 }
 0x222   : > { %865 = vadd.xlane.f32.xlu1 %v864_v6  ;;  %v791_v59 = vrot.slane %v759_v38, %v2577_v32  ;;  %v882_v52 = vsel %vm623_vm1, %v848_v47, 0.0  ;;  %v846_v61 = vmul.f32 %v2584_v58, %v823_v49  ;;  %v827_v62 = vmax.f32 %v811_v33, 0.0 }
 0x223   : > { %v813_v3 = vadd.f32 %v787_v36, %v3107_v20  ;;  %v873_v18 = vsel %vm623_vm1, %v845_v57, 0.0  ;;  %v849_v2 = vmul.f32 %v2584_v58, %v826_v53  ;;  %v828_v6 = vmax.f32 %v812_v45, 0.0 }
 0x224   : > { %868 = vadd.xlane.f32.xlu0 %v867_v21  ;;  %v814_v7 = vadd.f32 %v791_v59, %v3108_v35  ;;  %v876_v12 = vsel %vm623_vm1, %v846_v61, 0.0  ;;  %v850_v1 = vmul.f32 %v2584_v58, %v827_v62  ;;  %v815_v22 = vadd.f32 %v791_v59, %v3109_v31 }
 0x225   : > { %v829_v21 = vmax.f32 %v813_v3, 0.0  ;;  %v885_v0 = vsel %vm623_vm1, %v849_v2, 0.0  ;;  %v851_v27 = vmul.f32 %v2584_v58, %v828_v6 }
 0x226   : > { %871 = vadd.xlane.f32.xlu1 %v870_v43  ;;  %v830_v36 = vmax.f32 %v814_v7, 0.0  ;;  %v888_v38 = vsel %vm623_vm1, %v850_v1, 0.0  ;;  %v831_v47 = vmax.f32 %v815_v22, 0.0 }
 0x227   : > { %v852_v43 = vmul.f32 %v2584_v58, %v829_v21  ;;  %v891_v49 = vsel %vm623_vm1, %v851_v27, 0.0 }
 0x228   : > { %880 = vadd.xlane.f32.xlu0 %v879_v55  ;;  %v853_v33 = vmul.f32 %v2584_v58, %v830_v36  ;;  %v854_v57 = vmul.f32 %v2584_v58, %v831_v47  ;;  %v920_v58 = vand.u32 127, %v715_v11 }
 0x229   : > { %v894_v55 = vsel %vm623_vm1, %v852_v43, 0.0 }
 0x22a   : > { %883 = vadd.xlane.f32.xlu1 %v882_v52  ;;  %v897_v53 = vsel %vm623_vm1, %v853_v33, 0.0  ;;  %v900_v45 = vsel %vm623_vm1, %v854_v57, 0.0  ;;  %v925_v2 = vadd.s32 4294967288, %v920_v58  ;;  %v2662_v22 = vsub.s32 %v920_v58, %v2573_v15 }
 0x22c   : > { %874 = vadd.xlane.f32.xlu0 %v873_v18 }
 0x22e   : > { %877 = vadd.xlane.f32.xlu1 %v876_v12  ;;  %v2655_v12 = vsub.s32 %v925_v2, %v2573_v15 }
 0x230   : > { %886 = vadd.xlane.f32.xlu0 %v885_v0 }
 0x232   : > { %889 = vadd.xlane.f32.xlu1 %v888_v38 }
 0x234   : > { %892 = vadd.xlane.f32.xlu0 %v891_v49 }
 0x236   : > { %895 = vadd.xlane.f32.xlu1 %v894_v55 }
 0x238   : > { %898 = vadd.xlane.f32.xlu0 %v897_v53 }
 0x23a   : > { %901 = vadd.xlane.f32.xlu1 %v900_v45 }
 0x2a5   : > { %v2637_v59 = vpop.xlane.xlu0 %856 }
 0x2a6   : > { %v924_v33 = vrot.slane %v2637_v59, %v2662_v22 }
 0x2a7   : > { %v2639_v52 = vpop.xlane.xlu1 %862 }
 0x2a8   : > { %v935_v27 = vrot.slane %v2639_v52, %v2662_v22 }
 0x2a9   : > { %v2641_v61 = vpop.xlane.xlu0 %859 }
 0x2aa   : > { %v929_v36 = vrot.slane %v2641_v61, %v2655_v12 }
 0x2ab   : > { %v2643_v62 = vpop.xlane.xlu1 %865 }
 0x2ac   : > { %v939_v0 = vrot.slane %v2643_v62, %v2655_v12  ;;  %v931_v45 = vsel %vm930_vm11, %v929_v36, %v924_v33 }
 0x2ad   : > { %v2645_v3 = vpop.xlane.xlu0 %868 }
 0x2ae   : > { %v944_v47 = vrot.slane %v2645_v3, %v2662_v22  ;;  %v940_v55 = vsel %vm930_vm11, %v939_v0, %v935_v27 }
 0x2af   : > { %v2647_v18 = vpop.xlane.xlu1 %871  ;;  %v995_v0 = vsel %vm453_vm3, %v940_v55, %v931_v45 }
 0x2b0   : > { %v948_v11 = vrot.slane %v2647_v18, %v2655_v12 }
 0x2b1   : > { %v2650_v6 = vpop.xlane.xlu0 %880 }
 0x2b2   : > { %v949_v53 = vsel %vm930_vm11, %v948_v11, %v944_v47  ;;  %v962_v47 = vrot.slane %v2650_v6, %v2662_v22 }
 0x2b3   : > { %v2652_v7 = vpop.xlane.xlu1 %883  ;;  %v996_v36 = vsel %vm455_vm4, %v949_v53, %v995_v0 }
 0x2b4   : > { %v966_v13 = vrot.slane %v2652_v7, %v2655_v12 }
 0x2b5   : > { %v2657_v1 = vpop.xlane.xlu0 %874 }
 0x2b6   : > { %v953_v57 = vrot.slane %v2657_v1, %v2662_v22  ;;  %v967_v55 = vsel %vm930_vm11, %v966_v13, %v962_v47  ;;  %v2248_v13 = vmov 0  }
 0x2b7   : > { %v2659_v21 = vpop.xlane.xlu1 %877  ;;  %1975 = vset.pattern.permute.xlu0 %v2248_v13  ;;  %1974 = vset.pattern.permute.xlu1 %v2248_v13 }
 0x2b8   : > { %v957_v38 = vrot.slane %v2659_v21, %v2655_v12 }
 0x2b9   : > { %v2674_v43 = vpop.xlane.xlu0 %886 }
 0x2ba   : > { %v958_v63 = vsel %vm930_vm11, %v957_v38, %v953_v57  ;;  %v971_v27 = vrot.slane %v2674_v43, %v2662_v22 }
 0x2bb   : > { %v2678_v49 = vpop.xlane.xlu1 %889  ;;  %v997_v33 = vsel %vm457_vm5, %v958_v63, %v996_v36 }
 0x2bc   : > { %v975_v58 = vrot.slane %v2678_v49, %v2655_v12  ;;  %v998_v0 = vsel %vm459_vm6, %v967_v55, %v997_v33  ;;  %v3077_v55 = vsub.s32 2, %v2573_v15 }
 0x2bd   : > { %v893_v2 = vpop.xlane.xlu0 %892 }
 0x2be   : > { %v980_v38 = vrot.slane %v893_v2, %v2662_v22  ;;  %v976_v20 = vsel %vm930_vm11, %v975_v58, %v971_v27 }
 0x2bf   : > { %v2692_v19 = vpop.xlane.xlu1 %895  ;;  %v999_v28 = vsel %vm461_vm7, %v976_v20, %v998_v0 }
 0x2c0   : > { %v984_v11 = vrot.slane %v2692_v19, %v2655_v12 }
 0x2c1   : > { %v899_v57 = vpop.xlane.xlu0 %898 }
 0x2c2   : > { %v985_v45 = vsel %vm930_vm11, %v984_v11, %v980_v38  ;;  %v989_v26 = vrot.slane %v899_v57, %v2662_v22  ;;  %v3079_v11 = vsub.s32 1, %v2573_v15 }
 0x2c3   : > { %v2705_v25 = vpop.xlane.xlu1 %901  ;;  %v1000_v36 = vsel %vm463_vm8, %v985_v45, %v999_v28 }
 0x2c4   : > { %v993_v53 = vrot.slane %v2705_v25, %v2655_v12 }
 0x2c6   : > { %v994_v63 = vsel %vm930_vm11, %v993_v53, %v989_v26  ;;  %v3076_v26 = vsub.s32 5, %v2573_v15  ;;  %v3075_v53 = vsub.s32 6, %v2573_v15 }
 0x2c7   : > { %v1001_v58 = vsel %vm465_vm9, %v994_v63, %v1000_v36 }
 0x2c8   : > { %v1003_v27 = vsel %vm623_vm1, %v1001_v58, -inf }
 0x2c9   : > { %1004 = vmax.xlane.f32.xlu0 %v1003_v27 }
 0x352   : > { %v1005_v47 = vpop.xlane.xlu0 %1004 }
 0x353   : > { %v1010_v38 = vrot.slane %v1005_v47, %v2577_v32  ;;  %v1014_v20 = vrot.slane %v1005_v47, %v3079_v11  ;;  %v2730_v0 = vrot.slane %v1005_v47, %v3076_v26  ;;  %v1018_v58 = vrot.slane %v1005_v47, %v3077_v55 }
 0x354   : > { %v3081_v55 = vsub.s32 4, %v2573_v15 }
 0x355   : > { %v1047_v28 = vsub.f32 %v2637_v59, %v1010_v38  ;;  %v1048_v33 = vsub.f32 %v2641_v61, %v1010_v38  ;;  %v1049_v45 = vsub.f32 %v2639_v52, %v1014_v20  ;;  %v1050_v27 = vsub.f32 %v2643_v62, %v1014_v20 }
 0x356   : > { %v3080_v61 = vsub.s32 7, %v2573_v15  ;;  %v1034_v52 = vrot.slane %v1005_v47, %v3075_v53  ;;  %v1057_v13 = vsub.f32 %v2674_v43, %v2730_v0  ;;  %v3078_v38 = vsub.s32 3, %v2573_v15 }
 0x357   : > { %v1063_v63 = vmul.f32 1.442695, %v1047_v28  ;;  %v1065_v36 = vmul.f32 1.442695, %v1048_v33  ;;  %v1067_v59 = vmul.f32 1.442695, %v1049_v45  ;;  %v1051_v28 = vsub.f32 %v2645_v3, %v1018_v58 }
 0x358   : > { %v1069_v33 = vmul.f32 1.442695, %v1050_v27  ;;  %v1038_v62 = vrot.slane %v1005_v47, %v3080_v61  ;;  %v1059_v20 = vsub.f32 %v893_v2, %v1034_v52  ;;  %v1083_v45 = vmul.f32 1.442695, %v1057_v13 }
 0x359   : > { %1976 = vpow2.f32 %v1063_v63  ;;  %v1022_v63 = vrot.slane %v1005_v47, %v3078_v38  ;;  %v1071_v53 = vmul.f32 1.442695, %v1051_v28 }
 0x35a   : > { %1978 = vpow2.f32 %v1065_v36  ;;  %v1052_v36 = vsub.f32 %v2647_v18, %v1018_v58  ;;  %v1061_v26 = vsub.f32 %v899_v57, %v1038_v62  ;;  %v1087_v43 = vmul.f32 1.442695, %v1059_v20 }
 0x35b   : > { %1980 = vpow2.f32 %v1067_v59  ;;  %v1053_v3 = vsub.f32 %v2657_v1, %v1022_v63  ;;  %v1026_v18 = vrot.slane %v1005_v47, %v3081_v55  ;;  %v1054_v57 = vsub.f32 %v2659_v21, %v1022_v63 }
 0x35c   : > { %1982 = vpow2.f32 %v1069_v33  ;;  %v1073_v27 = vmul.f32 1.442695, %v1052_v36  ;;  %v1091_v13 = vmul.f32 1.442695, %v1061_v26 }
 0x35d   : > { %1984 = vpow2.f32 %v1083_v45  ;;  %v1075_v58 = vmul.f32 1.442695, %v1053_v3  ;;  %v1077_v26 = vmul.f32 1.442695, %v1054_v57  ;;  %v1056_v47 = vsub.f32 %v2652_v7, %v1026_v18 }
 0x35e   : > { %1986 = vpow2.f32 %v1071_v53  ;;  %v1055_v53 = vsub.f32 %v2650_v6, %v1026_v18  ;;  %v1058_v6 = vsub.f32 %v2678_v49, %v2730_v0  ;;  %v1062_v49 = vsub.f32 %v2705_v25, %v1038_v62 }
 0x35f   : > { %1988 = vpow2.f32 %v1087_v43  ;;  %v1081_v63 = vmul.f32 1.442695, %v1056_v47  ;;  %v1060_v43 = vsub.f32 %v2692_v19, %v1034_v52 }
 0x360   : > { %1990 = vpow2.f32 %v1073_v27  ;;  %v1079_v21 = vmul.f32 1.442695, %v1055_v53  ;;  %v1085_v3 = vmul.f32 1.442695, %v1058_v6  ;;  %v1093_v18 = vmul.f32 1.442695, %v1062_v49 }
 0x361   : > { %1992 = vpow2.f32 %v1091_v13  ;;  %v1089_v0 = vmul.f32 1.442695, %v1060_v43 }
 0x362   : > { %1994 = vpow2.f32 %v1075_v58 }
 0x363   : > { %1996 = vpow2.f32 %v1077_v26 }
 0x364   : > { %1998 = vpow2.f32 %v1079_v21 }
 0x365   : > { %2000 = vpow2.f32 %v1081_v63 }
 0x366   : > { %v2749_v59 = vpop.eup %1976  ;;  %2002 = vpow2.f32 %v1085_v3 }
 0x367   : > { %v2751_v2 = vpop.eup %1978  ;;  %1112 = vperm.xlu1 %1974, %v2749_v59   ;;  %2004 = vpow2.f32 %v1089_v0 }
 0x368   : > { %1115 = vperm.xlu0 %1975, %v2751_v2   ;;  %v2758_v1 = vpop.eup %1980  ;;  %2006 = vpow2.f32 %v1093_v18 }
 0x369   : > { %v2762_v28 = vpop.eup %1982 }
 0x36a   : > { %v2765_v33 = vpop.eup %1984 }
 0x36b   : > { %1118 = vperm.xlu1 %1974, %v2758_v1   ;;  %v2769_v20 = vpop.eup %1986 }
 0x36c   : > { %1142 = vperm.xlu0 %1975, %v2765_v33   ;;  %v2772_v45 = vpop.eup %1988 }
 0x36d   : > { %v2777_v36 = vpop.eup %1990 }
 0x36e   : > { %v2780_v7 = vpop.eup %1992 }
 0x36f   : > { %1121 = vperm.xlu1 %1974, %v2762_v28   ;;  %v2784_v27 = vpop.eup %1994 }
 0x370   : > { %1148 = vperm.xlu0 %1975, %v2772_v45   ;;  %v2788_v13 = vpop.eup %1996 }
 0x371   : > { %v2791_v57 = vpop.eup %1998 }
 0x372   : > { %v2794_v19 = vpop.eup %2000 }
 0x373   : > { %1124 = vperm.xlu1 %1974, %v2769_v20   ;;  %v2797_v52 = vpop.eup %2002 }
 0x374   : > { %1154 = vperm.xlu0 %1975, %v2780_v7   ;;  %v2800_v25 = vpop.eup %2004 }
 0x375   : > { %v2803_v62 = vpop.eup %2006 }
 0x377   : > { %1127 = vperm.xlu1 %1974, %v2777_v36  }
 0x37b   : > { %1130 = vperm.xlu1 %1974, %v2784_v27  }
 0x37f   : > { %1133 = vperm.xlu1 %1974, %v2788_v13  }
 0x383   : > { %1136 = vperm.xlu1 %1974, %v2791_v57  }
 0x387   : > { %1139 = vperm.xlu1 %1974, %v2794_v19  }
 0x38b   : > { %1145 = vperm.xlu1 %1974, %v2797_v52  }
 0x38f   : > { %1151 = vperm.xlu1 %1974, %v2800_v25  }
 0x393   : > { %1157 = vperm.xlu1 %1974, %v2803_v62  }
 0x3e2   : > { %v1113_v58 = vpop.permute.xlu1 %1112 }
 0x3e3   : > { %v1116_v63 = vpop.permute.xlu0 %1115  ;;  %v1162_v31 = vrot.slane %v1113_v58, %v2662_v22 }
 0x3e4   : > { %v1166_v55 = vrot.slane %v1116_v63, %v2655_v12 }
 0x3e6   : > { %v1119_v53 = vpop.permute.xlu1 %1118  ;;  %v1167_v58 = vsel %vm930_vm11, %v1166_v55, %v1162_v31 }
 0x3e7   : > { %v1143_v49 = vpop.permute.xlu0 %1142  ;;  %v1171_v34 = vrot.slane %v1119_v53, %v2662_v22 }
 0x3e8   : > { %v1207_v53 = vrot.slane %v1143_v49, %v2662_v22 }
 0x3ea   : > { %v1122_v26 = vpop.permute.xlu1 %1121 }
 0x3eb   : > { %v1175_v18 = vrot.slane %v1122_v26, %v2655_v12  ;;  %v1149_v38 = vpop.permute.xlu0 %1148 }
 0x3ed   : > { %v1176_v44 = vsel %vm930_vm11, %v1175_v18, %v1171_v34 }
 0x3ee   : > { %v1125_v47 = vpop.permute.xlu1 %1124  ;;  %v1231_v34 = vsel %vm453_vm3, %v1176_v44, %v1167_v58 }
 0x3ef   : > { %v1180_v37 = vrot.slane %v1125_v47, %v2662_v22 }
 0x3f2   : > { %v1128_v21 = vpop.permute.xlu1 %1127 }
 0x3f3   : > { %v1184_v11 = vrot.slane %v1128_v21, %v2655_v12 }
 0x3f5   : > { %v1185_v21 = vsel %vm930_vm11, %v1184_v11, %v1180_v37 }
 0x3f6   : > { %v1131_v6 = vpop.permute.xlu1 %1130  ;;  %v1232_v11 = vsel %vm455_vm4, %v1185_v21, %v1231_v34 }
 0x3f7   : > { %v1189_v26 = vrot.slane %v1131_v6, %v2662_v22  ;;  %v1155_v6 = vpop.permute.xlu0 %1154 }
 0x3fa   : > { %v1134_v43 = vpop.permute.xlu1 %1133 }
 0x3fb   : > { %v1193_v35 = vrot.slane %v1134_v43, %v2655_v12 }
 0x3fd   : > { %v1194_v43 = vsel %vm930_vm11, %v1193_v35, %v1189_v26  ;;  %v1225_v35 = vrot.slane %v1155_v6, %v2662_v22 }
 0x3fe   : > { %v1137_v3 = vpop.permute.xlu1 %1136  ;;  %v1233_v55 = vsel %vm457_vm5, %v1194_v43, %v1232_v11 }
 0x3ff   : > { %v1198_v63 = vrot.slane %v1137_v3, %v2662_v22 }
 0x402   : > { %v1140_v0 = vpop.permute.xlu1 %1139 }
 0x403   : > { %v1202_v42 = vrot.slane %v1140_v0, %v2655_v12  ;;  %v1216_v0 = vrot.slane %v1149_v38, %v2662_v22 }
 0x406   : > { %v1146_v61 = vpop.permute.xlu1 %1145 }
 0x407   : > { %v1211_v46 = vrot.slane %v1146_v61, %v2655_v12  ;;  %v1203_v61 = vsel %vm930_vm11, %v1202_v42, %v1198_v63  ;;  %v3110_v63 = vsub.s32 4, %v2573_v15 }
 0x408   : > { %v1234_v38 = vsel %vm459_vm6, %v1203_v61, %v1233_v55 }
 0x409   : > { %v1212_v37 = vsel %vm930_vm11, %v1211_v46, %v1207_v53 }
 0x40a   : > { %v1152_v48 = vpop.permute.xlu1 %1151  ;;  %v1235_v44 = vsel %vm461_vm7, %v1212_v37, %v1234_v38  ;;  %v3112_v37 = vsub.s32 1, %v2573_v15 }
 0x40b   : > { %v1220_v47 = vrot.slane %v1152_v48, %v2655_v12 }
 0x40d   : > { %v1221_v31 = vsel %vm930_vm11, %v1220_v47, %v1216_v0  ;;  %v3111_v0 = vsub.s32 7, %v2573_v15 }
 0x40e   : > { %v1158_v3 = vpop.permute.xlu1 %1157  ;;  %v1236_v42 = vsel %vm463_vm8, %v1221_v31, %v1235_v44  ;;  %v3116_v44 = vsub.s32 6, %v2573_v15 }
 0x40f   : > { %v1229_v48 = vrot.slane %v1158_v3, %v2655_v12 }
 0x411   : > { %v1230_v49 = vsel %vm930_vm11, %v1229_v48, %v1225_v35  ;;  %v3115_v48 = vsub.s32 5, %v2573_v15 }
 0x412   : > { %v1237_v46 = vsel %vm465_vm9, %v1230_v49, %v1236_v42  ;;  %v1498_v42 = vld [vmem:[%s3065_s6 + $0x18] sm:$0xff] }
 0x413   : > { %v1239_v18 = vsel %vm623_vm1, %v1237_v46, 0.0  ;;  %v1497_v46 = vld [vmem:[%s3065_s6 + $0x10] sm:$0xff] }
 0x414   : > { %1240 = vadd.xlane.f32.xlu0 %v1239_v18  ;;  %v1496_v18 = vld [vmem:[%s3065_s6 + $0x8] sm:$0xff] }
 0x49d   : > { %v1241_v26 = vpop.xlane.xlu0 %1240 }
 0x49e   : > { %2008 = vrcp.f32 %v1241_v26 }
 0x4ab   : > { %v2009_v21 = vpop.eup %2008 }
 0x4ac   : > { %v1263_v58 = vrot.slane %v2009_v21, %v3110_v63  ;;  %v1247_v53 = vrot.slane %v2009_v21, %v2577_v32  ;;  %v1275_v34 = vrot.slane %v2009_v21, %v3111_v0  ;;  %v1251_v11 = vrot.slane %v2009_v21, %v3112_v37 }
 0x4ad   : > { %v1267_v38 = vrot.slane %v2009_v21, %v3115_v48  ;;  %v1271_v49 = vrot.slane %v2009_v21, %v3116_v44 }
 0x4ae   : > { %v1292_v43 = vmul.f32 %v2791_v57, %v1263_v58  ;;  %v1284_v47 = vmul.f32 %v2749_v59, %v1247_v53  ;;  %v1298_v6 = vmul.f32 %v2780_v7, %v1275_v34  ;;  %v1285_v61 = vmul.f32 %v2751_v2, %v1247_v53 }
 0x4af   : > { %v1286_v32 = vmul.f32 %v2758_v1, %v1251_v11  ;;  %v1287_v57 = vmul.f32 %v2762_v28, %v1251_v11  ;;  %v3113_v59 = vsub.s32 2, %v2573_v15  ;;  %v3114_v2 = vsub.s32 3, %v2573_v15 }
 0x4b0   : > { %1342 = vperm.xlu0 %1975, %v1292_v43   ;;  %1302 = vperm.xlu1 %1974, %v1284_v47   ;;  %v1293_v28 = vmul.f32 %v2794_v19, %v1263_v58  ;;  %v1299_v19 = vmul.f32 %v2803_v62, %v1275_v34  ;;  %v3117_v15 = vmov 0.0   ;;  %v1499_v62 = vld [vmem:[%s3065_s6 + $0x20] sm:$0xff] }
 0x4b1   : > { %v1255_v3 = vrot.slane %v2009_v21, %v3113_v59  ;;  %v1259_v55 = vrot.slane %v2009_v21, %v3114_v2 }
 0x4b3   : > { %v1288_v31 = vmul.f32 %v2769_v20, %v1255_v3  ;;  %v1289_v7 = vmul.f32 %v2777_v36, %v1255_v3  ;;  %v1290_v35 = vmul.f32 %v2784_v27, %v1259_v55  ;;  %v1291_v1 = vmul.f32 %v2788_v13, %v1259_v55 }
 0x4b4   : > { %1372 = vperm.xlu0 %1975, %v1298_v6   ;;  %1307 = vperm.xlu1 %1974, %v1285_v61   ;;  %v1294_v20 = vmul.f32 %v2765_v33, %v1267_v38  ;;  %v1295_v36 = vmul.f32 %v2797_v52, %v1267_v38  ;;  %v1296_v27 = vmul.f32 %v2772_v45, %v1271_v49  ;;  %v1504_v33 = vld [vmem:[%s3065_s6 + $0x48] sm:$0xff]  ;;  %v1503_v52 = vld [vmem:[%s3065_s6 + $0x40] sm:$0xff]  ;;  %v1502_v45 = vld [vmem:[%s3065_s6 + $0x38] sm:$0xff] }
 0x4b5   : > { %v1297_v13 = vmul.f32 %v2800_v25, %v1271_v49  ;;  %1898 = vmatpush3.msra.mxu1 %v1504_v33  ;;  %v1501_v25 = vld [vmem:[%s3065_s6 + $0x30] sm:$0xff] }
 0x4b6   : > { %1899 = vmatprep.subr.mxu1 %v3117_v15 }
 0x4b7   : > { %1900 = vmatpush3.msra.mxu1 %v1503_v52 }
 0x4b8   : > { %1312 = vperm.xlu1 %1974, %v1286_v32   ;;  %1901 = vmatprep.subr.mxu1 %v3117_v15 }
 0x4b9   : > { %1902 = vmatpush3.msra.mxu1 %v1502_v45 }
 0x4ba   : > { %1903 = vmatprep.subr.mxu1 %v3117_v15 }
 0x4bb   : > { %1904 = vmatpush3.msra.mxu1 %v1501_v25 }
 0x4bc   : > { %1317 = vperm.xlu1 %1974, %v1287_v57   ;;  %1905 = vmatprep.subr.mxu1 %v3117_v15 }
 0x4c0   : > { %1322 = vperm.xlu1 %1974, %v1288_v31  }
 0x4c4   : > { %1327 = vperm.xlu1 %1974, %v1289_v7  }
 0x4c8   : > { %1332 = vperm.xlu1 %1974, %v1290_v35  }
 0x4cc   : > { %1337 = vperm.xlu1 %1974, %v1291_v1  }
 0x4d0   : > { %1347 = vperm.xlu1 %1974, %v1293_v28  }
 0x4d4   : > { %1352 = vperm.xlu1 %1974, %v1294_v20  }
 0x4d8   : > { %1357 = vperm.xlu1 %1974, %v1295_v36  }
 0x4dc   : > { %1362 = vperm.xlu1 %1974, %v1296_v27  }
 0x4e0   : > { %1367 = vperm.xlu1 %1974, %v1297_v13  }
 0x4e4   : > { %1377 = vperm.xlu1 %1974, %v1299_v19  }
 0x4e8   : > { %1489 = vrot.lane.b32.xlu1 %v2228_v56, %s2249_s16  ;;  %v1500_v56 = vld [vmem:[%s3065_s6 + $0x28] sm:$0xff]  ;;  %s1618_s16 = scalar_lea.vmem [#allocation14], %s3006_s26 }
 0x4e9   : > { %1906 = vmatpush3.msra.mxu1 %v1500_v56 }
 0x4ea   : > { %1907 = vmatprep.subr.mxu1 %v3117_v15 }
 0x4eb   : > { %1908 = vmatpush3.msra.mxu1 %v1499_v62 }
 0x4ec   : > { %1909 = vmatprep.subr.mxu1 %v3117_v15  ;;  %1594 = vrot.lane.b32.xlu1 %v2224_v60, %s2250_s27 }
 0x4ed   : > { %1910 = vmatpush3.msra.mxu1 %v1498_v42 }
 0x4ee   : > { %1911 = vmatprep.subr.mxu1 %v3117_v15 }
 0x4ef   : > { %1912 = vmatpush3.msra.mxu1 %v1497_v46 }
 0x4f0   : > { %1913 = vmatprep.subr.mxu1 %v3117_v15 }
 0x4f1   : > { %1914 = vmatpush3.msra.mxu1 %v1496_v18 }
 0x4f2   : > { %1915 = vmatprep.subr.mxu1 %v3117_v15 }
 0x52b   : > { %v2906_v26 = vpop.permute.xlu1 %1302  ;;  %v2932_v57 = vpop.permute.xlu0 %1342 }
 0x52c   : > { %v1380_v0 = vmul.f32 %v2906_v26, %v2369_v4  ;;  %v1388_v36 = vmul.f32 %v2932_v57, %v2422_v39  ;;  %v1659_v18 = vrot.slane %v2932_v57, %v2662_v22 }
 0x52e   : > { %v1396_v11 = vsel %vm159_vm0, %v1380_v0, 0.0  ;;  %v1432_v25 = vsel %vm159_vm0, %v1388_v36, 0.0 }
 0x52f   : > { %v2908_v21 = vpop.permute.xlu1 %1307  ;;  %v2951_v44 = vpop.permute.xlu0 %1372 }
 0x530   : > { %v1381_v47 = vmul.f32 %v2908_v21, %v2371_v5  ;;  %v1394_v56 = vmul.f32 %v2951_v44, %v2406_v23  ;;  %v1686_v57 = vrot.slane %v2951_v44, %v2662_v22 }
 0x532   : > { %v1397_v61 = vsel %vm159_vm0, %v1381_v47, 0.0  ;;  %v1623_v47 = vrot.slane %v2906_v26, %v2662_v22 }
 0x533   : > { %v2910_v63 = vpop.permute.xlu1 %1312  ;;  %v1398_v59 = vadd.f32 %v1397_v61, %v1396_v11  ;;  %v1627_v11 = vrot.slane %v2908_v21, %v2655_v12 }
 0x534   : > { %v1382_v37 = vmul.f32 %v2910_v63, %v2377_v8 }
 0x535   : > { %v1399_v28 = vrot.slane %v1398_v59, 4 }
 0x536   : > { %v1405_v7 = vsel %vm159_vm0, %v1382_v37, 0.0 }
 0x537   : > { %v2912_v58 = vpop.permute.xlu1 %1317  ;;  %v1400_v15 = vadd.f32 %v1399_v28, %v1398_v59 }
 0x538   : > { %v1383_v6 = vmul.f32 %v2912_v58, %v2379_v9  ;;  %v1636_v59 = vrot.slane %v2912_v58, %v2655_v12 }
 0x539   : > { %v1401_v37 = vrot.slane %v1400_v15, 2 }
 0x53a   : > { %v1406_v3 = vsel %vm159_vm0, %v1383_v6, 0.0 }
 0x53b   : > { %v2914_v53 = vpop.permute.xlu1 %1322  ;;  %v1407_v35 = vadd.f32 %v1406_v3, %v1405_v7  ;;  %v2981_v36 = vadd.f32 %v1401_v37, %v1400_v15 }
 0x53c   : > { %v1384_v2 = vmul.f32 %v2914_v53, %v2393_v16  ;;  %v1641_v28 = vrot.slane %v2914_v53, %v2662_v22 }
 0x53d   : > { %v1408_v13 = vrot.slane %v1407_v35, 4 }
 0x53e   : > { %v1414_v49 = vsel %vm159_vm0, %v1384_v2, 0.0  ;;  %v1632_v2 = vrot.slane %v2910_v63, %v2662_v22 }
 0x53f   : > { %v2916_v43 = vpop.permute.xlu1 %1327  ;;  %v1409_v0 = vadd.f32 %v1408_v13, %v1407_v35 }
 0x540   : > { %v1385_v31 = vmul.f32 %v2916_v43, %v2395_v17  ;;  %v1645_v26 = vrot.slane %v2916_v43, %v2655_v12  ;;  %v1628_v43 = vsel %vm930_vm11, %v1627_v11, %v1623_v47  ;;  %v1637_v44 = vsel %vm930_vm11, %v1636_v59, %v1632_v2 }
 0x541   : > { %v1410_v58 = vrot.slane %v1409_v0, 2 }
 0x542   : > { %v1415_v48 = vsel %vm159_vm0, %v1385_v31, 0.0  ;;  %v1459_v31 = vsel %vm159_vm0, %v1394_v56, 0.0  ;;  %v1692_v56 = vsel %vm453_vm3, %v1637_v44, %v1628_v43 }
 0x543   : > { %v2922_v34 = vpop.permute.xlu1 %1332  ;;  %v1416_v19 = vadd.f32 %v1415_v48, %v1414_v49  ;;  %v1646_v49 = vsel %vm930_vm11, %v1645_v26, %v1641_v28 }
 0x544   : > { %v1386_v38 = vmul.f32 %v2922_v34, %v2412_v29  ;;  %v1650_v53 = vrot.slane %v2922_v34, %v2662_v22 }
 0x545   : > { %v1417_v6 = vrot.slane %v1416_v19, 4 }
 0x546   : > { %v1423_v45 = vsel %vm159_vm0, %v1386_v38, 0.0 }
 0x547   : > { %v2930_v32 = vpop.permute.xlu1 %1337  ;;  %v1418_v48 = vadd.f32 %v1417_v6, %v1416_v19 }
 0x548   : > { %v1387_v55 = vmul.f32 %v2930_v32, %v2414_v30  ;;  %v1654_v63 = vrot.slane %v2930_v32, %v2655_v12 }
 0x549   : > { %v1419_v32 = vrot.slane %v1418_v48, 2 }
 0x54a   : > { %v1424_v27 = vsel %vm159_vm0, %v1387_v55, 0.0 }
 0x54b   : > { %v2942_v1 = vpop.permute.xlu1 %1347  ;;  %v1425_v62 = vadd.f32 %v1424_v27, %v1423_v45 }
 0x54c   : > { %v1389_v20 = vmul.f32 %v2942_v1, %v2424_v40  ;;  %v1663_v13 = vrot.slane %v2942_v1, %v2655_v12 }
 0x54d   : > { %v1426_v7 = vrot.slane %v1425_v62, 4 }
 0x54e   : > { %v1433_v33 = vsel %vm159_vm0, %v1389_v20, 0.0  ;;  %v1664_v37 = vsel %vm930_vm11, %v1663_v13, %v1659_v18 }
 0x54f   : > { %v1353_v52 = vpop.permute.xlu1 %1352  ;;  %v1434_v42 = vadd.f32 %v1433_v33, %v1432_v25  ;;  %v1427_v27 = vadd.f32 %v1426_v7, %v1425_v62  ;;  %v1411_v25 = vadd.f32 %v1410_v58, %v1409_v0  ;;  %v1655_v62 = vsel %vm930_vm11, %v1654_v63, %v1650_v53 }
 0x550   : > { %v1390_v46 = vmul.f32 %v1353_v52, %v2426_v41  ;;  %v1668_v1 = vrot.slane %v1353_v52, %v2662_v22 }
 0x551   : > { %v1435_v55 = vrot.slane %v1434_v42, 4  ;;  %v1412_v28 = vrot.slane %v1411_v25, 1 }
 0x552   : > { %v1441_v21 = vsel %vm159_vm0, %v1390_v46, 0.0 }
 0x553   : > { %v1358_v61 = vpop.permute.xlu1 %1357  ;;  %v1436_v19 = vadd.f32 %v1435_v55, %v1434_v42  ;;  %v1693_v42 = vsel %vm455_vm4, %v1646_v49, %v1692_v56 }
 0x554   : > { %v1391_v3 = vmul.f32 %v1358_v61, %v2434_v51  ;;  %v1672_v15 = vrot.slane %v1358_v61, %v2655_v12  ;;  %v1428_v61 = vrot.slane %v1427_v27, 2  ;;  %v1694_v52 = vsel %vm457_vm5, %v1655_v62, %v1693_v42 }
 0x555   : > { %v1437_v11 = vrot.slane %v1436_v19, 2  ;;  %v1695_v18 = vsel %vm459_vm6, %v1664_v37, %v1694_v52 }
 0x556   : > { %v1442_v35 = vsel %vm159_vm0, %v1391_v3, 0.0  ;;  %v1673_v59 = vsel %vm930_vm11, %v1672_v15, %v1668_v1 }
 0x557   : > { %v1443_v38 = vadd.f32 %v1442_v35, %v1441_v21  ;;  %v1363_v20 = vpop.permute.xlu1 %1362  ;;  %v1420_v35 = vadd.f32 %v1419_v32, %v1418_v48  ;;  %v1438_v44 = vadd.f32 %v1437_v11, %v1436_v19  ;;  %v1413_v32 = vadd.f32 %v1412_v28, %v1411_v25  ;;  %v1783_v28 = vld [vmem:[#allocation10] ss:$0 sm:$0xff] }
 0x558   : > { %v1392_v45 = vmul.f32 %v1363_v20, %v2381_v10  ;;  %v1677_v0 = vrot.slane %v1363_v20, %v2662_v22  ;;  %v1696_v20 = vsel %vm461_vm7, %v1673_v59, %v1695_v18 }
 0x559   : > { %v1444_v33 = vrot.slane %v1443_v38, 4 }
 0x55a   : > { %v1450_v3 = vsel %vm159_vm0, %v1392_v45, 0.0  ;;  %v1421_v45 = vrot.slane %v1420_v35, 1 }
 0x55b   : > { %v1445_v46 = vadd.f32 %v1444_v33, %v1443_v38  ;;  %v1368_v47 = vpop.permute.xlu1 %1367  ;;  %v1429_v38 = vadd.f32 %v1428_v61, %v1427_v27 }
 0x55c   : > { %v1393_v6 = vmul.f32 %v1368_v47, %v2389_v14  ;;  %v1681_v34 = vrot.slane %v1368_v47, %v2655_v12  ;;  %v1439_v47 = vrot.slane %v1438_v44, 1  ;;  %v1422_v1 = vadd.f32 %v1421_v45, %v1420_v35 }
 0x55d   : > { %v1446_v7 = vrot.slane %v1445_v46, 2  ;;  %v1430_v27 = vrot.slane %v1429_v38, 1 }
 0x55e   : > { %v1451_v26 = vsel %vm159_vm0, %v1393_v6, 0.0  ;;  %v1682_v55 = vsel %vm930_vm11, %v1681_v34, %v1677_v0  ;;  %v1440_v25 = vadd.f32 %v1439_v47, %v1438_v44 }
 0x55f   : > { %v1452_v2 = vadd.f32 %v1451_v26, %v1450_v3  ;;  %v1378_v21 = vpop.permute.xlu1 %1377  ;;  %v1697_v63 = vsel %vm463_vm8, %v1682_v55, %v1696_v20  ;;  %v1447_v48 = vadd.f32 %v1446_v7, %v1445_v46  ;;  %v1431_v42 = vadd.f32 %v1430_v27, %v1429_v38 }
 0x560   : > { %v1395_v22 = vmul.f32 %v1378_v21, %v2408_v24  ;;  %v1690_v58 = vrot.slane %v1378_v21, %v2655_v12  ;;  %v1403_v12 = vrot.slane %v2981_v36, 1  ;;  %v1470_v21 = vld [vmem:[%s1469_s28] sm:$0xff] }
 0x561   : > { %v1453_v43 = vrot.slane %v1452_v2, 4  ;;  %v1448_v62 = vrot.slane %v1447_v48, 1 }
 0x562   : > { %v1460_v49 = vsel %vm159_vm0, %v1395_v22, 0.0  ;;  %v1691_v13 = vsel %vm930_vm11, %v1690_v58, %v1686_v57  ;;  %v1495_v57 = vld [vmem:[%s3065_s6] sm:$0xff]  ;;  %v1404_v6 = vadd.f32 %v1403_v12, %v2981_v36 }
 0x563   : > { %v1454_v33 = vadd.f32 %v1453_v43, %v1452_v2  ;;  %v1461_v53 = vadd.f32 %v1460_v49, %v1459_v31  ;;  %v1698_v15 = vsel %vm465_vm9, %v1691_v13, %v1697_v63  ;;  %1916 = vmatpush3.msra.mxu1 %v1495_v57  ;;  %v1449_v37 = vadd.f32 %v1448_v62, %v1447_v48  ;;  %v1490_v35 = vpop.permute.xlu1 %1489 }
 0x564   : > { %1701 = vst.msk [vmem:[%s1700_s3] sm:$0xff] %vm623_vm1, %v1698_v15  ;;  %v1479_v11 = vsel %vm453_vm3, %v1413_v32, %v1404_v6 }
 0x565   : > { %v1455_v56 = vrot.slane %v1454_v33, 2  ;;  %v1462_v19 = vrot.slane %v1461_v53, 4  ;;  %v1480_v3 = vsel %vm455_vm4, %v1422_v1, %v1479_v11 }
 0x566   : > { %v1481_v52 = vsel %vm457_vm5, %v1431_v42, %v1480_v3 }
 0x567   : > { %v1463_v46 = vadd.f32 %v1462_v19, %v1461_v53  ;;  %v1456_v31 = vadd.f32 %v1455_v56, %v1454_v33  ;;  %v1482_v36 = vsel %vm459_vm6, %v1440_v25, %v1481_v52  ;;  %v1595_v15 = vpop.permute.xlu1 %1594 }
 0x568   : > { %v1483_v2 = vsel %vm461_vm7, %v1449_v37, %v1482_v36 }
 0x569   : > { %v1464_v34 = vrot.slane %v1463_v46, 2  ;;  %v1457_v61 = vrot.slane %v1456_v31, 1 }
 0x56b   : > { %v1465_v0 = vadd.f32 %v1464_v34, %v1463_v46  ;;  %v1458_v59 = vadd.f32 %v1457_v61, %v1456_v31 }
 0x56d   : > { %v1466_v26 = vrot.slane %v1465_v0, 1  ;;  %v1484_v55 = vsel %vm463_vm8, %v1458_v59, %v1483_v2 }
 0x56f   : > { %v1467_v7 = vadd.f32 %v1466_v26, %v1465_v0 }
 0x571   : > { %v1485_v60 = vsel %vm465_vm9, %v1467_v7, %v1484_v55 }
 0x572   : > { %1486 = vrot.lane.b32.xlu0 %v1485_v60, %s2251_s9 }
 0x5e4   : > { %v1487_v18 = vpop.permute.xlu0 %1486 }
 0x5e5   : > { %v1492_v22 = vsel %vm623_vm1, %v1470_v21, %v1487_v18 }
 0x5e6   : > { %v1494_v58 = vsel %vm1493_vm12, %v1492_v22, %v1490_v35 }
 0x5e7   : > { %1918 = vmatmul.mubr.msk.f32.vlgmr.msra.gmra.mxu1 %vm1512_vm13, %v1494_v58 }
 0x6a7   : > { %v1582_v38 = vpop.f32.mrf.mxu1 }
 0x6a8   : > { %v1583_v20 = vadd.f32 %v1783_v28, %v1582_v38 }
 0x6a9   : > { %v1919_v43 = vpop.f32.mrf.mxu1 }
 0x6aa   : > { %2010 = vtanh.f32 %v1583_v20  ;;  %v1785_v63 = vmul.f32 -1.442695, %v1583_v20 }
 0x6ac   : > { %2012 = vpow2.f32 %v1785_v63 }
 0x6b7   : > { %v2011_v44 = vpop.eup %2010 }
 0x6b8   : > { %1599 = vrot.lane.b32.xlu0 %v2011_v44, %s2252_s29 }
 0x6b9   : > { %v2013_v49 = vpop.eup %2012 }
 0x6ba   : > { %v1589_v13 = vadd.f32 1.0, %v2013_v49 }
 0x6bc   : > { %2014 = vrcp.f32 %v1589_v13 }
 0x6c9   : > { %v2015_v48 = vpop.eup %2014 }
 0x6ca   : > { %v1597_v45 = vmul.f32 %v2015_v48, %v1595_v15 }
 0x72a   : > { %v1600_v33 = vpop.permute.xlu0 %1599 }
 0x72b   : > { %v1602_v53 = vmul.f32 %v2015_v48, %v1600_v33 }
 0x72d   : > { %1604 = vrot.lane.b32.xlu0 %v1602_v53, %s2250_s27 }
 0x79f   : > { %v1605_v12 = vpop.permute.xlu0 %1604 }
 0x7a0   : > { %v1607_v27 = vadd.f32 %v1605_v12, %v1597_v45 }
 0x7a2   : > { %2016 = vtanh.f32 %v1607_v27 }
 0x7af   : > { %v2017_v56 = vpop.eup %2016 }
 0x7b0   : > { %1610 = vrot.lane.b32.xlu1 %v2017_v56, %s2252_s29 }
 0x7b4   : > { %1703 = vrot.lane.b32.xlu1 %v1607_v27, %s2253_s15 }
 0x822   : > { %v1611_v19 = vpop.permute.xlu1 %1610 }
 0x823   : > { %v1613_v32 = vmul.f32 %v2015_v48, %v1611_v19 }
 0x825   : > { %1615 = vrot.lane.b32.xlu0 %v1613_v32, %s2250_s27 }
 0x826   : > { %v1704_v60 = vpop.permute.xlu1 %1703  }
 0x894   :  { %629 = sbr.rel (!%p627_p7) target bundleno = 325 (0x145), region = 116 }
 0x897   : > { %v1616_v56 = vpop.permute.xlu0 %1615  }
 0x898   : > { %1619 = vst.msk [vmem:[%s1618_s16] sm:$0xff] %vm159_vm0, %v1616_v56 }
 0x899   :  { %2169 = shalt.err (!%p2166_p12)
}
 0x89a   :  { %1717 = dma.vmem_to_hbm [thread:$0]  %s1712_s2, 1024, %s3071_s12, [#allocation4], %s2236_s30, %s2236_s30, %s2237_s14  }
 0x89b   :  { %s2178_s4 = scalar_lea.vmem %s1724_s18, 1024  ;;  %p2183_p0 = scmp.lt.s32.totalorder %s1724_s18, %s1724_s18 }
 0x89c   :  { %p2179_p13 = scmp.ne.s32.totalorder %s1724_s18, %s2178_s4  ;;  %p2184_p1 = scmp.lt.s32.totalorder %s2178_s4, %s2178_s4 }
 0x89e   :  { %p2185_p2 = por %p2184_p1, %p2183_p0 }
 0x8a0   :  { %p2186_p3 = pnand %p2185_p2, %p2179_p13 }
 0x8a2   :  { %2189 = shalt.err (!%p2186_p3)
}
 0x8a3   :  { %1729 = dma.vmem_to_hbm [thread:$0]  %s1724_s18, 1024, %s3072_s13, [#allocation16], %s2236_s30, %s2236_s30, %s2237_s14  }
 0x8a4   :  { %2218 = dma.done.wait [#allocation4], 1024  }
 0x8a5   :  { %2219 = vsyncadd [#allocation4], 4294966272 }
 0x8a6   :  { %2220 = dma.done.wait [#allocation16], 1024  }
 0x8a7   :  { %2221 = vsyncadd [#allocation16], 4294966272 }
 0x8a8   :  { %1736 = vsyncpa [#allocation3], 1 }
 0x8a9   :  { %1737 = vsyncpa [#allocation6], 1 }
 0x8aa   :  { %1738 = vsyncpa [#allocation9], 1 }
 0x8ab   :  { %1739 = vsyncpa [#allocation12], 1 }
 0x8ac   :  { %1740 = vsyncpa [#allocation4], 1 }
 0x8ad   :  { %1741 = vsyncpa [#allocation16], 1 }

// kernel: tpu_custom_call.1
= control target key start
LH: loop header
LB: loop body
LE: loop exit
PB: predicated region body
PF: predicated region fallthrough
CT: control target
= control target key end

     0   :  { %19 = vsyncpa [#allocation3], 0  ;;  %s3207_s0 = inlined_call_operand.hbm [shape: f32[8,8,16], index: 0, kind: input, shape index: {}]   ;;  %s3208_s1 = inlined_call_operand.hbm [shape: f32[8,16,32], index: 1, kind: input, shape index: {}]   ;;  %s3209_s2 = inlined_call_operand.vmem [shape: f32[32,16], index: 2, kind: input, shape index: {}]   ;;  %s3210_s3 = inlined_call_operand.hbm [shape: f32[1,16], index: 3, kind: input, shape index: {}]   ;;  %s3211_s4 = inlined_call_operand.vmem [shape: f32[32,16], index: 4, kind: input, shape index: {}]   ;;  %s3212_s5 = inlined_call_operand.hbm [shape: f32[1,16], index: 5, kind: input, shape index: {}]   ;;  %s3213_s6 = inlined_call_operand.vmem [shape: f32[80,128], index: 6, kind: input, shape index: {}]   ;;  %s3214_s7 = inlined_call_operand.hbm [shape: f32[1,128], index: 7, kind: input, shape index: {}]   ;;  %s3215_s8 = inlined_call_operand.hbm [shape: f32[32,32], index: 8, kind: input, shape index: {}]   ;;  %s3216_s9 = inlined_call_operand.hbm [shape: f32[1,32], index: 9, kind: input, shape index: {}]   ;;  %s3217_s10 = inlined_call_operand.vmem [shape: f32[32,32], index: 10, kind: input, shape index: {}]   ;;  %s3218_s11 = inlined_call_operand.vmem [shape: f32[1,32], index: 11, kind: input, shape index: {}]   ;;  %s3219_s12 = inlined_call_operand.hbm [shape: f32[8,8,32], index: 12, kind: output, shape index: {0}]   ;;  %s3220_s13 = inlined_call_operand.hbm [shape: f32[8,8,16], index: 13, kind: output, shape index: {1}]  }
   0x1   :  { %20 = vsyncpa [#allocation6], 0 }
   0x2   :  { %21 = vsyncpa [#allocation9], 0 }
   0x3   :  { %22 = vsyncpa [#allocation12], 0 }
   0x4   :  { %23 = vsyncpa [#allocation4], 0 }
   0x5   :  { %24 = vsyncpa [#allocation16], 0  ;;  %s2376_s25 = smov [#allocation5]   ;;  %s2377_s27 = smov [#allocation8]  }
   0x6   :  { %s42_s26 = sshll.u32 %s2376_s25, 4  ;;  %s69_s28 = sshll.u32 %s2377_s27, 4  ;;  %s43_s26 = int_to_ptr.vmem [resolvable:$true] %s42_s26  ;;  %s70_s28 = int_to_ptr.vmem [resolvable:$true] %s69_s28 }
   0x7   :  { %s2168_s29 = scalar_lea.vmem %s43_s26, 2048  ;;  %p2173_p1 = scmp.lt.s32.totalorder %s43_s26, %s43_s26 }
   0x8   :  { %p2169_p0 = scmp.ne.s32.totalorder %s43_s26, %s2168_s29  ;;  %p2174_p2 = scmp.lt.s32.totalorder %s2168_s29, %s2168_s29 }
   0xa   :  { %p2175_p3 = por %p2174_p2, %p2173_p1 }
   0xc   :  { %p2176_p4 = pnand %p2175_p3, %p2169_p0 }
   0xe   :  { %2179 = shalt.err (!%p2176_p4)
}
   0xf   :  { %s2378_s30 = smov 128   ;;  %s2379_s14 = smov 8  }
  0x10   :  { %48 = dma.hbm_to_vmem [thread:$0]  %s3208_s1, 2048, %s43_s26, [#allocation6], %s2378_s30, %s2378_s30, %s2379_s14  }
  0x11   :  { %s2188_s17 = scalar_lea.vmem %s70_s28, 16  ;;  %s2192_s18 = scalar_lea.vmem %s70_s28, 32 }
  0x12   :  { %p2189_p5 = scmp.ne.s32.totalorder %s70_s28, %s2188_s17  ;;  %p2193_p6 = scmp.lt.s32.totalorder %s70_s28, %s70_s28 }
  0x13   :  { %p2194_p7 = scmp.lt.s32.totalorder %s2192_s18, %s2188_s17 }
  0x15   :  { %p2195_p8 = por %p2194_p7, %p2193_p6 }
  0x17   :  { %p2196_p9 = pnand %p2195_p8, %p2189_p5 }
  0x19   :  { %2199 = shalt.err (!%p2196_p9)
}
  0x1a   :  { %72 = dma.hbm_to_vmem [thread:$0]  %s3212_s5, 16, %s70_s28, [#allocation9]  }
  0x1b   :  { %s2380_s21 = smov [#allocation11]   ;;  %s2381_s23 = smov [#allocation2]  }
  0x1c   :  { %s90_s22 = sshll.u32 %s2380_s21, 4  ;;  %s30_s24 = sshll.u32 %s2381_s23, 4  ;;  %s91_s22 = int_to_ptr.vmem [resolvable:$true] %s90_s22  ;;  %s31_s24 = int_to_ptr.vmem [resolvable:$true] %s30_s24 }
  0x1d   :  { %s2208_s25 = scalar_lea.vmem %s91_s22, 512  ;;  %p2213_p11 = scmp.lt.s32.totalorder %s91_s22, %s91_s22 }
  0x1e   :  { %p2209_p10 = scmp.ne.s32.totalorder %s91_s22, %s2208_s25  ;;  %p2214_p12 = scmp.lt.s32.totalorder %s2208_s25, %s2208_s25 }
  0x20   :  { %p2215_p13 = por %p2214_p12, %p2213_p11 }
  0x22   :  { %p2216_p0 = pnand %p2215_p13, %p2209_p10 }
  0x24   :  { %2219 = shalt.err (!%p2216_p0)
}
  0x25   :  { %96 = dma.hbm_to_vmem [thread:$0]  %s3215_s8, 512, %s91_s22, [#allocation12], %s2378_s30, %s2378_s30, %s2379_s14  }
  0x26   :  { %s2228_s5 = scalar_lea.vmem %s31_s24, 1024  ;;  %p2233_p2 = scmp.lt.s32.totalorder %s31_s24, %s31_s24 }
  0x27   :  { %p2229_p1 = scmp.ne.s32.totalorder %s31_s24, %s2228_s5  ;;  %p2234_p3 = scmp.lt.s32.totalorder %s2228_s5, %s2228_s5 }
  0x29   :  { %p2235_p4 = por %p2234_p3, %p2233_p2 }
  0x2b   :  { %p2236_p5 = pnand %p2235_p4, %p2229_p1 }
  0x2d   :  { %2239 = shalt.err (!%p2236_p5)
}
  0x2e   :  { %36 = dma.hbm_to_vmem [thread:$0]  %s3207_s0, 1024, %s31_s24, [#allocation3], %s2378_s30, %s2378_s30, %s2379_s14  }
  0x2f   :  { %s2382_s29 = smov [#allocation7]   ;;  %s2383_s16 = smov [#allocation10]  }
  0x30   :  { %s57_s15 = sshll.u32 %s2382_s29, 4  ;;  %s81_s17 = sshll.u32 %s2383_s16, 4  ;;  %s58_s15 = int_to_ptr.vmem [resolvable:$true] %s57_s15  ;;  %s82_s17 = int_to_ptr.vmem [resolvable:$true] %s81_s17 }
  0x31   :  { %s2248_s8 = scalar_lea.vmem %s58_s15, 16  ;;  %s2252_s18 = scalar_lea.vmem %s58_s15, 32 }
  0x32   :  { %p2249_p6 = scmp.ne.s32.totalorder %s58_s15, %s2248_s8  ;;  %p2253_p7 = scmp.lt.s32.totalorder %s58_s15, %s58_s15 }
  0x33   :  { %p2254_p8 = scmp.lt.s32.totalorder %s2252_s18, %s2248_s8 }
  0x35   :  { %p2255_p9 = por %p2254_p8, %p2253_p7 }
  0x37   :  { %p2256_p10 = pnand %p2255_p9, %p2249_p6 }
  0x39   :  { %2259 = shalt.err (!%p2256_p10)
}
  0x3a   :  { %60 = dma.hbm_to_vmem [thread:$0]  %s3210_s3, 16, %s58_s15, [#allocation6]  }
  0x3b   :  { %s2268_s21 = scalar_lea.vmem %s82_s17, 16  ;;  %s2272_s0 = scalar_lea.vmem %s82_s17, 32 }
  0x3c   :  { %p2269_p11 = scmp.ne.s32.totalorder %s82_s17, %s2268_s21  ;;  %p2273_p12 = scmp.lt.s32.totalorder %s82_s17, %s82_s17 }
  0x3d   :  { %p2274_p13 = scmp.lt.s32.totalorder %s2272_s0, %s2268_s21 }
  0x3f   :  { %p2275_p0 = por %p2274_p13, %p2273_p12 }
  0x41   :  { %p2276_p1 = pnand %p2275_p0, %p2269_p11 }
  0x43   :  { %2279 = shalt.err (!%p2276_p1)
}
  0x44   :  { %84 = dma.hbm_to_vmem [thread:$0]  %s3214_s7, 16, %s82_s17, [#allocation9]  }
  0x45   :  { %s2384_s24 = smov [#allocation13]  }
  0x46   :  { %s103_s25 = sshll.u32 %s2384_s24, 4  ;;  %s104_s25 = int_to_ptr.vmem [resolvable:$true] %s103_s25 }
  0x47   :  { %s2288_s1 = scalar_lea.vmem %s104_s25, 16  ;;  %s2292_s26 = scalar_lea.vmem %s104_s25, 32 }
  0x48   :  { %p2289_p2 = scmp.ne.s32.totalorder %s104_s25, %s2288_s1  ;;  %p2293_p3 = scmp.lt.s32.totalorder %s104_s25, %s104_s25 }
  0x49   :  { %p2294_p4 = scmp.lt.s32.totalorder %s2292_s26, %s2288_s1 }
  0x4b   :  { %p2295_p5 = por %p2294_p4, %p2293_p3 }
  0x4d   :  { %p2296_p6 = pnand %p2295_p5, %p2289_p2 }
  0x4f   :  { %2299 = shalt.err (!%p2296_p6)
}
  0x50   :  { %106 = dma.hbm_to_vmem [thread:$0]  %s3216_s9, 16, %s104_s25, [#allocation12]  }
  0x51   :  { %2352 = dma.done.wait [#allocation3], 1024  }
  0x52   :  { %2353 = vsyncadd [#allocation3], 4294966272 }
  0x53   :  { %2354 = dma.done.wait [#allocation6], 2064  }
  0x54   :  { %2355 = vsyncadd [#allocation6], 4294965232 }
  0x55   :  { %2356 = dma.done.wait [#allocation9], 32  }
  0x56   :  { %2357 = vsyncadd [#allocation9], 4294967264 }
  0x57   :  { %2358 = dma.done.wait [#allocation12], 528  }
  0x58   :  { %2359 = vsyncadd [#allocation12], 4294966768  ;;  %vm159_vm0 = vcmask 261120   ;;  %vm623_vm1 = vcmask 130048   ;;  %v2385_v0 = vmov 0.0   ;;  %v151_v1 = vld [vmem:[%s3209_s2 + $0x18] sm:$0xff] }
  0x59   :  { %621 = vst.msk [vmem:[#allocation14 + $0x38] sm:$0xff] %vm159_vm0, %v2385_v0  ;;  %v150_v2 = vld [vmem:[%s3209_s2 + $0x10] sm:$0xff]  ;;  %1970 = vmatprep.subr.mxu0 %v151_v1  ;;  %v149_v3 = vld [vmem:[%s3209_s2 + $0x8] sm:$0xff]  ;;  %2064 = vmatprep.subr.mxu1 %v151_v1  ;;  %v2509_v4 = vld [vmem:[#allocation5] sm:$0xff]  ;;  %vm2386_vm2 = vmmov 0   ;;  %vm453_vm3 = vcmask 1041409  }
  0x5a   :  { %624 = vst.msk [vmem:[#allocation15 + $0x38] sm:$0xff] %vm623_vm1, %v2385_v0  ;;  %v2511_v5 = vld [vmem:[#allocation5 + $0x8] sm:$0xff]  ;;  %1971 = vmatpush3.msra.mxu0 %v151_v1  ;;  %2068 = vmatpush3.msra.mxu1 %v151_v1  ;;  %v353_v6 = vsel %vm159_vm0, %v2509_v4, 0.0  ;;  %v2517_v8 = vld [vmem:[#allocation5 + $0x10] sm:$0xff]  ;;  %v2519_v9 = vld [vmem:[#allocation5 + $0x18] sm:$0xff]  ;;  %vm455_vm4 = vcmask 1042434  }
  0x5b   :  { %v354_v7 = vsel %vm159_vm0, %v2511_v5, 0.0  ;;  %v2521_v10 = vld [vmem:[#allocation5 + $0x60] sm:$0xff]  ;;  %1972 = vmatprep.subr.mxu0 %v150_v2  ;;  %1978 = vmatprep.mubr.msk.f32.mxu0 %vm159_vm0, %v2509_v4  ;;  %v362_v12 = vsel %vm159_vm0, %v2517_v8, 0.0  ;;  %v363_v13 = vsel %vm159_vm0, %v2519_v9, 0.0  ;;  %v2529_v14 = vld [vmem:[#allocation5 + $0x68] sm:$0xff]  ;;  %v2546_v23 = vld [vmem:[#allocation5 + $0x70] sm:$0xff] }
  0x5c   :  { %v355_v11 = vadd.f32 %v354_v7, %v353_v6  ;;  %v407_v15 = vsel %vm159_vm0, %v2521_v10, 0.0  ;;  %v2533_v16 = vld [vmem:[#allocation5 + $0x20] sm:$0xff]  ;;  %v2535_v17 = vld [vmem:[#allocation5 + $0x28] sm:$0xff]  ;;  %1973 = vmatpush3.msra.mxu0 %v150_v2  ;;  %2065 = vmatprep.subr.mxu1 %v150_v2  ;;  %v364_v19 = vadd.f32 %v363_v13, %v362_v12  ;;  %v408_v20 = vsel %vm159_vm0, %v2529_v14, 0.0  ;;  %v2548_v24 = vld [vmem:[#allocation5 + $0x78] sm:$0xff]  ;;  %s2680_s24 = smov 0  }
  0x5d   :  { %v148_v18 = vld [vmem:[%s3209_s2] sm:$0xff]  ;;  %v371_v21 = vsel %vm159_vm0, %v2533_v16, 0.0  ;;  %v372_v22 = vsel %vm159_vm0, %v2535_v17, 0.0  ;;  %1974 = vmatprep.subr.mxu0 %v149_v3  ;;  %2069 = vmatpush3.msra.mxu1 %v150_v2  ;;  %v409_v26 = vadd.f32 %v408_v20, %v407_v15  ;;  %v416_v28 = vsel %vm159_vm0, %v2546_v23, 0.0  ;;  %v2552_v29 = vld [vmem:[#allocation5 + $0x30] sm:$0xff]  ;;  %v2554_v30 = vld [vmem:[#allocation5 + $0x38] sm:$0xff] }
  0x5e   :  { %v356_v25 = vrot.slane %v355_v11, 4  ;;  %v373_v27 = vadd.f32 %v372_v22, %v371_v21  ;;  %1975 = vmatpush3.msra.mxu0 %v149_v3  ;;  %2066 = vmatprep.subr.mxu1 %v149_v3  ;;  %v365_v31 = vrot.slane %v364_v19, 4  ;;  %v417_v32 = vsel %vm159_vm0, %v2548_v24, 0.0  ;;  %v2562_v39 = vld [vmem:[#allocation5 + $0x40] sm:$0xff]  ;;  %v2564_v40 = vld [vmem:[#allocation5 + $0x48] sm:$0xff]  ;;  %v2566_v41 = vld [vmem:[#allocation5 + $0x50] sm:$0xff] }
  0x5f   :  { %v380_v33 = vsel %vm159_vm0, %v2552_v29, 0.0  ;;  %v381_v34 = vsel %vm159_vm0, %v2554_v30, 0.0  ;;  %1976 = vmatprep.subr.mxu0 %v148_v18  ;;  %2070 = vmatpush3.msra.mxu1 %v149_v3  ;;  %v410_v36 = vrot.slane %v409_v26, 4  ;;  %v418_v38 = vadd.f32 %v417_v32, %v416_v28  ;;  %v437_v49 = vld [vmem:[#allocation11 + $0x18] sm:$0xff]  ;;  %v436_v60 = vld [vmem:[#allocation11 + $0x10] sm:$0xff]  ;;  %v435_v7 = vld [vmem:[#allocation11 + $0x8] sm:$0xff] }
  0x60   :  { %v357_v35 = vadd.f32 %v356_v25, %v355_v11  ;;  %v374_v37 = vrot.slane %v373_v27, 4  ;;  %1977 = vmatpush3.msra.mxu0 %v148_v18  ;;  %2067 = vmatprep.subr.mxu1 %v148_v18  ;;  %v366_v42 = vadd.f32 %v365_v31, %v364_v19  ;;  %v382_v43 = vadd.f32 %v381_v34, %v380_v33  ;;  %v2574_v51 = vld [vmem:[#allocation5 + $0x58] sm:$0xff]  ;;  %v434_v22 = vld [vmem:[#allocation11] sm:$0xff] }
  0x61   :  { %v389_v44 = vsel %vm159_vm0, %v2562_v39, 0.0  ;;  %v390_v45 = vsel %vm159_vm0, %v2564_v40, 0.0  ;;  %1979 = vmatmul.mubr.msk.f32.vlgmr.msra.gmra.mxu0 %vm159_vm0, %v2511_v5  ;;  %2071 = vmatpush3.msra.mxu1 %v148_v18  ;;  %v411_v47 = vadd.f32 %v410_v36, %v409_v26  ;;  %v419_v50 = vrot.slane %v418_v38, 4 }
  0x62   :  { %v358_v46 = vrot.slane %v357_v35, 2  ;;  %v375_v48 = vadd.f32 %v374_v37, %v373_v27  ;;  %1981 = vmatprep.mubr.msk.f32.mxu0 %vm159_vm0, %v2517_v8  ;;  %v367_v52 = vrot.slane %v366_v42, 2  ;;  %1996 = vmatprep.mubr.msk.f32.mxu1 %vm159_vm0, %v2521_v10  ;;  %v383_v53 = vrot.slane %v382_v43, 4 }
  0x63   :  { %v391_v54 = vadd.f32 %v390_v45, %v389_v44  ;;  %v398_v55 = vsel %vm159_vm0, %v2566_v41, 0.0  ;;  %v412_v57 = vrot.slane %v411_v47, 2  ;;  %1997 = vmatmul.mubr.msk.f32.vlgmr.msra.gmra.mxu1 %vm159_vm0, %v2529_v14  ;;  %2002 = vmatprep.subr.mxu1 %v2385_v0  ;;  %v420_v59 = vadd.f32 %v419_v50, %v418_v38 }
  0x64   :  { %v359_v56 = vadd.f32 %v358_v46, %v357_v35  ;;  %v376_v58 = vrot.slane %v375_v48, 2  ;;  %v368_v61 = vadd.f32 %v367_v52, %v366_v42  ;;  %2003 = vmatpush3.msra.mxu1 %v437_v49  ;;  %1999 = vmatprep.mubr.msk.f32.mxu1 %vm159_vm0, %v2546_v23  ;;  %v384_v62 = vadd.f32 %v383_v53, %v382_v43 }
  0x65   :  { %v392_v63 = vrot.slane %v391_v54, 4  ;;  %v399_v1 = vsel %vm159_vm0, %v2574_v51, 0.0  ;;  %1982 = vmatmul.mubr.msk.f32.gmra.mxu0 %vm159_vm0, %v2519_v9  ;;  %2004 = vmatprep.subr.mxu1 %v2385_v0  ;;  %v421_v6 = vrot.slane %v420_v59, 2  ;;  %v413_v19 = vadd.f32 %v412_v57, %v411_v47 }
  0x66   :  { %v360_v2 = vrot.slane %v359_v56, 1  ;;  %v377_v3 = vadd.f32 %v376_v58, %v375_v48  ;;  %v369_v11 = vrot.slane %v368_v61, 1  ;;  %1984 = vmatprep.mubr.msk.f32.mxu0 %vm159_vm0, %v2533_v16  ;;  %2005 = vmatpush3.msra.mxu1 %v436_v60  ;;  %v385_v12 = vrot.slane %v384_v62, 2 }
  0x67   :  { %v393_v13 = vadd.f32 %v392_v63, %v391_v54  ;;  %v400_v15 = vadd.f32 %v399_v1, %v398_v55  ;;  %2000 = vmatmul.mubr.msk.f32.gmra.mxu1 %vm159_vm0, %v2548_v24  ;;  %v422_v21 = vadd.f32 %v421_v6, %v420_v59  ;;  %2006 = vmatprep.subr.mxu1 %v2385_v0  ;;  %v414_v37 = vrot.slane %v413_v19, 1  ;;  %v542_v1 = vld [vmem:[%s3217_s10 + $0x18] sm:$0xff]  ;;  %v540_v6 = vld [vmem:[%s3217_s10 + $0x8] sm:$0xff] }
  0x68   :  { %v361_v18 = vadd.f32 %v360_v2, %v359_v56  ;;  %v378_v20 = vrot.slane %v377_v3, 1  ;;  %v370_v25 = vadd.f32 %v369_v11, %v368_v61  ;;  %v386_v26 = vadd.f32 %v385_v12, %v384_v62  ;;  %2007 = vmatpush3.msra.mxu1 %v435_v7  ;;  %2010 = vmatprep.mubr.msk.f32.mxu1 %vm2386_vm2, %v2385_v0  ;;  %v539_v7 = vld [vmem:[%s3217_s10] sm:$0xff] }
  0x69   :  { %v394_v27 = vrot.slane %v393_v13, 2  ;;  %v401_v28 = vrot.slane %v400_v15, 4  ;;  %1985 = vmatmul.mubr.msk.f32.gmra.mxu0 %vm159_vm0, %v2535_v17  ;;  %2008 = vmatprep.subr.mxu1 %v2385_v0  ;;  %v423_v42 = vrot.slane %v422_v21, 1  ;;  %vm457_vm5 = vcmask 1043459   ;;  %v1893_v11 = vld [vmem:[#allocation7] ss:$0 sm:$0xff] }
  0x6a   :  { %v426_v31 = vmul.f32 0.0625, %v361_v18  ;;  %v379_v32 = vadd.f32 %v378_v20, %v377_v3  ;;  %v427_v33 = vmul.f32 0.0625, %v370_v25  ;;  %1987 = vmatprep.mubr.msk.f32.mxu0 %vm159_vm0, %v2552_v29  ;;  %v387_v34 = vrot.slane %v386_v26, 1  ;;  %2009 = vmatpush3.msra.mxu1 %v434_v22  ;;  %v541_v3 = vld [vmem:[%s3217_s10 + $0x10] sm:$0xff] }
  0x6b   :  { %v395_v35 = vadd.f32 %v394_v27, %v393_v13  ;;  %v402_v36 = vadd.f32 %v401_v28, %v400_v15  ;;  %2013 = vmatprep.subr.mxu1 %v2385_v0  ;;  %v415_v52 = vadd.f32 %v414_v37, %v413_v19  ;;  %vm459_vm6 = vcmask 1044484  }
  0x6c   :  { %v428_v38 = vmul.f32 0.0625, %v379_v32  ;;  %v454_v43 = vsel %vm453_vm3, %v427_v33, %v426_v31  ;;  %v388_v44 = vadd.f32 %v387_v34, %v386_v26  ;;  %v424_v53 = vadd.f32 %v423_v42, %v422_v21 }
  0x6d   :  { %v396_v45 = vrot.slane %v395_v35, 1  ;;  %v403_v46 = vrot.slane %v402_v36, 2  ;;  %1988 = vmatmul.mubr.msk.f32.gmra.mxu0 %vm159_vm0, %v2554_v30  ;;  %v432_v58 = vmul.f32 0.0625, %v415_v52  ;;  %vm461_vm7 = vcmask 1045509   ;;  %v1910_v52 = vld [vmem:[#allocation13] ss:$0 sm:$0xff] }
  0x6e   :  { %v456_v47 = vsel %vm455_vm4, %v428_v38, %v454_v43  ;;  %v429_v48 = vmul.f32 0.0625, %v388_v44  ;;  %1990 = vmatprep.mubr.msk.f32.mxu0 %vm159_vm0, %v2562_v39  ;;  %v433_v60 = vmul.f32 0.0625, %v424_v53  ;;  %vm463_vm8 = vcmask 1046534  }
  0x6f   :  { %v397_v49 = vadd.f32 %v396_v45, %v395_v35  ;;  %v404_v50 = vadd.f32 %v403_v46, %v402_v36  ;;  %vm465_vm9 = vcmask 1047559  }
  0x70   :  { %v458_v54 = vsel %vm457_vm5, %v429_v48, %v456_v47 }
  0x71   :  { %v430_v55 = vmul.f32 0.0625, %v397_v49  ;;  %v405_v56 = vrot.slane %v404_v50, 1  ;;  %1991 = vmatmul.mubr.msk.f32.gmra.mxu0 %vm159_vm0, %v2564_v40 }
  0x72   :  { %1993 = vmatprep.mubr.msk.f32.mxu0 %vm159_vm0, %v2566_v41 }
  0x73   :  { %v406_v57 = vadd.f32 %v405_v56, %v404_v50  ;;  %v460_v59 = vsel %vm459_vm6, %v430_v55, %v458_v54 }
  0x75   :  { %v431_v61 = vmul.f32 0.0625, %v406_v57  ;;  %1994 = vmatmul.mubr.msk.f32.gmra.mxu0 %vm159_vm0, %v2574_v51 }
  0x77   :  { %v462_v62 = vsel %vm461_vm7, %v431_v61, %v460_v59 }
  0x78   :  { %v464_v63 = vsel %vm463_vm8, %v432_v58, %v462_v62  ;;  %v1912_v58 = vld [vmem:[%s3218_s11] ss:$0 sm:$0xff] }
  0x79   :  { %v466_v2 = vsel %vm465_vm9, %v433_v60, %v464_v63 }
  0x7a   :  { %2011 = vmatmul.mubr.msk.f32.vlgmr.msra.gmra.mxu1 %vm159_vm0, %v466_v2 }
  0x7b   :  { %2014 = vmatpush3.msra.mxu1 %v542_v1  ;;  %2021 = vmatprep.mubr.msk.f32.mxu1 %vm2386_vm2, %v2385_v0 }
  0x7c   :  { %2015 = vmatprep.subr.mxu1 %v2385_v0 }
  0x7d   :  { %2016 = vmatpush3.msra.mxu1 %v541_v3 }
  0x7e   :  { %2017 = vmatprep.subr.mxu1 %v2385_v0 }
  0x7f   :  { %2018 = vmatpush3.msra.mxu1 %v540_v6 }
  0x80   :  { %2019 = vmatprep.subr.mxu1 %v2385_v0 }
  0x81   :  { %2020 = vmatpush3.msra.mxu1 %v539_v7 }
  0x82   :  { %2022 = vmatmul.mubr.msk.f32.vlgmr.msra.gmra.mxu1 %vm159_vm0, %v466_v2 }
 0x121   :  { %v1980_v12 = vpop.f32.mrf.mxu0 }
 0x122   :  { %v2641_v13 = vadd.f32 %v1980_v12, %v1893_v11 }
 0x123   :  { %v274_v15 = vpop.f32.mrf.mxu0  ;;  %v1998_v18 = vpop.f32.mrf.mxu1 }
 0x124   :  { %3230 = vst [vmem:[#allocation23_spill] sm:$0xff] %v2641_v13  ;;  %v2643_v19 = vadd.f32 %v1893_v11, %v274_v15  ;;  %v2645_v20 = vadd.f32 %v1998_v18, %v1893_v11 }
 0x125   :  { %v1983_v21 = vpop.f32.mrf.mxu0  ;;  %v334_v22 = vpop.f32.mrf.mxu1 }
 0x126   :  { %3231 = vst [vmem:[#allocation24_spill] sm:$0xff] %v2643_v19  ;;  %3232 = vst [vmem:[#allocation25_spill] sm:$0xff] %v2645_v20  ;;  %v2647_v25 = vadd.f32 %v1983_v21, %v1893_v11  ;;  %v2649_v26 = vadd.f32 %v1893_v11, %v334_v22 }
 0x127   :  { %v284_v0 = vpop.f32.mrf.mxu0  ;;  %v2001_v27 = vpop.f32.mrf.mxu1 }
 0x128   :  { %3233 = vst [vmem:[#allocation26_spill] sm:$0xff] %v2647_v25  ;;  %3234 = vst [vmem:[#allocation27_spill] sm:$0xff] %v2649_v26  ;;  %v2651_v28 = vadd.f32 %v1893_v11, %v284_v0  ;;  %v2653_v31 = vadd.f32 %v2001_v27, %v1893_v11 }
 0x129   :  { %v1986_v32 = vpop.f32.mrf.mxu0  ;;  %v344_v33 = vpop.f32.mrf.mxu1 }
 0x12a   :  { %3235 = vst [vmem:[#allocation28_spill] sm:$0xff] %v2651_v28  ;;  %3236 = vst [vmem:[#allocation29_spill] sm:$0xff] %v2653_v31  ;;  %v2655_v34 = vadd.f32 %v1986_v32, %v1893_v11  ;;  %v2657_v35 = vadd.f32 %v1893_v11, %v344_v33 }
 0x12b   :  { %v294_v36 = vpop.f32.mrf.mxu0 }
 0x12c   :  { %3237 = vst [vmem:[#allocation30_spill] sm:$0xff] %v2655_v34  ;;  %3238 = vst [vmem:[#allocation31_spill] sm:$0xff] %v2657_v35  ;;  %v2659_v37 = vadd.f32 %v1893_v11, %v294_v36 }
 0x12d   :  { %v1989_v38 = vpop.f32.mrf.mxu0 }
 0x12e   :  { %3239 = vst [vmem:[#allocation32_spill] sm:$0xff] %v2659_v37  ;;  %v2661_v42 = vadd.f32 %v1989_v38, %v1893_v11 }
 0x12f   :  { %v304_v43 = vpop.f32.mrf.mxu0 }
 0x130   :  { %3240 = vst [vmem:[#allocation33_spill] sm:$0xff] %v2661_v42  ;;  %v2663_v44 = vadd.f32 %v1893_v11, %v304_v43 }
 0x131   :  { %v1992_v45 = vpop.f32.mrf.mxu0 }
 0x132   :  { %3241 = vst [vmem:[#allocation34_spill] sm:$0xff] %v2663_v44  ;;  %v2665_v46 = vadd.f32 %v1992_v45, %v1893_v11 }
 0x133   :  { %v314_v47 = vpop.f32.mrf.mxu0 }
 0x134   :  { %3242 = vst [vmem:[#allocation35_spill] sm:$0xff] %v2665_v46  ;;  %v2667_v48 = vadd.f32 %v1893_v11, %v314_v47 }
 0x135   :  { %v1995_v49 = vpop.f32.mrf.mxu0 }
 0x136   :  { %3243 = vst [vmem:[#allocation36_spill] sm:$0xff] %v2667_v48  ;;  %v2669_v50 = vadd.f32 %v1995_v49, %v1893_v11 }
 0x137   :  { %v324_v53 = vpop.f32.mrf.mxu0 }
 0x138   :  { %v2671_v54 = vadd.f32 %v1893_v11, %v324_v53 }
 0x13a   :  { %v535_v55 = vpop.f32.mrf.mxu1 }
 0x13b   :  { %v536_v56 = vadd.f32 %v1910_v52, %v535_v55  }
 0x13c   :  { %v2012_v57 = vpop.f32.mrf.mxu1 }
 0x142   :  { %v616_v59 = vpop.f32.mrf.mxu1 }
 0x143   :  { %v617_v60 = vadd.f32 %v1912_v58, %v616_v59  }
 0x144   :  { %v2023_v61 = vpop.f32.mrf.mxu1 }
 0x145 LB: > { %v636_v62 = vld [vmem:[%s3211_s4 + $0x18] sm:$0xff]  ;;  %v3221_v63 = vmov 0.0   ;;  %v635_v1 = vld [vmem:[%s3211_s4 + $0x10] sm:$0xff]  ;;  %vm2388_vm10 = vmmov 0   ;;  %v634_v2 = vld [vmem:[%s3211_s4 + $0x8] sm:$0xff]  ;;  %v715_v11 = vlaneseq  ;;  %vm930_vm11 = vcmask 130112   ;;  %s2374_s24 = sphi %s2680_s24, %s630_s24   ;;  %v2370_v56 = vphi %v536_v56, %v1750_v56   ;;  %v2366_v60 = vphi %v617_v60, %v1838_v60  }
 0x146   : > { %2024 = vmatprep.subr.mxu0 %v3221_v63  ;;  %2032 = vmatprep.mubr.msk.f32.mxu0 %vm2388_vm10, %v3221_v63  ;;  %v633_v3 = vld [vmem:[%s3211_s4] sm:$0xff]  ;;  %v2389_v6 = vmov 1966171168   ;;  %v3244_v19 = vld [vmem:[#allocation24_spill] sm:$0xff]  ;;  %v3245_v13 = vld [vmem:[#allocation23_spill] sm:$0xff]  ;;  %s3038_s0 = sshll.u32 %s2374_s24, 3 }
 0x147   : > { %2025 = vmatpush3.msra.mxu0 %v636_v62  ;;  %2035 = vmatprep.subr.mxu1 %v3221_v63  ;;  %v713_v7 = vunpack.c.l.s4 %v2389_v6  ;;  %v2718_v15 = vshrl.u32 %v715_v11, 7  ;;  %v2729_v58 = vld [vmem:[#allocation8] ss:$0 sm:$0xff]  ;;  %v3246_v28 = vld [vmem:[#allocation28_spill] sm:$0xff]  ;;  %v3251_v46 = vld [vmem:[#allocation35_spill] sm:$0xff]  ;;  %s1469_s22 = scalar_lea.vmem [#allocation2], %s3038_s0 }
 0x148   : > { %2026 = vmatprep.subr.mxu0 %v3221_v63  ;;  %2043 = vmatprep.mubr.msk.f32.mxu1 %vm2388_vm10, %v3221_v63  ;;  %v3247_v25 = vld [vmem:[#allocation26_spill] sm:$0xff]  ;;  %v3248_v37 = vld [vmem:[#allocation32_spill] sm:$0xff]  ;;  %v3253_v42 = vld [vmem:[#allocation33_spill] sm:$0xff]  ;;  %s2391_s10 = smov 32   ;;  %s1834_s23 = scalar_lea.vmem [#allocation15], %s3038_s0 }
 0x149   : > { %2027 = vmatpush3.msra.mxu0 %v635_v1  ;;  %v714_v12 = vunpack.c.0.s8 %v713_v7  ;;  %v2722_v32 = vsub.s32 0, %v2718_v15  ;;  %v3249_v34 = vld [vmem:[#allocation30_spill] sm:$0xff]  ;;  %v3250_v48 = vld [vmem:[#allocation36_spill] sm:$0xff]  ;;  %v3254_v26 = vld [vmem:[#allocation27_spill] sm:$0xff]  ;;  %s2392_s9 = smov 64   ;;  %s2393_s28 = smov 96  }
 0x14a   : > { %2028 = vmatprep.subr.mxu0 %v3221_v63  ;;  %v3252_v44 = vld [vmem:[#allocation34_spill] sm:$0xff]  ;;  %v3255_v20 = vld [vmem:[#allocation25_spill] sm:$0xff]  ;;  %v3256_v35 = vld [vmem:[#allocation31_spill] sm:$0xff]  ;;  %s1752_s29 = scalar_lea.vmem [#allocation14], %s3038_s0  ;;  %s630_s24 = sadd.s32 1, %s2374_s24  }
 0x14b   : > { %2029 = vmatpush3.msra.mxu0 %v634_v2  ;;  %v717_v18 = vsub.s32 %v714_v12, %v2718_v15  ;;  %v3257_v31 = vld [vmem:[#allocation29_spill] sm:$0xff]  ;;  %p627_p7 = scmp.ge.s32.totalorder %s630_s24, 7  }
 0x14c   : > { %2030 = vmatprep.subr.mxu0 %v3221_v63  ;;  %s2394_s15 = smov (%p627_p7), [#allocation14]   ;;  %s2395_s17 = smov (%p627_p7), [#allocation15]  }
 0x14d   : > { %2031 = vmatpush3.msra.mxu0 %v633_v3  ;;  %s1845_s16 = sshll.u32 (%p627_p7), %s2394_s15, 4  ;;  %s1857_s2 = sshll.u32 (%p627_p7), %s2395_s17, 4  ;;  %s1846_s16 = int_to_ptr.vmem [resolvable:$true] %s1845_s16  ;;  %s1858_s2 = int_to_ptr.vmem [resolvable:$true] %s1857_s2 }
 0x14e   : > { %2033 = vmatmul.mubr.msk.f32.vlgmr.msra.gmra.mxu0 %vm159_vm0, %v2370_v56  ;;  %2046 = vmatprep.subr.mxu0 %v3221_v63  ;;  %s2300_s8 = scalar_lea.vmem (%p627_p7), %s1846_s16, 1024  ;;  %p2305_p9 = scmp.lt.s32.totalorder (%p627_p7), %s1846_s16, %s1846_s16 }
 0x14f   : > { %2050 = vmatprep.mubr.msk.f32.mxu0 %vm2388_vm10, %v3221_v63  ;;  %p2301_p8 = scmp.ne.s32.totalorder (%p627_p7), %s1846_s16, %s2300_s8  ;;  %p2306_p10 = scmp.lt.s32.totalorder (%p627_p7), %s2300_s8, %s2300_s8 }
 0x151   :  { %p2307_p11 = por (%p627_p7), %p2306_p10, %p2305_p9 }
 0x153   :  { %p2308_p12 = pnand (%p627_p7), %p2307_p11, %p2301_p8 }
 0x20e   : > { %v706_v21 = vpop.f32.mrf.mxu0 }
 0x20f   : > { %v711_v22 = vcombine.high %v706_v21, %v706_v21  ;;  %v718_v0 = vrot.slane %v706_v21, %v717_v18 }
 0x210   : > { %v2034_v27 = vpop.f32.mrf.mxu0 }
 0x211   : > { %v725_v33 = vrot.slane %v711_v22, %v717_v18  ;;  %v726_v36 = vcombine.high %v718_v0, %v718_v0  ;;  %v734_v38 = vrot.slane %v718_v0, %v717_v18 }
 0x213   : > { %v741_v43 = vrot.slane %v725_v33, %v717_v18  ;;  %v748_v45 = vrot.slane %v726_v36, %v717_v18  ;;  %v756_v47 = vcombine.high %v734_v38, %v734_v38  ;;  %v763_v49 = vrot.slane %v734_v38, %v2722_v32 }
 0x214   : > { %v727_v2 = vcombine.high %v725_v33, %v725_v33 }
 0x215   : > { %v767_v52 = vrot.slane %v748_v45, %v2722_v32  ;;  %v771_v53 = vrot.slane %v756_v47, %v2722_v32  ;;  %v800_v55 = vadd.f32 %v763_v49, %v3244_v19  ;;  %v801_v57 = vadd.f32 %v763_v49, %v3245_v13 }
 0x216   : > { %v779_v1 = vrot.slane %v741_v43, %v2722_v32  ;;  %v758_v0 = vcombine.high %v748_v45, %v748_v45 }
 0x217   : > { %v802_v59 = vadd.f32 %v767_v52, %v3246_v28  ;;  %v803_v61 = vadd.f32 %v767_v52, %v3247_v25  ;;  %v804_v62 = vadd.f32 %v771_v53, %v3248_v37  ;;  %v816_v3 = vmax.f32 %v800_v55, 0.0 }
 0x218   : > { %v817_v6 = vmax.f32 %v801_v57, 0.0  ;;  %v805_v21 = vadd.f32 %v771_v53, %v3249_v34  ;;  %v808_v38 = vadd.f32 %v779_v1, %v3250_v48  ;;  %v755_v52 = vrot.slane %v727_v2, %v717_v18 }
 0x219   : > { %v818_v7 = vmax.f32 %v802_v59, 0.0  ;;  %v819_v12 = vmax.f32 %v803_v61, 0.0  ;;  %v839_v22 = vmul.f32 %v2729_v58, %v816_v3  ;;  %v820_v36 = vmax.f32 %v804_v62, 0.0 }
 0x21a   : > { %v840_v49 = vmul.f32 %v2729_v58, %v817_v6  ;;  %v821_v57 = vmax.f32 %v805_v21, 0.0  ;;  %v809_v53 = vadd.f32 %v779_v1, %v3251_v46  ;;  %v775_v45 = vrot.slane %v758_v0, %v2722_v32 }
 0x21b   : > { %v841_v27 = vmul.f32 %v2729_v58, %v818_v7  ;;  %v855_v47 = vsel %vm623_vm1, %v839_v22, 0.0  ;;  %v842_v55 = vmul.f32 %v2729_v58, %v819_v12  ;;  %v843_v59 = vmul.f32 %v2729_v58, %v820_v36 }
 0x21c   : > { %856 = vadd.xlane.f32.xlu0 %v855_v47  ;;  %v824_v61 = vmax.f32 %v808_v38, 0.0  ;;  %v858_v62 = vsel %vm623_vm1, %v840_v49, 0.0  ;;  %v806_v3 = vadd.f32 %v775_v45, %v3252_v44  ;;  %v783_v18 = vrot.slane %v755_v52, %v2722_v32 }
 0x21d   : > { %v861_v33 = vsel %vm623_vm1, %v841_v27, 0.0  ;;  %v757_v2 = vcombine.high %v741_v43, %v741_v43  ;;  %v864_v6 = vsel %vm623_vm1, %v842_v55, 0.0  ;;  %v844_v7 = vmul.f32 %v2729_v58, %v821_v57 }
 0x21e   : > { %862 = vadd.xlane.f32.xlu1 %v861_v33  ;;  %v825_v12 = vmax.f32 %v809_v53, 0.0  ;;  %v807_v1 = vadd.f32 %v775_v45, %v3253_v42  ;;  %v867_v21 = vsel %vm623_vm1, %v843_v59, 0.0  ;;  %v847_v22 = vmul.f32 %v2729_v58, %v824_v61 }
 0x21f   : > { %v822_v0 = vmax.f32 %v806_v3, 0.0  ;;  %v810_v27 = vadd.f32 %v783_v18, %v2671_v54  ;;  %v787_v36 = vrot.slane %v757_v2, %v2722_v32  ;;  %v759_v38 = vcombine.high %v755_v52, %v755_v52 }
 0x220   : > { %859 = vadd.xlane.f32.xlu0 %v858_v62  ;;  %v870_v43 = vsel %vm623_vm1, %v844_v7, 0.0  ;;  %v848_v47 = vmul.f32 %v2729_v58, %v825_v12  ;;  %v823_v49 = vmax.f32 %v807_v1, 0.0  ;;  %v811_v33 = vadd.f32 %v783_v18, %v2669_v50 }
 0x221   : > { %v879_v55 = vsel %vm623_vm1, %v847_v22, 0.0  ;;  %v845_v57 = vmul.f32 %v2729_v58, %v822_v0  ;;  %v826_v53 = vmax.f32 %v810_v27, 0.0  ;;  %v812_v45 = vadd.f32 %v787_v36, %v3254_v26 }
 0x222   : > { %865 = vadd.xlane.f32.xlu1 %v864_v6  ;;  %v791_v59 = vrot.slane %v759_v38, %v2722_v32  ;;  %v882_v52 = vsel %vm623_vm1, %v848_v47, 0.0  ;;  %v846_v61 = vmul.f32 %v2729_v58, %v823_v49  ;;  %v827_v62 = vmax.f32 %v811_v33, 0.0 }
 0x223   : > { %v813_v3 = vadd.f32 %v787_v36, %v3255_v20  ;;  %v873_v18 = vsel %vm623_vm1, %v845_v57, 0.0  ;;  %v849_v2 = vmul.f32 %v2729_v58, %v826_v53  ;;  %v828_v6 = vmax.f32 %v812_v45, 0.0 }
 0x224   : > { %868 = vadd.xlane.f32.xlu0 %v867_v21  ;;  %v814_v7 = vadd.f32 %v791_v59, %v3256_v35  ;;  %v876_v12 = vsel %vm623_vm1, %v846_v61, 0.0  ;;  %v850_v1 = vmul.f32 %v2729_v58, %v827_v62  ;;  %v815_v22 = vadd.f32 %v791_v59, %v3257_v31 }
 0x225   : > { %v829_v21 = vmax.f32 %v813_v3, 0.0  ;;  %v885_v0 = vsel %vm623_vm1, %v849_v2, 0.0  ;;  %v851_v27 = vmul.f32 %v2729_v58, %v828_v6 }
 0x226   : > { %871 = vadd.xlane.f32.xlu1 %v870_v43  ;;  %v830_v36 = vmax.f32 %v814_v7, 0.0  ;;  %v888_v38 = vsel %vm623_vm1, %v850_v1, 0.0  ;;  %v831_v47 = vmax.f32 %v815_v22, 0.0 }
 0x227   : > { %v852_v43 = vmul.f32 %v2729_v58, %v829_v21  ;;  %v891_v49 = vsel %vm623_vm1, %v851_v27, 0.0 }
 0x228   : > { %880 = vadd.xlane.f32.xlu0 %v879_v55  ;;  %v853_v33 = vmul.f32 %v2729_v58, %v830_v36  ;;  %v854_v57 = vmul.f32 %v2729_v58, %v831_v47  ;;  %v920_v58 = vand.u32 127, %v715_v11 }
 0x229   : > { %v894_v55 = vsel %vm623_vm1, %v852_v43, 0.0 }
 0x22a   : > { %883 = vadd.xlane.f32.xlu1 %v882_v52  ;;  %v897_v53 = vsel %vm623_vm1, %v853_v33, 0.0  ;;  %v900_v45 = vsel %vm623_vm1, %v854_v57, 0.0  ;;  %v925_v2 = vadd.s32 4294967288, %v920_v58  ;;  %v2807_v22 = vsub.s32 %v920_v58, %v2718_v15 }
 0x22c   : > { %874 = vadd.xlane.f32.xlu0 %v873_v18 }
 0x22e   : > { %877 = vadd.xlane.f32.xlu1 %v876_v12  ;;  %v2800_v12 = vsub.s32 %v925_v2, %v2718_v15 }
 0x230   : > { %886 = vadd.xlane.f32.xlu0 %v885_v0 }
 0x232   : > { %889 = vadd.xlane.f32.xlu1 %v888_v38 }
 0x234   : > { %892 = vadd.xlane.f32.xlu0 %v891_v49 }
 0x236   : > { %895 = vadd.xlane.f32.xlu1 %v894_v55 }
 0x238   : > { %898 = vadd.xlane.f32.xlu0 %v897_v53 }
 0x23a   : > { %901 = vadd.xlane.f32.xlu1 %v900_v45 }
 0x2a5   : > { %v2782_v59 = vpop.xlane.xlu0 %856 }
 0x2a6   : > { %v924_v33 = vrot.slane %v2782_v59, %v2807_v22 }
 0x2a7   : > { %v2784_v52 = vpop.xlane.xlu1 %862 }
 0x2a8   : > { %v935_v27 = vrot.slane %v2784_v52, %v2807_v22 }
 0x2a9   : > { %v2786_v61 = vpop.xlane.xlu0 %859 }
 0x2aa   : > { %v929_v36 = vrot.slane %v2786_v61, %v2800_v12 }
 0x2ab   : > { %v2788_v62 = vpop.xlane.xlu1 %865 }
 0x2ac   : > { %v939_v0 = vrot.slane %v2788_v62, %v2800_v12  ;;  %v931_v45 = vsel %vm930_vm11, %v929_v36, %v924_v33 }
 0x2ad   : > { %v2790_v3 = vpop.xlane.xlu0 %868 }
 0x2ae   : > { %v944_v47 = vrot.slane %v2790_v3, %v2807_v22  ;;  %v940_v55 = vsel %vm930_vm11, %v939_v0, %v935_v27 }
 0x2af   : > { %v2792_v18 = vpop.xlane.xlu1 %871  ;;  %v995_v0 = vsel %vm453_vm3, %v940_v55, %v931_v45 }
 0x2b0   : > { %v948_v11 = vrot.slane %v2792_v18, %v2800_v12 }
 0x2b1   : > { %v2795_v6 = vpop.xlane.xlu0 %880 }
 0x2b2   : > { %v949_v53 = vsel %vm930_vm11, %v948_v11, %v944_v47  ;;  %v962_v47 = vrot.slane %v2795_v6, %v2807_v22 }
 0x2b3   : > { %v2797_v7 = vpop.xlane.xlu1 %883  ;;  %v996_v36 = vsel %vm455_vm4, %v949_v53, %v995_v0 }
 0x2b4   : > { %v966_v13 = vrot.slane %v2797_v7, %v2800_v12 }
 0x2b5   : > { %v2802_v1 = vpop.xlane.xlu0 %874 }
 0x2b6   : > { %v953_v57 = vrot.slane %v2802_v1, %v2807_v22  ;;  %v967_v55 = vsel %vm930_vm11, %v966_v13, %v962_v47  ;;  %v2390_v13 = vmov 0  }
 0x2b7   : > { %v2804_v21 = vpop.xlane.xlu1 %877  ;;  %2117 = vset.pattern.permute.xlu0 %v2390_v13  ;;  %2116 = vset.pattern.permute.xlu1 %v2390_v13 }
 0x2b8   : > { %v957_v38 = vrot.slane %v2804_v21, %v2800_v12 }
 0x2b9   : > { %v2819_v43 = vpop.xlane.xlu0 %886 }
 0x2ba   : > { %v958_v63 = vsel %vm930_vm11, %v957_v38, %v953_v57  ;;  %v971_v27 = vrot.slane %v2819_v43, %v2807_v22 }
 0x2bb   : > { %v2823_v49 = vpop.xlane.xlu1 %889  ;;  %v997_v33 = vsel %vm457_vm5, %v958_v63, %v996_v36 }
 0x2bc   : > { %v975_v58 = vrot.slane %v2823_v49, %v2800_v12  ;;  %v998_v0 = vsel %vm459_vm6, %v967_v55, %v997_v33  ;;  %v3225_v55 = vsub.s32 2, %v2718_v15 }
 0x2bd   : > { %v893_v2 = vpop.xlane.xlu0 %892 }
 0x2be   : > { %v980_v38 = vrot.slane %v893_v2, %v2807_v22  ;;  %v976_v20 = vsel %vm930_vm11, %v975_v58, %v971_v27 }
 0x2bf   : > { %v2837_v19 = vpop.xlane.xlu1 %895  ;;  %v999_v28 = vsel %vm461_vm7, %v976_v20, %v998_v0 }
 0x2c0   : > { %v984_v11 = vrot.slane %v2837_v19, %v2800_v12 }
 0x2c1   : > { %v899_v57 = vpop.xlane.xlu0 %898 }
 0x2c2   : > { %v985_v45 = vsel %vm930_vm11, %v984_v11, %v980_v38  ;;  %v989_v26 = vrot.slane %v899_v57, %v2807_v22  ;;  %v3227_v11 = vsub.s32 1, %v2718_v15 }
 0x2c3   : > { %v2850_v25 = vpop.xlane.xlu1 %901  ;;  %v1000_v36 = vsel %vm463_vm8, %v985_v45, %v999_v28 }
 0x2c4   : > { %v993_v53 = vrot.slane %v2850_v25, %v2800_v12 }
 0x2c6   : > { %v994_v63 = vsel %vm930_vm11, %v993_v53, %v989_v26  ;;  %v3224_v26 = vsub.s32 5, %v2718_v15  ;;  %v3223_v53 = vsub.s32 6, %v2718_v15 }
 0x2c7   : > { %v1001_v58 = vsel %vm465_vm9, %v994_v63, %v1000_v36 }
 0x2c8   : > { %v1003_v27 = vsel %vm623_vm1, %v1001_v58, -inf }
 0x2c9   : > { %1004 = vmax.xlane.f32.xlu0 %v1003_v27 }
 0x352   : > { %v1005_v47 = vpop.xlane.xlu0 %1004 }
 0x353   : > { %v1010_v38 = vrot.slane %v1005_v47, %v2722_v32  ;;  %v1014_v20 = vrot.slane %v1005_v47, %v3227_v11  ;;  %v2875_v0 = vrot.slane %v1005_v47, %v3224_v26  ;;  %v1018_v58 = vrot.slane %v1005_v47, %v3225_v55 }
 0x354   : > { %v3229_v55 = vsub.s32 4, %v2718_v15 }
 0x355   : > { %v1047_v28 = vsub.f32 %v2782_v59, %v1010_v38  ;;  %v1048_v33 = vsub.f32 %v2786_v61, %v1010_v38  ;;  %v1049_v45 = vsub.f32 %v2784_v52, %v1014_v20  ;;  %v1050_v27 = vsub.f32 %v2788_v62, %v1014_v20 }
 0x356   : > { %v3228_v61 = vsub.s32 7, %v2718_v15  ;;  %v1034_v52 = vrot.slane %v1005_v47, %v3223_v53  ;;  %v1057_v13 = vsub.f32 %v2819_v43, %v2875_v0  ;;  %v3226_v38 = vsub.s32 3, %v2718_v15 }
 0x357   : > { %v1063_v63 = vmul.f32 1.442695, %v1047_v28  ;;  %v1065_v36 = vmul.f32 1.442695, %v1048_v33  ;;  %v1067_v59 = vmul.f32 1.442695, %v1049_v45  ;;  %v1051_v28 = vsub.f32 %v2790_v3, %v1018_v58 }
 0x358   : > { %v1069_v33 = vmul.f32 1.442695, %v1050_v27  ;;  %v1038_v62 = vrot.slane %v1005_v47, %v3228_v61  ;;  %v1059_v20 = vsub.f32 %v893_v2, %v1034_v52  ;;  %v1083_v45 = vmul.f32 1.442695, %v1057_v13 }
 0x359   : > { %2118 = vpow2.f32 %v1063_v63  ;;  %v1022_v63 = vrot.slane %v1005_v47, %v3226_v38  ;;  %v1071_v53 = vmul.f32 1.442695, %v1051_v28 }
 0x35a   : > { %2120 = vpow2.f32 %v1065_v36  ;;  %v1052_v36 = vsub.f32 %v2792_v18, %v1018_v58  ;;  %v1061_v26 = vsub.f32 %v899_v57, %v1038_v62  ;;  %v1087_v43 = vmul.f32 1.442695, %v1059_v20 }
 0x35b   : > { %2122 = vpow2.f32 %v1067_v59  ;;  %v1053_v3 = vsub.f32 %v2802_v1, %v1022_v63  ;;  %v1026_v18 = vrot.slane %v1005_v47, %v3229_v55  ;;  %v1054_v57 = vsub.f32 %v2804_v21, %v1022_v63 }
 0x35c   : > { %2124 = vpow2.f32 %v1069_v33  ;;  %v1073_v27 = vmul.f32 1.442695, %v1052_v36  ;;  %v1091_v13 = vmul.f32 1.442695, %v1061_v26 }
 0x35d   : > { %2126 = vpow2.f32 %v1083_v45  ;;  %v1075_v58 = vmul.f32 1.442695, %v1053_v3  ;;  %v1077_v26 = vmul.f32 1.442695, %v1054_v57  ;;  %v1056_v47 = vsub.f32 %v2797_v7, %v1026_v18 }
 0x35e   : > { %2128 = vpow2.f32 %v1071_v53  ;;  %v1055_v53 = vsub.f32 %v2795_v6, %v1026_v18  ;;  %v1058_v6 = vsub.f32 %v2823_v49, %v2875_v0  ;;  %v1062_v49 = vsub.f32 %v2850_v25, %v1038_v62 }
 0x35f   : > { %2130 = vpow2.f32 %v1087_v43  ;;  %v1081_v63 = vmul.f32 1.442695, %v1056_v47  ;;  %v1060_v43 = vsub.f32 %v2837_v19, %v1034_v52 }
 0x360   : > { %2132 = vpow2.f32 %v1073_v27  ;;  %v1079_v21 = vmul.f32 1.442695, %v1055_v53  ;;  %v1085_v3 = vmul.f32 1.442695, %v1058_v6  ;;  %v1093_v18 = vmul.f32 1.442695, %v1062_v49 }
 0x361   : > { %2134 = vpow2.f32 %v1091_v13  ;;  %v1089_v0 = vmul.f32 1.442695, %v1060_v43 }
 0x362   : > { %2136 = vpow2.f32 %v1075_v58 }
 0x363   : > { %2138 = vpow2.f32 %v1077_v26 }
 0x364   : > { %2140 = vpow2.f32 %v1079_v21 }
 0x365   : > { %2142 = vpow2.f32 %v1081_v63 }
 0x366   : > { %v2894_v59 = vpop.eup %2118  ;;  %2144 = vpow2.f32 %v1085_v3 }
 0x367   : > { %v2896_v2 = vpop.eup %2120  ;;  %1112 = vperm.xlu1 %2116, %v2894_v59   ;;  %2146 = vpow2.f32 %v1089_v0 }
 0x368   : > { %1115 = vperm.xlu0 %2117, %v2896_v2   ;;  %v2903_v1 = vpop.eup %2122  ;;  %2148 = vpow2.f32 %v1093_v18 }
 0x369   : > { %v2907_v28 = vpop.eup %2124 }
 0x36a   : > { %v2910_v33 = vpop.eup %2126 }
 0x36b   : > { %1118 = vperm.xlu1 %2116, %v2903_v1   ;;  %v2914_v20 = vpop.eup %2128 }
 0x36c   : > { %1142 = vperm.xlu0 %2117, %v2910_v33   ;;  %v2917_v45 = vpop.eup %2130 }
 0x36d   : > { %v2922_v36 = vpop.eup %2132 }
 0x36e   : > { %v2925_v7 = vpop.eup %2134 }
 0x36f   : > { %1121 = vperm.xlu1 %2116, %v2907_v28   ;;  %v2929_v27 = vpop.eup %2136 }
 0x370   : > { %1148 = vperm.xlu0 %2117, %v2917_v45   ;;  %v2933_v13 = vpop.eup %2138 }
 0x371   : > { %v2936_v57 = vpop.eup %2140 }
 0x372   : > { %v2939_v19 = vpop.eup %2142 }
 0x373   : > { %1124 = vperm.xlu1 %2116, %v2914_v20   ;;  %v2942_v52 = vpop.eup %2144 }
 0x374   : > { %1154 = vperm.xlu0 %2117, %v2925_v7   ;;  %v2945_v25 = vpop.eup %2146 }
 0x375   : > { %v2948_v62 = vpop.eup %2148 }
 0x377   : > { %1127 = vperm.xlu1 %2116, %v2922_v36  }
 0x37b   : > { %1130 = vperm.xlu1 %2116, %v2929_v27  }
 0x37f   : > { %1133 = vperm.xlu1 %2116, %v2933_v13  }
 0x383   : > { %1136 = vperm.xlu1 %2116, %v2936_v57  }
 0x387   : > { %1139 = vperm.xlu1 %2116, %v2939_v19  }
 0x38b   : > { %1145 = vperm.xlu1 %2116, %v2942_v52  }
 0x38f   : > { %1151 = vperm.xlu1 %2116, %v2945_v25  }
 0x393   : > { %1157 = vperm.xlu1 %2116, %v2948_v62  }
 0x3e2   : > { %v1113_v58 = vpop.permute.xlu1 %1112 }
 0x3e3   : > { %v1116_v63 = vpop.permute.xlu0 %1115  ;;  %v1162_v31 = vrot.slane %v1113_v58, %v2807_v22 }
 0x3e4   : > { %v1166_v55 = vrot.slane %v1116_v63, %v2800_v12 }
 0x3e6   : > { %v1119_v53 = vpop.permute.xlu1 %1118  ;;  %v1167_v58 = vsel %vm930_vm11, %v1166_v55, %v1162_v31 }
 0x3e7   : > { %v1143_v49 = vpop.permute.xlu0 %1142  ;;  %v1171_v34 = vrot.slane %v1119_v53, %v2807_v22 }
 0x3e8   : > { %v1207_v53 = vrot.slane %v1143_v49, %v2807_v22 }
 0x3ea   : > { %v1122_v26 = vpop.permute.xlu1 %1121 }
 0x3eb   : > { %v1175_v18 = vrot.slane %v1122_v26, %v2800_v12  ;;  %v1149_v38 = vpop.permute.xlu0 %1148 }
 0x3ed   : > { %v1176_v44 = vsel %vm930_vm11, %v1175_v18, %v1171_v34 }
 0x3ee   : > { %v1125_v47 = vpop.permute.xlu1 %1124  ;;  %v1231_v34 = vsel %vm453_vm3, %v1176_v44, %v1167_v58 }
 0x3ef   : > { %v1180_v37 = vrot.slane %v1125_v47, %v2807_v22 }
 0x3f2   : > { %v1128_v21 = vpop.permute.xlu1 %1127 }
 0x3f3   : > { %v1184_v11 = vrot.slane %v1128_v21, %v2800_v12 }
 0x3f5   : > { %v1185_v21 = vsel %vm930_vm11, %v1184_v11, %v1180_v37 }
 0x3f6   : > { %v1131_v6 = vpop.permute.xlu1 %1130  ;;  %v1232_v11 = vsel %vm455_vm4, %v1185_v21, %v1231_v34 }
 0x3f7   : > { %v1189_v26 = vrot.slane %v1131_v6, %v2807_v22  ;;  %v1155_v6 = vpop.permute.xlu0 %1154 }
 0x3fa   : > { %v1134_v43 = vpop.permute.xlu1 %1133 }
 0x3fb   : > { %v1193_v35 = vrot.slane %v1134_v43, %v2800_v12 }
 0x3fd   : > { %v1194_v43 = vsel %vm930_vm11, %v1193_v35, %v1189_v26  ;;  %v1225_v35 = vrot.slane %v1155_v6, %v2807_v22 }
 0x3fe   : > { %v1137_v3 = vpop.permute.xlu1 %1136  ;;  %v1233_v55 = vsel %vm457_vm5, %v1194_v43, %v1232_v11 }
 0x3ff   : > { %v1198_v63 = vrot.slane %v1137_v3, %v2807_v22 }
 0x402   : > { %v1140_v0 = vpop.permute.xlu1 %1139 }
 0x403   : > { %v1202_v42 = vrot.slane %v1140_v0, %v2800_v12  ;;  %v1216_v0 = vrot.slane %v1149_v38, %v2807_v22 }
 0x406   : > { %v1146_v61 = vpop.permute.xlu1 %1145 }
 0x407   : > { %v1211_v46 = vrot.slane %v1146_v61, %v2800_v12  ;;  %v1203_v61 = vsel %vm930_vm11, %v1202_v42, %v1198_v63  ;;  %v3258_v63 = vsub.s32 4, %v2718_v15 }
 0x408   : > { %v1234_v38 = vsel %vm459_vm6, %v1203_v61, %v1233_v55 }
 0x409   : > { %v1212_v37 = vsel %vm930_vm11, %v1211_v46, %v1207_v53 }
 0x40a   : > { %v1152_v48 = vpop.permute.xlu1 %1151  ;;  %v1235_v44 = vsel %vm461_vm7, %v1212_v37, %v1234_v38  ;;  %v3260_v37 = vsub.s32 1, %v2718_v15 }
 0x40b   : > { %v1220_v47 = vrot.slane %v1152_v48, %v2800_v12 }
 0x40d   : > { %v1221_v31 = vsel %vm930_vm11, %v1220_v47, %v1216_v0  ;;  %v3259_v0 = vsub.s32 7, %v2718_v15 }
 0x40e   : > { %v1158_v3 = vpop.permute.xlu1 %1157  ;;  %v1236_v42 = vsel %vm463_vm8, %v1221_v31, %v1235_v44  ;;  %v3264_v44 = vsub.s32 6, %v2718_v15 }
 0x40f   : > { %v1229_v48 = vrot.slane %v1158_v3, %v2800_v12 }
 0x411   : > { %v1230_v49 = vsel %vm930_vm11, %v1229_v48, %v1225_v35  ;;  %v3263_v48 = vsub.s32 5, %v2718_v15 }
 0x412   : > { %v1237_v46 = vsel %vm465_vm9, %v1230_v49, %v1236_v42  ;;  %v1473_v42 = vld [vmem:[%s3213_s6 + $0x10] sm:$0xff] }
 0x413   : > { %v1239_v18 = vsel %vm623_vm1, %v1237_v46, 0.0  ;;  %v1470_v46 = vld [vmem:[%s1469_s22] sm:$0xff] }
 0x414   : > { %1240 = vadd.xlane.f32.xlu0 %v1239_v18 }
 0x49d   : > { %v1241_v26 = vpop.xlane.xlu0 %1240 }
 0x49e   : > { %2150 = vrcp.f32 %v1241_v26 }
 0x4ab   : > { %v2151_v21 = vpop.eup %2150 }
 0x4ac   : > { %v1263_v58 = vrot.slane %v2151_v21, %v3258_v63  ;;  %v1247_v53 = vrot.slane %v2151_v21, %v2722_v32  ;;  %v1275_v34 = vrot.slane %v2151_v21, %v3259_v0  ;;  %v1251_v11 = vrot.slane %v2151_v21, %v3260_v37 }
 0x4ad   : > { %v1267_v38 = vrot.slane %v2151_v21, %v3263_v48  ;;  %v1271_v49 = vrot.slane %v2151_v21, %v3264_v44 }
 0x4ae   : > { %v1292_v43 = vmul.f32 %v2936_v57, %v1263_v58  ;;  %v1284_v47 = vmul.f32 %v2894_v59, %v1247_v53  ;;  %v1298_v6 = vmul.f32 %v2925_v7, %v1275_v34  ;;  %v1285_v61 = vmul.f32 %v2896_v2, %v1247_v53 }
 0x4af   : > { %v1286_v32 = vmul.f32 %v2903_v1, %v1251_v11  ;;  %v1287_v57 = vmul.f32 %v2907_v28, %v1251_v11  ;;  %v3261_v59 = vsub.s32 2, %v2718_v15  ;;  %v3262_v2 = vsub.s32 3, %v2718_v15  ;;  %v1472_v15 = vld [vmem:[%s3213_s6 + $0x8] sm:$0xff] }
 0x4b0   : > { %1342 = vperm.xlu0 %2117, %v1292_v43   ;;  %1302 = vperm.xlu1 %2116, %v1284_v47   ;;  %v1293_v28 = vmul.f32 %v2939_v19, %v1263_v58  ;;  %v1299_v19 = vmul.f32 %v2948_v62, %v1275_v34  ;;  %v1474_v62 = vld [vmem:[%s3213_s6 + $0x18] sm:$0xff] }
 0x4b1   : > { %v1255_v3 = vrot.slane %v2151_v21, %v3261_v59  ;;  %v1259_v55 = vrot.slane %v2151_v21, %v3262_v2  ;;  %2047 = vmatpush3.msra.mxu0 %v1472_v15 }
 0x4b3   : > { %v1288_v31 = vmul.f32 %v2914_v20, %v1255_v3  ;;  %v1289_v7 = vmul.f32 %v2922_v36, %v1255_v3  ;;  %v1290_v35 = vmul.f32 %v2929_v27, %v1259_v55  ;;  %v1291_v1 = vmul.f32 %v2933_v13, %v1259_v55 }
 0x4b4   : > { %1372 = vperm.xlu0 %2117, %v1298_v6   ;;  %1307 = vperm.xlu1 %2116, %v1285_v61   ;;  %v1294_v20 = vmul.f32 %v2910_v33, %v1267_v38  ;;  %v1295_v36 = vmul.f32 %v2942_v52, %v1267_v38  ;;  %v1296_v27 = vmul.f32 %v2917_v45, %v1271_v49  ;;  %v1476_v33 = vld [vmem:[%s3213_s6 + $0x28] sm:$0xff]  ;;  %v1475_v52 = vld [vmem:[%s3213_s6 + $0x20] sm:$0xff] }
 0x4b5   : > { %v1297_v13 = vmul.f32 %v2945_v25, %v1271_v49  ;;  %2036 = vmatpush3.msra.mxu1 %v1476_v33  ;;  %v1471_v45 = vld [vmem:[%s3213_s6] sm:$0xff]  ;;  %v3265_v25 = vmov 0.0  }
 0x4b6   : > { %2037 = vmatprep.subr.mxu1 %v3265_v25  ;;  %2048 = vmatprep.subr.mxu0 %v3265_v25 }
 0x4b7   : > { %2038 = vmatpush3.msra.mxu1 %v1475_v52  ;;  %2049 = vmatpush3.msra.mxu0 %v1471_v45 }
 0x4b8   : > { %1312 = vperm.xlu1 %2116, %v1286_v32   ;;  %2039 = vmatprep.subr.mxu1 %v3265_v25 }
 0x4b9   : > { %2040 = vmatpush3.msra.mxu1 %v1474_v62  ;;  %2051 = vmatmul.mubr.msk.f32.vlgmr.msra.gmra.mxu0 %vm623_vm1, %v1470_v46 }
 0x4ba   : > { %2041 = vmatprep.subr.mxu1 %v3265_v25 }
 0x4bb   : > { %2042 = vmatpush3.msra.mxu1 %v1473_v42 }
 0x4bc   : > { %1317 = vperm.xlu1 %2116, %v1287_v57   ;;  %2053 = vmatprep.subr.mxu1 %v3265_v25 }
 0x4c0   : > { %1322 = vperm.xlu1 %2116, %v1288_v31  }
 0x4c4   : > { %1327 = vperm.xlu1 %2116, %v1289_v7  }
 0x4c8   : > { %1332 = vperm.xlu1 %2116, %v1290_v35  }
 0x4cc   : > { %1337 = vperm.xlu1 %2116, %v1291_v1  }
 0x4d0   : > { %1347 = vperm.xlu1 %2116, %v1293_v28  }
 0x4d4   : > { %1352 = vperm.xlu1 %2116, %v1294_v20  }
 0x4d8   : > { %1357 = vperm.xlu1 %2116, %v1295_v36  }
 0x4dc   : > { %1362 = vperm.xlu1 %2116, %v1296_v27  }
 0x4e0   : > { %1367 = vperm.xlu1 %2116, %v1297_v13  }
 0x4e4   : > { %1377 = vperm.xlu1 %2116, %v1299_v19  }
 0x4e8   : > { %1728 = vrot.lane.b32.xlu1 %v2366_v60, %s2391_s10 }
 0x52b   : > { %v3044_v18 = vpop.permute.xlu1 %1302  ;;  %v3070_v11 = vpop.permute.xlu0 %1342 }
 0x52c   : > { %v1380_v47 = vmul.f32 %v3044_v18, %v2509_v4  ;;  %v1388_v38 = vmul.f32 %v3070_v11, %v2562_v39 }
 0x52e   : > { %v1396_v61 = vsel %vm159_vm0, %v1380_v47, 0.0  ;;  %v1432_v15 = vsel %vm159_vm0, %v1388_v38, 0.0  ;;  %v1757_v47 = vrot.slane %v3044_v18, %v2807_v22 }
 0x52f   : > { %v3046_v26 = vpop.permute.xlu1 %1307  ;;  %v3089_v20 = vpop.permute.xlu0 %1372 }
 0x530   : > { %v1381_v43 = vmul.f32 %v3046_v26, %v2511_v5  ;;  %v1394_v45 = vmul.f32 %v3089_v20, %v2546_v23 }
 0x532   : > { %v1397_v34 = vsel %vm159_vm0, %v1381_v43, 0.0  ;;  %v1793_v43 = vrot.slane %v3070_v11, %v2807_v22  ;;  %v1820_v11 = vrot.slane %v3089_v20, %v2807_v22 }
 0x533   : > { %v3048_v21 = vpop.permute.xlu1 %1312  ;;  %v1398_v32 = vadd.f32 %v1397_v34, %v1396_v61 }
 0x534   : > { %v1382_v6 = vmul.f32 %v3048_v21, %v2517_v8 }
 0x535   : > { %v1399_v35 = vrot.slane %v1398_v32, 4 }
 0x536   : > { %v1405_v3 = vsel %vm159_vm0, %v1382_v6, 0.0 }
 0x537   : > { %v3050_v63 = vpop.permute.xlu1 %1317  ;;  %v1400_v33 = vadd.f32 %v1399_v35, %v1398_v32  ;;  %v1761_v32 = vrot.slane %v3046_v26, %v2800_v12 }
 0x538   : > { %v1383_v60 = vmul.f32 %v3050_v63, %v2519_v9 }
 0x539   : > { %v1401_v61 = vrot.slane %v1400_v33, 2 }
 0x53a   : > { %v1406_v57 = vsel %vm159_vm0, %v1383_v60, 0.0 }
 0x53b   : > { %v3052_v58 = vpop.permute.xlu1 %1322  ;;  %v1407_v2 = vadd.f32 %v1406_v57, %v1405_v3  ;;  %v1770_v57 = vrot.slane %v3050_v63, %v2800_v12  ;;  %v1459_v3 = vsel %vm159_vm0, %v1394_v45, 0.0  ;;  %v3119_v20 = vadd.f32 %v1401_v61, %v1400_v33 }
 0x53c   : > { %v1384_v31 = vmul.f32 %v3052_v58, %v2533_v16 }
 0x53d   : > { %v1408_v49 = vrot.slane %v1407_v2, 4 }
 0x53e   : > { %v1414_v36 = vsel %vm159_vm0, %v1384_v31, 0.0 }
 0x53f   : > { %v3054_v53 = vpop.permute.xlu1 %1327  ;;  %v1409_v60 = vadd.f32 %v1408_v49, %v1407_v2 }
 0x540   : > { %v1385_v59 = vmul.f32 %v3054_v53, %v2535_v17  ;;  %v1779_v18 = vrot.slane %v3054_v53, %v2800_v12  ;;  %v1762_v53 = vsel %vm930_vm11, %v1761_v32, %v1757_v47 }
 0x541   : > { %v1410_v63 = vrot.slane %v1409_v60, 2 }
 0x542   : > { %v1415_v1 = vsel %vm159_vm0, %v1385_v59, 0.0 }
 0x543   : > { %v3060_v0 = vpop.permute.xlu1 %1332  ;;  %v1416_v27 = vadd.f32 %v1415_v1, %v1414_v36  ;;  %v1775_v1 = vrot.slane %v3052_v58, %v2807_v22  ;;  %v1411_v45 = vadd.f32 %v1410_v63, %v1409_v60 }
 0x544   : > { %v1386_v28 = vmul.f32 %v3060_v0, %v2552_v29  ;;  %v1784_v58 = vrot.slane %v3060_v0, %v2807_v22 }
 0x545   : > { %v1417_v34 = vrot.slane %v1416_v27, 4 }
 0x546   : > { %v1423_v52 = vsel %vm159_vm0, %v1386_v28, 0.0 }
 0x547   : > { %v3068_v37 = vpop.permute.xlu1 %1337  ;;  %v1418_v28 = vadd.f32 %v1417_v34, %v1416_v27 }
 0x548   : > { %v1387_v7 = vmul.f32 %v3068_v37, %v2554_v30 }
 0x549   : > { %v1419_v47 = vrot.slane %v1418_v28, 2 }
 0x54a   : > { %v1424_v44 = vsel %vm159_vm0, %v1387_v7, 0.0  ;;  %v1766_v7 = vrot.slane %v3048_v21, %v2807_v22  ;;  %v1788_v21 = vrot.slane %v3068_v37, %v2800_v12 }
 0x54b   : > { %v3080_v55 = vpop.permute.xlu1 %1347  ;;  %v1425_v62 = vadd.f32 %v1424_v44, %v1423_v52  ;;  %v1780_v44 = vsel %vm930_vm11, %v1779_v18, %v1775_v1  ;;  %v1420_v63 = vadd.f32 %v1419_v47, %v1418_v28 }
 0x54c   : > { %v1389_v48 = vmul.f32 %v3080_v55, %v2564_v40  ;;  %v1771_v36 = vsel %vm930_vm11, %v1770_v57, %v1766_v7 }
 0x54d   : > { %v1426_v31 = vrot.slane %v1425_v62, 4 }
 0x54e   : > { %v1433_v13 = vsel %vm159_vm0, %v1389_v48, 0.0 }
 0x54f   : > { %v1353_v19 = vpop.permute.xlu1 %1352  ;;  %v1434_v42 = vadd.f32 %v1433_v13, %v1432_v15  ;;  %v1427_v49 = vadd.f32 %v1426_v31, %v1425_v62  ;;  %v1797_v13 = vrot.slane %v3080_v55, %v2800_v12  ;;  %v1789_v62 = vsel %vm930_vm11, %v1788_v21, %v1784_v58 }
 0x550   : > { %v1390_v46 = vmul.f32 %v1353_v19, %v2566_v41  ;;  %v1802_v61 = vrot.slane %v1353_v19, %v2807_v22 }
 0x551   : > { %v1435_v2 = vrot.slane %v1434_v42, 4 }
 0x552   : > { %v1441_v26 = vsel %vm159_vm0, %v1390_v46, 0.0  ;;  %v1826_v46 = vsel %vm453_vm3, %v1771_v36, %v1762_v53 }
 0x553   : > { %v1358_v6 = vpop.permute.xlu1 %1357  ;;  %v1436_v27 = vadd.f32 %v1435_v2, %v1434_v42  ;;  %v1827_v0 = vsel %vm455_vm4, %v1780_v44, %v1826_v46  ;;  %v1428_v42 = vrot.slane %v1427_v49, 2  ;;  %v1421_v46 = vrot.slane %v1420_v63, 1 }
 0x554   : > { %v1391_v59 = vmul.f32 %v1358_v6, %v2574_v51  ;;  %v1806_v33 = vrot.slane %v1358_v6, %v2800_v12  ;;  %v1798_v6 = vsel %vm930_vm11, %v1797_v13, %v1793_v43  ;;  %v1828_v19 = vsel %vm457_vm5, %v1789_v62, %v1827_v0 }
 0x555   : > { %v1437_v57 = vrot.slane %v1436_v27, 2  ;;  %v1829_v1 = vsel %vm459_vm6, %v1798_v6, %v1828_v19 }
 0x556   : > { %v1442_v35 = vsel %vm159_vm0, %v1391_v59, 0.0  ;;  %v1807_v59 = vsel %vm930_vm11, %v1806_v33, %v1802_v61 }
 0x557   : > { %v1443_v48 = vadd.f32 %v1442_v35, %v1441_v26  ;;  %v1363_v38 = vpop.permute.xlu1 %1362  ;;  %v1830_v53 = vsel %vm461_vm7, %v1807_v59, %v1829_v1  ;;  %v1438_v21 = vadd.f32 %v1437_v57, %v1436_v27  ;;  %v1479_v1 = vld [vmem:[%s3213_s6 + $0x40] sm:$0xff] }
 0x558   : > { %v1392_v15 = vmul.f32 %v1363_v38, %v2521_v10  ;;  %v1811_v60 = vrot.slane %v1363_v38, %v2807_v22  ;;  %v1429_v38 = vadd.f32 %v1428_v42, %v1427_v49 }
 0x559   : > { %v1444_v52 = vrot.slane %v1443_v48, 4 }
 0x55a   : > { %v1450_v18 = vsel %vm159_vm0, %v1392_v15, 0.0  ;;  %v1430_v49 = vrot.slane %v1429_v38, 1 }
 0x55b   : > { %v1445_v37 = vadd.f32 %v1444_v52, %v1443_v48  ;;  %v1368_v34 = vpop.permute.xlu1 %1367  ;;  %v1412_v48 = vrot.slane %v1411_v45, 1 }
 0x55c   : > { %v1393_v55 = vmul.f32 %v1368_v34, %v2529_v14  ;;  %v1815_v32 = vrot.slane %v1368_v34, %v2800_v12  ;;  %v1439_v34 = vrot.slane %v1438_v21, 1  ;;  %v1431_v0 = vadd.f32 %v1430_v49, %v1429_v38 }
 0x55d   : > { %v1446_v7 = vrot.slane %v1445_v37, 2  ;;  %v1413_v62 = vadd.f32 %v1412_v48, %v1411_v45 }
 0x55e   : > { %v1451_v31 = vsel %vm159_vm0, %v1393_v55, 0.0  ;;  %v1816_v26 = vsel %vm930_vm11, %v1815_v32, %v1811_v60  ;;  %v1440_v6 = vadd.f32 %v1439_v34, %v1438_v21 }
 0x55f   : > { %v1452_v2 = vadd.f32 %v1451_v31, %v1450_v18  ;;  %v1378_v35 = vpop.permute.xlu1 %1377  ;;  %v1831_v44 = vsel %vm463_vm8, %v1816_v26, %v1830_v53  ;;  %v1447_v28 = vadd.f32 %v1446_v7, %v1445_v37 }
 0x560   : > { %v1395_v22 = vmul.f32 %v1378_v35, %v2548_v24  ;;  %v1824_v43 = vrot.slane %v1378_v35, %v2800_v12  ;;  %v1403_v12 = vrot.slane %v3119_v20, 1  ;;  %v1480_v35 = vld [vmem:[%s3213_s6 + $0x48] sm:$0xff] }
 0x561   : > { %v1453_v36 = vrot.slane %v1452_v2, 4  ;;  %v1448_v55 = vrot.slane %v1447_v28, 1 }
 0x562   : > { %v1460_v13 = vsel %vm159_vm0, %v1395_v22, 0.0  ;;  %v1825_v52 = vsel %vm930_vm11, %v1824_v43, %v1820_v11  ;;  %v1422_v11 = vadd.f32 %v1421_v46, %v1420_v63  ;;  %v1404_v37 = vadd.f32 %v1403_v12, %v3119_v20  ;;  %v1478_v22 = vld [vmem:[%s3213_s6 + $0x38] sm:$0xff]  ;;  %v1477_v43 = vld [vmem:[%s3213_s6 + $0x30] sm:$0xff] }
 0x563   : > { %v1454_v58 = vadd.f32 %v1453_v36, %v1452_v2  ;;  %v1461_v33 = vadd.f32 %v1460_v13, %v1459_v3  ;;  %v1832_v15 = vsel %vm465_vm9, %v1825_v52, %v1831_v44  ;;  %v1449_v60 = vadd.f32 %v1448_v55, %v1447_v28  ;;  %v1920_v13 = vld [vmem:[#allocation10] ss:$0 sm:$0xff] }
 0x564   : > { %1835 = vst.msk [vmem:[%s1834_s23] sm:$0xff] %vm623_vm1, %v1832_v15  ;;  %v1489_v59 = vsel %vm453_vm3, %v1413_v62, %v1404_v37 }
 0x565   : > { %v1455_v47 = vrot.slane %v1454_v58, 2  ;;  %v1462_v27 = vrot.slane %v1461_v33, 4  ;;  %v1490_v31 = vsel %vm455_vm4, %v1422_v11, %v1489_v59 }
 0x566   : > { %v1491_v45 = vsel %vm457_vm5, %v1431_v0, %v1490_v31 }
 0x567   : > { %v1463_v61 = vadd.f32 %v1462_v27, %v1461_v33  ;;  %v1456_v32 = vadd.f32 %v1455_v47, %v1454_v58  ;;  %v1492_v7 = vsel %vm459_vm6, %v1440_v6, %v1491_v45  ;;  %v1729_v47 = vpop.permute.xlu1 %1728 }
 0x568   : > { %v1493_v26 = vsel %vm461_vm7, %v1449_v60, %v1492_v7 }
 0x569   : > { %v1464_v3 = vrot.slane %v1463_v61, 2  ;;  %v1457_v42 = vrot.slane %v1456_v32, 1 }
 0x56b   : > { %v1465_v57 = vadd.f32 %v1464_v3, %v1463_v61  ;;  %v1458_v18 = vadd.f32 %v1457_v42, %v1456_v32 }
 0x56d   : > { %v1466_v19 = vrot.slane %v1465_v57, 1  ;;  %v1494_v20 = vsel %vm463_vm8, %v1458_v18, %v1493_v26 }
 0x56f   : > { %v1467_v2 = vadd.f32 %v1466_v19, %v1465_v57 }
 0x571   : > { %v1495_v63 = vsel %vm465_vm9, %v1467_v2, %v1494_v20 }
 0x572   : > { %2044 = vmatmul.mubr.msk.f32.vlgmr.msra.gmra.mxu1 %vm159_vm0, %v1495_v63 }
 0x573   : > { %2054 = vmatpush3.msra.mxu1 %v1480_v35  ;;  %2061 = vmatprep.mubr.msk.f32.mxu1 %vm2388_vm10, %v3265_v25 }
 0x574   : > { %2055 = vmatprep.subr.mxu1 %v3265_v25 }
 0x575   : > { %2056 = vmatpush3.msra.mxu1 %v1479_v1 }
 0x576   : > { %2057 = vmatprep.subr.mxu1 %v3265_v25 }
 0x577   : > { %2058 = vmatpush3.msra.mxu1 %v1478_v22 }
 0x578   : > { %2059 = vmatprep.subr.mxu1 %v3265_v25 }
 0x579   : > { %2060 = vmatpush3.msra.mxu1 %v1477_v43  ;;  %v1637_v48 = vpop.f32.mrf.mxu0 }
 0x57a   : > { %2062 = vmatmul.mubr.msk.f32.vlgmr.msra.gmra.mxu1 %vm159_vm0, %v2370_v56 }
 0x57b   : > { %v2052_v38 = vpop.f32.mrf.mxu0 }
 0x632   : > { %v1564_v53 = vpop.f32.mrf.mxu1 }
 0x633   : > { %v1638_v21 = vadd.f32 %v1637_v48, %v1564_v53 }
 0x634   : > { %v2045_v36 = vpop.f32.mrf.mxu1 }
 0x63a   : > { %v1707_v44 = vpop.f32.mrf.mxu1 }
 0x63b   : > { %v1711_v52 = vadd.f32 %v1707_v44, %v1638_v21 }
 0x63c   : > { %v2063_v28 = vpop.f32.mrf.mxu1 }
 0x63d   : > { %v1719_v58 = vadd.f32 %v1920_v13, %v1711_v52 }
 0x63f   : > { %2152 = vtanh.f32 %v1719_v58  ;;  %v1921_v15 = vmul.f32 -1.442695, %v1719_v58 }
 0x641   : > { %2154 = vpow2.f32 %v1921_v15 }
 0x64c   : > { %v2153_v33 = vpop.eup %2152 }
 0x64d   : > { %1733 = vrot.lane.b32.xlu0 %v2153_v33, %s2392_s9 }
 0x64e   : > { %v2155_v25 = vpop.eup %2154 }
 0x64f   : > { %v1723_v46 = vadd.f32 1.0, %v2155_v25 }
 0x651   : > { %2156 = vrcp.f32 %v1723_v46 }
 0x65e   : > { %v2157_v56 = vpop.eup %2156 }
 0x65f   : > { %v1731_v27 = vmul.f32 %v2157_v56, %v1729_v47 }
 0x6bf   : > { %v1734_v12 = vpop.permute.xlu0 %1733 }
 0x6c0   : > { %v1736_v49 = vmul.f32 %v2157_v56, %v1734_v12 }
 0x6c2   : > { %1738 = vrot.lane.b32.xlu0 %v1736_v49, %s2391_s10 }
 0x734   : > { %v1739_v34 = vpop.permute.xlu0 %1738 }
 0x735   : > { %v1741_v62 = vadd.f32 %v1739_v34, %v1731_v27 }
 0x737   : > { %2158 = vtanh.f32 %v1741_v62 }
 0x744   : > { %v2159_v61 = vpop.eup %2158 }
 0x745   : > { %1744 = vrot.lane.b32.xlu1 %v2159_v61, %s2392_s9 }
 0x749   : > { %1837 = vrot.lane.b32.xlu1 %v1741_v62, %s2393_s28 }
 0x7b7   : > { %v1745_v55 = vpop.permute.xlu1 %1744 }
 0x7b8   : > { %v1747_v32 = vmul.f32 %v2157_v56, %v1745_v55 }
 0x7ba   : > { %1749 = vrot.lane.b32.xlu0 %v1747_v32, %s2391_s10 }
 0x7bb   : > { %v1838_v60 = vpop.permute.xlu1 %1837  }
 0x829   :  { %629 = sbr.rel (!%p627_p7) target bundleno = 325 (0x145), region = 116 }
 0x82c   : > { %v1750_v56 = vpop.permute.xlu0 %1749  }
 0x82d   : > { %1753 = vst.msk [vmem:[%s1752_s29] sm:$0xff] %vm159_vm0, %v1750_v56 }
 0x82e   :  { %2311 = shalt.err (!%p2308_p12)
}
 0x82f   :  { %1851 = dma.vmem_to_hbm [thread:$0]  %s1846_s16, 1024, %s3219_s12, [#allocation4], %s2378_s30, %s2378_s30, %s2379_s14  }
 0x830   :  { %s2320_s4 = scalar_lea.vmem %s1858_s2, 1024  ;;  %p2325_p0 = scmp.lt.s32.totalorder %s1858_s2, %s1858_s2 }
 0x831   :  { %p2321_p13 = scmp.ne.s32.totalorder %s1858_s2, %s2320_s4  ;;  %p2326_p1 = scmp.lt.s32.totalorder %s2320_s4, %s2320_s4 }
 0x833   :  { %p2327_p2 = por %p2326_p1, %p2325_p0 }
 0x835   :  { %p2328_p3 = pnand %p2327_p2, %p2321_p13 }
 0x837   :  { %2331 = shalt.err (!%p2328_p3)
}
 0x838   :  { %1863 = dma.vmem_to_hbm [thread:$0]  %s1858_s2, 1024, %s3220_s13, [#allocation16], %s2378_s30, %s2378_s30, %s2379_s14  }
 0x839   :  { %2360 = dma.done.wait [#allocation4], 1024  }
 0x83a   :  { %2361 = vsyncadd [#allocation4], 4294966272 }
 0x83b   :  { %2362 = dma.done.wait [#allocation16], 1024  }
 0x83c   :  { %2363 = vsyncadd [#allocation16], 4294966272 }
 0x83d   :  { %1870 = vsyncpa [#allocation3], 1 }
 0x83e   :  { %1871 = vsyncpa [#allocation6], 1 }
 0x83f   :  { %1872 = vsyncpa [#allocation9], 1 }
 0x840   :  { %1873 = vsyncpa [#allocation12], 1 }
 0x841   :  { %1874 = vsyncpa [#allocation4], 1 }
 0x842   :  { %1875 = vsyncpa [#allocation16], 1 }

</bundles_post_ra>
